<compile_context>
chip_gen: v7x
topology: tpu7x:2x2x1
jax: 0.10.0
libtpu: 0.0.40
codegen_flags: <defaults>
</compile_context>

<pallas_src>
import numpy as np
import jax
import jax.numpy as jnp
from jax.experimental import pallas as pl
from jax.experimental.pallas import tpu as pltpu

# ----------------------------- config (small) --------------------------------
CHANNELS = 4
HIDDEN = 32
KERNEL_SIZE = 5
DILATION_RATE = (1, 2, 1, 2)   # len == N_FLOWS (per-flow dilation base)
N_LAYERS = 2
N_FLOWS = 4
GIN_CHANNELS = 0               # no conditioning -> g=None
B = 2
T = 16
HALF = CHANNELS // 2

assert N_LAYERS >= 2
assert len(DILATION_RATE) == N_FLOWS

# Matmul operand dtype: set to jnp.bfloat16 on v6e/v7x for 2x MXU rate (loosen the
# test tolerance accordingly).  float32 keeps the check against the reference tight.
MATMUL_DTYPE = jnp.float32


# ------------------------------ Pallas kernel --------------------------------
def make_block_kernel(x1_high_flags):
    """All N_FLOWS (coupling + flip) fused; one batch element per grid step.

    Layout: channels / HIDDEN on sublanes (contraction axis), time on lanes.
    `x1_high_flags[f]` says whether flow f's x1 half lives in the high stored rows
    (the Flip permutation itself is baked into the pre/post weights).
    """

    def mdot(w, x):
        return jnp.dot(w.astype(MATMUL_DTYPE), x.astype(MATMUL_DTYPE),
                       preferred_element_type=jnp.float32)

    def kernel(x_ref, mask_ref, pre_w_ref, pre_b_ref, in_w_ref, in_b_ref,
               rs_w_ref, rs_b_ref, post_w_ref, post_b_ref, out_ref):
        s = x_ref[...]                                    # (C, T) stored-channel order
        mask = mask_ref[...]                              # (1, T)
        # hoisted mask broadcasts (reused by every flow / layer)
        mask_h = jnp.broadcast_to(mask, (HIDDEN, T))
        mask_c = jnp.broadcast_to(mask, (CHANNELS, T))

        # which stored rows hold the x1 half -- built from an iota, so nothing is
        # captured as an array constant.
        ch = jax.lax.broadcasted_iota(jnp.int32, (CHANNELS, 1), 0)
        upd_hi = (ch >= HALF).astype(jnp.float32)
        upd_lo = (ch < HALF).astype(jnp.float32)

        for f in range(N_FLOWS):                          # fused flows, static unroll
            # pre 1x1: logical-x0 columns are scattered to their stored positions at
            # trace time, so Flip() never moves data.
            h = (mdot(pre_w_ref[f], s) + pre_b_ref[f]) * mask_h        # (H, T)

            skip_sum = jnp.zeros((HIDDEN, T), jnp.float32)
            for i in range(N_LAYERS):
                d = DILATION_RATE[f] ** i
                pad = (KERNEL_SIZE * d - d) // 2
                # conv "same" zero padding once, then K static tap slices stacked on
                # the sublane/contraction axis (no lane-axis concat of the wide
                # operand, no wrap-around masks).
                zpad = jnp.zeros((HIDDEN, pad), jnp.float32)
                h_pad = jnp.concatenate([zpad, h, zpad], axis=1)       # (H, T+2*pad)
                x_taps = jnp.concatenate(
                    [h_pad[:, k * d:k * d + T] for k in range(KERNEL_SIZE)],
                    axis=0)                                            # (K*H, T)

                # tanh/sigmoid halves in ONE matmul; sublane slices are 8-aligned.
                x_in = mdot(in_w_ref[f, i], x_taps) + in_b_ref[f, i]   # (2H, T)
                acts = jnp.tanh(x_in[:HIDDEN]) * jax.nn.sigmoid(x_in[HIDDEN:])

                if i < N_LAYERS - 1:
                    # res/skip halves in ONE matmul.
                    rs = mdot(rs_w_ref[f, i], acts) + rs_b_ref[f, i]   # (2H, T)
                    h = (h + rs[:HIDDEN]) * mask_h
                    skip_sum = skip_sum + rs[HIDDEN:]
                else:                                     # last layer: skip only
                    rs = (mdot(rs_w_ref[f, i][:HIDDEN], acts)
                          + rs_b_ref[f, i][:HIDDEN])                    # (H, T)
                    skip_sum = skip_sum + rs

            out_wn = skip_sum * mask_h

            # post 1x1 -> mean m, scattered into the stored x1 rows (x0 rows zero).
            m_full = (mdot(post_w_ref[f], out_wn) + post_b_ref[f]) * mask_c
            upd = upd_hi if x1_high_flags[f] else upd_lo
            # x1 <- m + x1*mask ; x0 passes through.  Flip() costs nothing: the
            # permutation is folded into the NEXT flow's pre/post weights.
            s = s * (mask_c * upd + (1.0 - upd)) + m_full

        out_ref[...] = s                                  # single (C, T) store

    return kernel


# ----------------- flow-stacked, permutation-baked kernel params --------------
def stack_kernel_params(flow_params):
    """Stack per-flow torch-layout params on a flow axis, in (out, in) matmul layout
    (time on lanes), with the Flip channel permutation baked into the pre/post 1x1s."""
    perm = list(range(CHANNELS))      # logical channel c -> stored channel perm[c]
    acc = {k: [] for k in ("pre_w", "pre_b", "in_w", "in_b",
                           "rs_w", "rs_b", "post_w", "post_b")}
    x1_high_flags = []

    for f in range(N_FLOWS):
        p = {k: np.asarray(v, np.float32) for k, v in flow_params[f].items()}

        # pre 1x1: torch (HIDDEN, HALF, 1) -> (HIDDEN, C); columns placed at the
        # stored positions of the logical x0 half, zero elsewhere.
        pre_full = np.zeros((HIDDEN, CHANNELS), np.float32)
        for j in range(HALF):
            pre_full[:, perm[j]] = p["pre_w"][:, j, 0]
        acc["pre_w"].append(pre_full)
        acc["pre_b"].append(p["pre_b"][:, None])                        # (H, 1)

        # dilated in_layers: torch (L, 2H, H, K) -> (L, 2H, K*H) with contraction
        # index k*H + cin matching the sublane-stacked tap operand.
        acc["in_w"].append(p["in_w"].transpose(0, 1, 3, 2)
                           .reshape(N_LAYERS, 2 * HIDDEN, KERNEL_SIZE * HIDDEN))
        acc["in_b"].append(p["in_b"][:, :, None])                       # (L, 2H, 1)

        # res/skip 1x1: (L, 2H, H); non-last layers: rows [:H]=res, [H:]=skip,
        # last layer: rows [:H] used as skip (sliced in-kernel).
        acc["rs_w"].append(p["rs_w"])
        acc["rs_b"].append(p["rs_b"][:, :, None])                       # (L, 2H, 1)

        # post 1x1: torch (HALF, HIDDEN, 1) -> (C, HIDDEN); rows scattered to the
        # stored positions of the logical x1 half, zero elsewhere.
        post_full = np.zeros((CHANNELS, HIDDEN), np.float32)
        post_b_full = np.zeros((CHANNELS, 1), np.float32)
        for j in range(HALF):
            c = perm[HALF + j]
            post_full[c, :] = p["post_w"][j, :, 0]
            post_b_full[c, 0] = p["post_b"][j]
        acc["post_w"].append(post_full)
        acc["post_b"].append(post_b_full)

        # stored rows of the x1 half must form a contiguous low/high block for the
        # in-kernel update mask (holds for the standard Flip()).
        x1_rows = sorted(perm[HALF + j] for j in range(HALF))
        assert x1_rows in (list(range(HALF)), list(range(HALF, CHANNELS)))
        x1_high_flags.append(x1_rows[0] >= HALF)

        perm = perm[::-1]                                 # Flip() between flows

    params = {}
    for k, v in acc.items():
        arr = np.stack(v).astype(np.float32)
        params[k] = jnp.asarray(arr, dtype=MATMUL_DTYPE if k.endswith("_w")
                                else jnp.float32)
    return params, x1_high_flags, perm                     # perm == final permutation


# ------------------------------ forward wrapper --------------------------------
def make_forward(x1_high_flags, final_perm):
    kernel = make_block_kernel(x1_high_flags)

    const3 = lambda b: (0, 0, 0)        # weights: resident across grid steps
    const4 = lambda b: (0, 0, 0, 0)
    in_specs = [
        pl.BlockSpec((None, CHANNELS, T), lambda b: (b, 0, 0)),           # x
        pl.BlockSpec((None, 1, T), lambda b: (b, 0, 0)),                  # mask
        pl.BlockSpec((N_FLOWS, HIDDEN, CHANNELS), const3),                # pre_w
        pl.BlockSpec((N_FLOWS, HIDDEN, 1), const3),                       # pre_b
        pl.BlockSpec((N_FLOWS, N_LAYERS, 2 * HIDDEN, KERNEL_SIZE * HIDDEN), const4),
        pl.BlockSpec((N_FLOWS, N_LAYERS, 2 * HIDDEN, 1), const4),         # in_b
        pl.BlockSpec((N_FLOWS, N_LAYERS, 2 * HIDDEN, HIDDEN), const4),    # rs_w
        pl.BlockSpec((N_FLOWS, N_LAYERS, 2 * HIDDEN, 1), const4),         # rs_b
        pl.BlockSpec((N_FLOWS, CHANNELS, HIDDEN), const3),                # post_w
        pl.BlockSpec((N_FLOWS, CHANNELS, 1), const3),                     # post_b
    ]
    call = pl.pallas_call(
        kernel,
        out_shape=jax.ShapeDtypeStruct((B, CHANNELS, T), jnp.float32),
        grid=(B,),                                        # one batch element per step
        in_specs=in_specs,
        out_specs=pl.BlockSpec((None, CHANNELS, T), lambda b: (b, 0, 0)),
        compiler_params=pltpu.CompilerParams(
            dimension_semantics=("parallel",)),           # v7x: one TC per batch elem
    )
    identity = list(range(CHANNELS))

    @jax.jit
    def forward(x_nct, x_mask_n1t, params):
        # torch NCT layout is already (channels on sublanes, time on lanes): pass-through.
        out = call(x_nct, x_mask_n1t,
                   params["pre_w"], params["pre_b"],
                   params["in_w"], params["in_b"],
                   params["rs_w"], params["rs_b"],
                   params["post_w"], params["post_b"])
        if list(final_perm) != identity:                  # only needed for odd N_FLOWS
            out = out[:, np.asarray(final_perm), :]
        return out

    return forward


# ------------------------- parameter initialization ---------------------------
def init_flow_params(key):
    """Torch-layout (Cout, Cin, K) params for one ResidualCouplingLayer."""
    ks = jax.random.split(key, 8)
    s = 0.1
    pre_w = jax.random.normal(ks[0], (HIDDEN, HALF, 1), jnp.float32) * s
    pre_b = jax.random.normal(ks[1], (HIDDEN,), jnp.float32) * s
    in_w = jax.random.normal(ks[2], (N_LAYERS, 2 * HIDDEN, HIDDEN, KERNEL_SIZE), jnp.float32) * s
    in_b = jax.random.normal(ks[3], (N_LAYERS, 2 * HIDDEN), jnp.float32) * s
    # last res_skip layer only has HIDDEN output channels; its tail rows are unused.
    rs_w = jax.random.normal(ks[4], (N_LAYERS, 2 * HIDDEN, HIDDEN), jnp.float32) * s
    rs_b = jax.random.normal(ks[5], (N_LAYERS, 2 * HIDDEN), jnp.float32) * s
    # NOTE: the real module zero-inits post (identity at init); use small random values
    # here so the compute path is actually exercised.
    post_w = jax.random.normal(ks[6], (HALF, HIDDEN, 1), jnp.float32) * s
    post_b = jax.random.normal(ks[7], (HALF,), jnp.float32) * s
    return dict(pre_w=pre_w, pre_b=pre_b, in_w=in_w, in_b=in_b,
                rs_w=rs_w, rs_b=rs_b, post_w=post_w, post_b=post_b)


# ------------------------- pure-JAX reference (NCT) ----------------------------
def conv1d_ref(x, w, b, dilation=1, padding=0):
    out = jax.lax.conv_general_dilated(
        x, w, window_strides=(1,), padding=[(padding, padding)],
        rhs_dilation=(dilation,), dimension_numbers=("NCH", "OIH", "NCH"),
        precision=jax.lax.Precision.HIGHEST)
    return out + b[None, :, None]


def wn_ref(h, mask, p, dilation_base):
    output = jnp.zeros_like(h)
    for i in range(N_LAYERS):
        d = dilation_base ** i
        pad = (KERNEL_SIZE * d - d) // 2
        x_in = conv1d_ref(h, p["in_w"][i], p["in_b"][i], dilation=d, padding=pad)
        acts = jnp.tanh(x_in[:, :HIDDEN]) * jax.nn.sigmoid(x_in[:, HIDDEN:])
        if i < N_LAYERS - 1:
            rs = conv1d_ref(acts, p["rs_w"][i][:, :, None], p["rs_b"][i])
            h = (h + rs[:, :HIDDEN]) * mask
            output = output + rs[:, HIDDEN:]
        else:
            rs = conv1d_ref(acts, p["rs_w"][i, :HIDDEN][:, :, None], p["rs_b"][i, :HIDDEN])
            output = output + rs
    return output * mask


def coupling_layer_ref(x, mask, p, dilation_base):
    x0, x1 = x[:, :HALF], x[:, HALF:]
    h = conv1d_ref(x0, p["pre_w"], p["pre_b"]) * mask
    h = wn_ref(h, mask, p, dilation_base)
    m = conv1d_ref(h, p["post_w"], p["post_b"]) * mask
    x1 = m + x1 * mask
    return jnp.concatenate([x0, x1], axis=1)


def block_ref(x, mask, flow_params):
    for i in range(N_FLOWS):
        x = coupling_layer_ref(x, mask, flow_params[i], DILATION_RATE[i])
        x = x[:, ::-1, :]
    return x


# ---------------------------------- main --------------------------------------
if __name__ == "__main__":
    key = jax.random.PRNGKey(0)
    k_x, k_p = jax.random.split(key)

    x = jax.random.normal(k_x, (B, CHANNELS, T), jnp.float32)           # NCT like torch
    lengths = jnp.array([T, T - 4])
    x_mask = (jnp.arange(T)[None, :] < lengths[:, None]).astype(jnp.float32)[:, None, :]

    flow_keys = jax.random.split(k_p, N_FLOWS)
    flow_params = [init_flow_params(k) for k in flow_keys]
    kparams, x1_high_flags, final_perm = stack_kernel_params(flow_params)

    forward = make_forward(x1_high_flags, final_perm)
    out = jax.block_until_ready(forward(x, x_mask, kparams))

    ref = block_ref(x, x_mask, flow_params)
    # tolerance covers the TPU MXU's default (bf16-pass) f32 matmul precision vs the
    # HIGHEST-precision reference; structural errors would be orders of magnitude larger.
    np.testing.assert_allclose(np.asarray(out), np.asarray(ref), rtol=2e-2, atol=2e-2)

    print("KERNEL_OK")
</pallas_src>

<mosaic_0001>
module attributes {stable_mosaic.version = 11 : i64} {
  func.func @kernel(%arg0: i32, %arg1: memref<1x4x16xf32, #tpu.memory_space<vmem>>, %arg2: memref<1x1x16xf32, #tpu.memory_space<vmem>>, %arg3: memref<4x32x4xf32, #tpu.memory_space<vmem>>, %arg4: memref<4x32x1xf32, #tpu.memory_space<vmem>>, %arg5: memref<4x2x64x160xf32, #tpu.memory_space<vmem>>, %arg6: memref<4x2x64x1xf32, #tpu.memory_space<vmem>>, %arg7: memref<4x2x64x32xf32, #tpu.memory_space<vmem>>, %arg8: memref<4x2x64x1xf32, #tpu.memory_space<vmem>>, %arg9: memref<4x4x32xf32, #tpu.memory_space<vmem>>, %arg10: memref<4x4x1xf32, #tpu.memory_space<vmem>>, %arg11: memref<1x4x16xf32, #tpu.memory_space<vmem>>) attributes {dimension_semantics = [#tpu.dimension_semantics<parallel>], iteration_bounds = array<i64: 2>, scalar_prefetch = 0 : i64, scratch_operands = 0 : i64, tpu.core_type = #tpu.core_type<tc>, window_params = [{transform_indices = @transform_0, window_bounds = array<i64: 1, 4, 16>}, {transform_indices = @transform_1, window_bounds = array<i64: 1, 1, 16>}, {pipeline_mode = #tpu.pipeline_mode<synchronous>, transform_indices = @transform_2, window_bounds = array<i64: 4, 32, 4>}, {pipeline_mode = #tpu.pipeline_mode<synchronous>, transform_indices = @transform_3, window_bounds = array<i64: 4, 32, 1>}, {pipeline_mode = #tpu.pipeline_mode<synchronous>, transform_indices = @transform_4, window_bounds = array<i64: 4, 2, 64, 160>}, {pipeline_mode = #tpu.pipeline_mode<synchronous>, transform_indices = @transform_5, window_bounds = array<i64: 4, 2, 64, 1>}, {pipeline_mode = #tpu.pipeline_mode<synchronous>, transform_indices = @transform_6, window_bounds = array<i64: 4, 2, 64, 32>}, {pipeline_mode = #tpu.pipeline_mode<synchronous>, transform_indices = @transform_7, window_bounds = array<i64: 4, 2, 64, 1>}, {pipeline_mode = #tpu.pipeline_mode<synchronous>, transform_indices = @transform_8, window_bounds = array<i64: 4, 4, 32>}, {pipeline_mode = #tpu.pipeline_mode<synchronous>, transform_indices = @transform_9, window_bounds = array<i64: 4, 4, 1>}, {transform_indices = @transform_10, window_bounds = array<i64: 1, 4, 16>}]} {
    %c0 = arith.constant 0 : index
    %c0_0 = arith.constant 0 : index
    %c0_1 = arith.constant 0 : index
    %0 = vector.load %arg1[%c0, %c0_0, %c0_1] : memref<1x4x16xf32, #tpu.memory_space<vmem>>, vector<1x4x16xf32>
    %1 = vector.shape_cast %0 : vector<1x4x16xf32> to vector<4x16xf32>
    %c0_2 = arith.constant 0 : index
    %c0_3 = arith.constant 0 : index
    %c0_4 = arith.constant 0 : index
    %2 = vector.load %arg2[%c0_2, %c0_3, %c0_4] : memref<1x1x16xf32, #tpu.memory_space<vmem>>, vector<1x1x16xf32>
    %3 = vector.shape_cast %2 : vector<1x1x16xf32> to vector<1x16xf32>
    %4 = vector.shape_cast %3 : vector<1x16xf32> to vector<1x16xf32>
    %5 = vector.broadcast %4 : vector<1x16xf32> to vector<32x16xf32>
    %6 = vector.shape_cast %3 : vector<1x16xf32> to vector<1x16xf32>
    %7 = vector.broadcast %6 : vector<1x16xf32> to vector<4x16xf32>
    %8 = tpu.iota {dimensions = array<i32: 0>} : vector<4x1xi32>
    %c2_i32 = arith.constant 2 : i32
    %9 = vector.broadcast %c2_i32 : i32 to vector<4x1xi32>
    %10 = arith.cmpi sge, %8, %9 : vector<4x1xi32>
    %11 = arith.extui %10 : vector<4x1xi1> to vector<4x1xi32>
    %12 = arith.sitofp %11 : vector<4x1xi32> to vector<4x1xf32>
    %c2_i32_5 = arith.constant 2 : i32
    %13 = vector.broadcast %c2_i32_5 : i32 to vector<4x1xi32>
    %14 = arith.cmpi slt, %8, %13 : vector<4x1xi32>
    %15 = arith.extui %14 : vector<4x1xi1> to vector<4x1xi32>
    %16 = arith.sitofp %15 : vector<4x1xi32> to vector<4x1xf32>
    %c0_6 = arith.constant 0 : index
    %c0_7 = arith.constant 0 : index
    %c0_8 = arith.constant 0 : index
    %17 = vector.load %arg3[%c0_6, %c0_7, %c0_8] : memref<4x32x4xf32, #tpu.memory_space<vmem>>, vector<1x32x4xf32>
    %18 = vector.shape_cast %17 : vector<1x32x4xf32> to vector<32x4xf32>
    %cst = arith.constant dense<0.000000e+00> : vector<32x16xf32>
    %19 = tpu.matmul %18, %1, %cst {dimension_numbers = #tpu.dot_dimension_numbers<[1], [0], [0], [1], [0, 0, 1, 1], [], []>} : vector<32x4xf32>, vector<4x16xf32>, vector<32x16xf32> -> vector<32x16xf32>
    %c0_9 = arith.constant 0 : index
    %c0_10 = arith.constant 0 : index
    %c0_11 = arith.constant 0 : index
    %20 = vector.load %arg4[%c0_9, %c0_10, %c0_11] : memref<4x32x1xf32, #tpu.memory_space<vmem>>, vector<1x32x1xf32>
    %21 = vector.shape_cast %20 : vector<1x32x1xf32> to vector<32x1xf32>
    %22 = vector.broadcast %21 : vector<32x1xf32> to vector<32x16xf32>
    %23 = arith.addf %19, %22 : vector<32x16xf32>
    %24 = arith.mulf %23, %5 : vector<32x16xf32>
    %cst_12 = arith.constant 0.000000e+00 : f32
    %25 = vector.broadcast %cst_12 : f32 to vector<32x16xf32>
    %cst_13 = arith.constant 0.000000e+00 : f32
    %26 = vector.broadcast %cst_13 : f32 to vector<32x2xf32>
    %27 = tpu.concatenate %26, %24, %26 in 1 : vector<32x2xf32>, vector<32x16xf32>, vector<32x2xf32> -> vector<32x20xf32>
    %28 = vector.extract_strided_slice %27 {offsets = [0, 0], sizes = [32, 16], strides = [1, 1]} : vector<32x20xf32> to vector<32x16xf32>
    %29 = vector.extract_strided_slice %27 {offsets = [0, 1], sizes = [32, 16], strides = [1, 1]} : vector<32x20xf32> to vector<32x16xf32>
    %30 = vector.extract_strided_slice %27 {offsets = [0, 2], sizes = [32, 16], strides = [1, 1]} : vector<32x20xf32> to vector<32x16xf32>
    %31 = vector.extract_strided_slice %27 {offsets = [0, 3], sizes = [32, 16], strides = [1, 1]} : vector<32x20xf32> to vector<32x16xf32>
    %32 = vector.extract_strided_slice %27 {offsets = [0, 4], sizes = [32, 16], strides = [1, 1]} : vector<32x20xf32> to vector<32x16xf32>
    %33 = tpu.concatenate %28, %29, %30, %31, %32 in 0 : vector<32x16xf32>, vector<32x16xf32>, vector<32x16xf32>, vector<32x16xf32>, vector<32x16xf32> -> vector<160x16xf32>
    %c0_14 = arith.constant 0 : index
    %c0_15 = arith.constant 0 : index
    %c0_16 = arith.constant 0 : index
    %c0_17 = arith.constant 0 : index
    %34 = vector.load %arg5[%c0_14, %c0_15, %c0_16, %c0_17] : memref<4x2x64x160xf32, #tpu.memory_space<vmem>>, vector<1x1x64x160xf32>
    %35 = vector.shape_cast %34 : vector<1x1x64x160xf32> to vector<64x160xf32>
    %cst_18 = arith.constant dense<0.000000e+00> : vector<64x16xf32>
    %36 = tpu.matmul %35, %33, %cst_18 {dimension_numbers = #tpu.dot_dimension_numbers<[1], [0], [0], [1], [0, 0, 1, 1], [], []>} : vector<64x160xf32>, vector<160x16xf32>, vector<64x16xf32> -> vector<64x16xf32>
    %c0_19 = arith.constant 0 : index
    %c0_20 = arith.constant 0 : index
    %c0_21 = arith.constant 0 : index
    %c0_22 = arith.constant 0 : index
    %37 = vector.load %arg6[%c0_19, %c0_20, %c0_21, %c0_22] : memref<4x2x64x1xf32, #tpu.memory_space<vmem>>, vector<1x1x64x1xf32>
    %38 = vector.shape_cast %37 : vector<1x1x64x1xf32> to vector<64x1xf32>
    %39 = vector.broadcast %38 : vector<64x1xf32> to vector<64x16xf32>
    %40 = arith.addf %36, %39 : vector<64x16xf32>
    %41 = vector.extract_strided_slice %40 {offsets = [0, 0], sizes = [32, 16], strides = [1, 1]} : vector<64x16xf32> to vector<32x16xf32>
    %42 = math.tanh %41 : vector<32x16xf32>
    %43 = vector.extract_strided_slice %40 {offsets = [32, 0], sizes = [32, 16], strides = [1, 1]} : vector<64x16xf32> to vector<32x16xf32>
    %44 = arith.negf %43 : vector<32x16xf32>
    %45 = math.exp %44 : vector<32x16xf32>
    %cst_23 = arith.constant 1.000000e+00 : f32
    %46 = vector.broadcast %cst_23 : f32 to vector<32x16xf32>
    %47 = arith.addf %46, %45 : vector<32x16xf32>
    %48 = arith.divf %46, %47 : vector<32x16xf32>
    %49 = arith.mulf %42, %48 : vector<32x16xf32>
    %c0_24 = arith.constant 0 : index
    %c0_25 = arith.constant 0 : index
    %c0_26 = arith.constant 0 : index
    %c0_27 = arith.constant 0 : index
    %50 = vector.load %arg7[%c0_24, %c0_25, %c0_26, %c0_27] : memref<4x2x64x32xf32, #tpu.memory_space<vmem>>, vector<1x1x64x32xf32>
    %51 = vector.shape_cast %50 : vector<1x1x64x32xf32> to vector<64x32xf32>
    %cst_28 = arith.constant dense<0.000000e+00> : vector<64x16xf32>
    %52 = tpu.matmul %51, %49, %cst_28 {dimension_numbers = #tpu.dot_dimension_numbers<[1], [0], [0], [1], [0, 0, 1, 1], [], []>} : vector<64x32xf32>, vector<32x16xf32>, vector<64x16xf32> -> vector<64x16xf32>
    %c0_29 = arith.constant 0 : index
    %c0_30 = arith.constant 0 : index
    %c0_31 = arith.constant 0 : index
    %c0_32 = arith.constant 0 : index
    %53 = vector.load %arg8[%c0_29, %c0_30, %c0_31, %c0_32] : memref<4x2x64x1xf32, #tpu.memory_space<vmem>>, vector<1x1x64x1xf32>
    %54 = vector.shape_cast %53 : vector<1x1x64x1xf32> to vector<64x1xf32>
    %55 = vector.broadcast %54 : vector<64x1xf32> to vector<64x16xf32>
    %56 = arith.addf %52, %55 : vector<64x16xf32>
    %57 = vector.extract_strided_slice %56 {offsets = [0, 0], sizes = [32, 16], strides = [1, 1]} : vector<64x16xf32> to vector<32x16xf32>
    %58 = arith.addf %24, %57 : vector<32x16xf32>
    %59 = arith.mulf %58, %5 : vector<32x16xf32>
    %60 = vector.extract_strided_slice %56 {offsets = [32, 0], sizes = [32, 16], strides = [1, 1]} : vector<64x16xf32> to vector<32x16xf32>
    %61 = arith.addf %25, %60 : vector<32x16xf32>
    %cst_33 = arith.constant 0.000000e+00 : f32
    %62 = vector.broadcast %cst_33 : f32 to vector<32x2xf32>
    %63 = tpu.concatenate %62, %59, %62 in 1 : vector<32x2xf32>, vector<32x16xf32>, vector<32x2xf32> -> vector<32x20xf32>
    %64 = vector.extract_strided_slice %63 {offsets = [0, 0], sizes = [32, 16], strides = [1, 1]} : vector<32x20xf32> to vector<32x16xf32>
    %65 = vector.extract_strided_slice %63 {offsets = [0, 1], sizes = [32, 16], strides = [1, 1]} : vector<32x20xf32> to vector<32x16xf32>
    %66 = vector.extract_strided_slice %63 {offsets = [0, 2], sizes = [32, 16], strides = [1, 1]} : vector<32x20xf32> to vector<32x16xf32>
    %67 = vector.extract_strided_slice %63 {offsets = [0, 3], sizes = [32, 16], strides = [1, 1]} : vector<32x20xf32> to vector<32x16xf32>
    %68 = vector.extract_strided_slice %63 {offsets = [0, 4], sizes = [32, 16], strides = [1, 1]} : vector<32x20xf32> to vector<32x16xf32>
    %69 = tpu.concatenate %64, %65, %66, %67, %68 in 0 : vector<32x16xf32>, vector<32x16xf32>, vector<32x16xf32>, vector<32x16xf32>, vector<32x16xf32> -> vector<160x16xf32>
    %c0_34 = arith.constant 0 : index
    %c1 = arith.constant 1 : index
    %c0_35 = arith.constant 0 : index
    %c0_36 = arith.constant 0 : index
    %70 = vector.load %arg5[%c0_34, %c1, %c0_35, %c0_36] : memref<4x2x64x160xf32, #tpu.memory_space<vmem>>, vector<1x1x64x160xf32>
    %71 = vector.shape_cast %70 : vector<1x1x64x160xf32> to vector<64x160xf32>
    %cst_37 = arith.constant dense<0.000000e+00> : vector<64x16xf32>
    %72 = tpu.matmul %71, %69, %cst_37 {dimension_numbers = #tpu.dot_dimension_numbers<[1], [0], [0], [1], [0, 0, 1, 1], [], []>} : vector<64x160xf32>, vector<160x16xf32>, vector<64x16xf32> -> vector<64x16xf32>
    %c0_38 = arith.constant 0 : index
    %c1_39 = arith.constant 1 : index
    %c0_40 = arith.constant 0 : index
    %c0_41 = arith.constant 0 : index
    %73 = vector.load %arg6[%c0_38, %c1_39, %c0_40, %c0_41] : memref<4x2x64x1xf32, #tpu.memory_space<vmem>>, vector<1x1x64x1xf32>
    %74 = vector.shape_cast %73 : vector<1x1x64x1xf32> to vector<64x1xf32>
    %75 = vector.broadcast %74 : vector<64x1xf32> to vector<64x16xf32>
    %76 = arith.addf %72, %75 : vector<64x16xf32>
    %77 = vector.extract_strided_slice %76 {offsets = [0, 0], sizes = [32, 16], strides = [1, 1]} : vector<64x16xf32> to vector<32x16xf32>
    %78 = math.tanh %77 : vector<32x16xf32>
    %79 = vector.extract_strided_slice %76 {offsets = [32, 0], sizes = [32, 16], strides = [1, 1]} : vector<64x16xf32> to vector<32x16xf32>
    %80 = arith.negf %79 : vector<32x16xf32>
    %81 = math.exp %80 : vector<32x16xf32>
    %cst_42 = arith.constant 1.000000e+00 : f32
    %82 = vector.broadcast %cst_42 : f32 to vector<32x16xf32>
    %83 = arith.addf %82, %81 : vector<32x16xf32>
    %84 = arith.divf %82, %83 : vector<32x16xf32>
    %85 = arith.mulf %78, %84 : vector<32x16xf32>
    %c0_43 = arith.constant 0 : index
    %c1_44 = arith.constant 1 : index
    %c0_45 = arith.constant 0 : index
    %c0_46 = arith.constant 0 : index
    %86 = vector.load %arg7[%c0_43, %c1_44, %c0_45, %c0_46] : memref<4x2x64x32xf32, #tpu.memory_space<vmem>>, vector<1x1x64x32xf32>
    %87 = vector.shape_cast %86 : vector<1x1x64x32xf32> to vector<64x32xf32>
    %88 = vector.extract_strided_slice %87 {offsets = [0, 0], sizes = [32, 32], strides = [1, 1]} : vector<64x32xf32> to vector<32x32xf32>
    %cst_47 = arith.constant dense<0.000000e+00> : vector<32x16xf32>
    %89 = tpu.matmul %88, %85, %cst_47 {dimension_numbers = #tpu.dot_dimension_numbers<[1], [0], [0], [1], [0, 0, 1, 1], [], []>} : vector<32x32xf32>, vector<32x16xf32>, vector<32x16xf32> -> vector<32x16xf32>
    %c0_48 = arith.constant 0 : index
    %c1_49 = arith.constant 1 : index
    %c0_50 = arith.constant 0 : index
    %c0_51 = arith.constant 0 : index
    %90 = vector.load %arg8[%c0_48, %c1_49, %c0_50, %c0_51] : memref<4x2x64x1xf32, #tpu.memory_space<vmem>>, vector<1x1x64x1xf32>
    %91 = vector.shape_cast %90 : vector<1x1x64x1xf32> to vector<64x1xf32>
    %92 = vector.extract_strided_slice %91 {offsets = [0, 0], sizes = [32, 1], strides = [1, 1]} : vector<64x1xf32> to vector<32x1xf32>
    %93 = vector.broadcast %92 : vector<32x1xf32> to vector<32x16xf32>
    %94 = arith.addf %89, %93 : vector<32x16xf32>
    %95 = arith.addf %61, %94 : vector<32x16xf32>
    %96 = arith.mulf %95, %5 : vector<32x16xf32>
    %c0_52 = arith.constant 0 : index
    %c0_53 = arith.constant 0 : index
    %c0_54 = arith.constant 0 : index
    %97 = vector.load %arg9[%c0_52, %c0_53, %c0_54] : memref<4x4x32xf32, #tpu.memory_space<vmem>>, vector<1x4x32xf32>
    %98 = vector.shape_cast %97 : vector<1x4x32xf32> to vector<4x32xf32>
    %cst_55 = arith.constant dense<0.000000e+00> : vector<4x16xf32>
    %99 = tpu.matmul %98, %96, %cst_55 {dimension_numbers = #tpu.dot_dimension_numbers<[1], [0], [0], [1], [0, 0, 1, 1], [], []>} : vector<4x32xf32>, vector<32x16xf32>, vector<4x16xf32> -> vector<4x16xf32>
    %c0_56 = arith.constant 0 : index
    %c0_57 = arith.constant 0 : index
    %c0_58 = arith.constant 0 : index
    %100 = vector.load %arg10[%c0_56, %c0_57, %c0_58] : memref<4x4x1xf32, #tpu.memory_space<vmem>>, vector<1x4x1xf32>
    %101 = vector.shape_cast %100 : vector<1x4x1xf32> to vector<4x1xf32>
    %102 = vector.broadcast %101 : vector<4x1xf32> to vector<4x16xf32>
    %103 = arith.addf %99, %102 : vector<4x16xf32>
    %104 = arith.mulf %103, %7 : vector<4x16xf32>
    %105 = vector.broadcast %12 : vector<4x1xf32> to vector<4x16xf32>
    %106 = arith.mulf %7, %105 : vector<4x16xf32>
    %cst_59 = arith.constant 1.000000e+00 : f32
    %107 = vector.broadcast %cst_59 : f32 to vector<4x1xf32>
    %108 = arith.subf %107, %12 : vector<4x1xf32>
    %109 = vector.broadcast %108 : vector<4x1xf32> to vector<4x16xf32>
    %110 = arith.addf %106, %109 : vector<4x16xf32>
    %111 = arith.mulf %1, %110 : vector<4x16xf32>
    %112 = arith.addf %111, %104 : vector<4x16xf32>
    %c1_60 = arith.constant 1 : index
    %c0_61 = arith.constant 0 : index
    %c0_62 = arith.constant 0 : index
    %113 = vector.load %arg3[%c1_60, %c0_61, %c0_62] : memref<4x32x4xf32, #tpu.memory_space<vmem>>, vector<1x32x4xf32>
    %114 = vector.shape_cast %113 : vector<1x32x4xf32> to vector<32x4xf32>
    %cst_63 = arith.constant dense<0.000000e+00> : vector<32x16xf32>
    %115 = tpu.matmul %114, %112, %cst_63 {dimension_numbers = #tpu.dot_dimension_numbers<[1], [0], [0], [1], [0, 0, 1, 1], [], []>} : vector<32x4xf32>, vector<4x16xf32>, vector<32x16xf32> -> vector<32x16xf32>
    %c1_64 = arith.constant 1 : index
    %c0_65 = arith.constant 0 : index
    %c0_66 = arith.constant 0 : index
    %116 = vector.load %arg4[%c1_64, %c0_65, %c0_66] : memref<4x32x1xf32, #tpu.memory_space<vmem>>, vector<1x32x1xf32>
    %117 = vector.shape_cast %116 : vector<1x32x1xf32> to vector<32x1xf32>
    %118 = vector.broadcast %117 : vector<32x1xf32> to vector<32x16xf32>
    %119 = arith.addf %115, %118 : vector<32x16xf32>
    %120 = arith.mulf %119, %5 : vector<32x16xf32>
    %cst_67 = arith.constant 0.000000e+00 : f32
    %121 = vector.broadcast %cst_67 : f32 to vector<32x16xf32>
    %cst_68 = arith.constant 0.000000e+00 : f32
    %122 = vector.broadcast %cst_68 : f32 to vector<32x2xf32>
    %123 = tpu.concatenate %122, %120, %122 in 1 : vector<32x2xf32>, vector<32x16xf32>, vector<32x2xf32> -> vector<32x20xf32>
    %124 = vector.extract_strided_slice %123 {offsets = [0, 0], sizes = [32, 16], strides = [1, 1]} : vector<32x20xf32> to vector<32x16xf32>
    %125 = vector.extract_strided_slice %123 {offsets = [0, 1], sizes = [32, 16], strides = [1, 1]} : vector<32x20xf32> to vector<32x16xf32>
    %126 = vector.extract_strided_slice %123 {offsets = [0, 2], sizes = [32, 16], strides = [1, 1]} : vector<32x20xf32> to vector<32x16xf32>
    %127 = vector.extract_strided_slice %123 {offsets = [0, 3], sizes = [32, 16], strides = [1, 1]} : vector<32x20xf32> to vector<32x16xf32>
    %128 = vector.extract_strided_slice %123 {offsets = [0, 4], sizes = [32, 16], strides = [1, 1]} : vector<32x20xf32> to vector<32x16xf32>
    %129 = tpu.concatenate %124, %125, %126, %127, %128 in 0 : vector<32x16xf32>, vector<32x16xf32>, vector<32x16xf32>, vector<32x16xf32>, vector<32x16xf32> -> vector<160x16xf32>
    %c1_69 = arith.constant 1 : index
    %c0_70 = arith.constant 0 : index
    %c0_71 = arith.constant 0 : index
    %c0_72 = arith.constant 0 : index
    %130 = vector.load %arg5[%c1_69, %c0_70, %c0_71, %c0_72] : memref<4x2x64x160xf32, #tpu.memory_space<vmem>>, vector<1x1x64x160xf32>
    %131 = vector.shape_cast %130 : vector<1x1x64x160xf32> to vector<64x160xf32>
    %cst_73 = arith.constant dense<0.000000e+00> : vector<64x16xf32>
    %132 = tpu.matmul %131, %129, %cst_73 {dimension_numbers = #tpu.dot_dimension_numbers<[1], [0], [0], [1], [0, 0, 1, 1], [], []>} : vector<64x160xf32>, vector<160x16xf32>, vector<64x16xf32> -> vector<64x16xf32>
    %c1_74 = arith.constant 1 : index
    %c0_75 = arith.constant 0 : index
    %c0_76 = arith.constant 0 : index
    %c0_77 = arith.constant 0 : index
    %133 = vector.load %arg6[%c1_74, %c0_75, %c0_76, %c0_77] : memref<4x2x64x1xf32, #tpu.memory_space<vmem>>, vector<1x1x64x1xf32>
    %134 = vector.shape_cast %133 : vector<1x1x64x1xf32> to vector<64x1xf32>
    %135 = vector.broadcast %134 : vector<64x1xf32> to vector<64x16xf32>
    %136 = arith.addf %132, %135 : vector<64x16xf32>
    %137 = vector.extract_strided_slice %136 {offsets = [0, 0], sizes = [32, 16], strides = [1, 1]} : vector<64x16xf32> to vector<32x16xf32>
    %138 = math.tanh %137 : vector<32x16xf32>
    %139 = vector.extract_strided_slice %136 {offsets = [32, 0], sizes = [32, 16], strides = [1, 1]} : vector<64x16xf32> to vector<32x16xf32>
    %140 = arith.negf %139 : vector<32x16xf32>
    %141 = math.exp %140 : vector<32x16xf32>
    %cst_78 = arith.constant 1.000000e+00 : f32
    %142 = vector.broadcast %cst_78 : f32 to vector<32x16xf32>
    %143 = arith.addf %142, %141 : vector<32x16xf32>
    %144 = arith.divf %142, %143 : vector<32x16xf32>
    %145 = arith.mulf %138, %144 : vector<32x16xf32>
    %c1_79 = arith.constant 1 : index
    %c0_80 = arith.constant 0 : index
    %c0_81 = arith.constant 0 : index
    %c0_82 = arith.constant 0 : index
    %146 = vector.load %arg7[%c1_79, %c0_80, %c0_81, %c0_82] : memref<4x2x64x32xf32, #tpu.memory_space<vmem>>, vector<1x1x64x32xf32>
    %147 = vector.shape_cast %146 : vector<1x1x64x32xf32> to vector<64x32xf32>
    %cst_83 = arith.constant dense<0.000000e+00> : vector<64x16xf32>
    %148 = tpu.matmul %147, %145, %cst_83 {dimension_numbers = #tpu.dot_dimension_numbers<[1], [0], [0], [1], [0, 0, 1, 1], [], []>} : vector<64x32xf32>, vector<32x16xf32>, vector<64x16xf32> -> vector<64x16xf32>
    %c1_84 = arith.constant 1 : index
    %c0_85 = arith.constant 0 : index
    %c0_86 = arith.constant 0 : index
    %c0_87 = arith.constant 0 : index
    %149 = vector.load %arg8[%c1_84, %c0_85, %c0_86, %c0_87] : memref<4x2x64x1xf32, #tpu.memory_space<vmem>>, vector<1x1x64x1xf32>
    %150 = vector.shape_cast %149 : vector<1x1x64x1xf32> to vector<64x1xf32>
    %151 = vector.broadcast %150 : vector<64x1xf32> to vector<64x16xf32>
    %152 = arith.addf %148, %151 : vector<64x16xf32>
    %153 = vector.extract_strided_slice %152 {offsets = [0, 0], sizes = [32, 16], strides = [1, 1]} : vector<64x16xf32> to vector<32x16xf32>
    %154 = arith.addf %120, %153 : vector<32x16xf32>
    %155 = arith.mulf %154, %5 : vector<32x16xf32>
    %156 = vector.extract_strided_slice %152 {offsets = [32, 0], sizes = [32, 16], strides = [1, 1]} : vector<64x16xf32> to vector<32x16xf32>
    %157 = arith.addf %121, %156 : vector<32x16xf32>
    %cst_88 = arith.constant 0.000000e+00 : f32
    %158 = vector.broadcast %cst_88 : f32 to vector<32x4xf32>
    %159 = tpu.concatenate %158, %155, %158 in 1 : vector<32x4xf32>, vector<32x16xf32>, vector<32x4xf32> -> vector<32x24xf32>
    %160 = vector.extract_strided_slice %159 {offsets = [0, 0], sizes = [32, 16], strides = [1, 1]} : vector<32x24xf32> to vector<32x16xf32>
    %161 = vector.extract_strided_slice %159 {offsets = [0, 2], sizes = [32, 16], strides = [1, 1]} : vector<32x24xf32> to vector<32x16xf32>
    %162 = vector.extract_strided_slice %159 {offsets = [0, 4], sizes = [32, 16], strides = [1, 1]} : vector<32x24xf32> to vector<32x16xf32>
    %163 = vector.extract_strided_slice %159 {offsets = [0, 6], sizes = [32, 16], strides = [1, 1]} : vector<32x24xf32> to vector<32x16xf32>
    %164 = vector.extract_strided_slice %159 {offsets = [0, 8], sizes = [32, 16], strides = [1, 1]} : vector<32x24xf32> to vector<32x16xf32>
    %165 = tpu.concatenate %160, %161, %162, %163, %164 in 0 : vector<32x16xf32>, vector<32x16xf32>, vector<32x16xf32>, vector<32x16xf32>, vector<32x16xf32> -> vector<160x16xf32>
    %c1_89 = arith.constant 1 : index
    %c1_90 = arith.constant 1 : index
    %c0_91 = arith.constant 0 : index
    %c0_92 = arith.constant 0 : index
    %166 = vector.load %arg5[%c1_89, %c1_90, %c0_91, %c0_92] : memref<4x2x64x160xf32, #tpu.memory_space<vmem>>, vector<1x1x64x160xf32>
    %167 = vector.shape_cast %166 : vector<1x1x64x160xf32> to vector<64x160xf32>
    %cst_93 = arith.constant dense<0.000000e+00> : vector<64x16xf32>
    %168 = tpu.matmul %167, %165, %cst_93 {dimension_numbers = #tpu.dot_dimension_numbers<[1], [0], [0], [1], [0, 0, 1, 1], [], []>} : vector<64x160xf32>, vector<160x16xf32>, vector<64x16xf32> -> vector<64x16xf32>
    %c1_94 = arith.constant 1 : index
    %c1_95 = arith.constant 1 : index
    %c0_96 = arith.constant 0 : index
    %c0_97 = arith.constant 0 : index
    %169 = vector.load %arg6[%c1_94, %c1_95, %c0_96, %c0_97] : memref<4x2x64x1xf32, #tpu.memory_space<vmem>>, vector<1x1x64x1xf32>
    %170 = vector.shape_cast %169 : vector<1x1x64x1xf32> to vector<64x1xf32>
    %171 = vector.broadcast %170 : vector<64x1xf32> to vector<64x16xf32>
    %172 = arith.addf %168, %171 : vector<64x16xf32>
    %173 = vector.extract_strided_slice %172 {offsets = [0, 0], sizes = [32, 16], strides = [1, 1]} : vector<64x16xf32> to vector<32x16xf32>
    %174 = math.tanh %173 : vector<32x16xf32>
    %175 = vector.extract_strided_slice %172 {offsets = [32, 0], sizes = [32, 16], strides = [1, 1]} : vector<64x16xf32> to vector<32x16xf32>
    %176 = arith.negf %175 : vector<32x16xf32>
    %177 = math.exp %176 : vector<32x16xf32>
    %cst_98 = arith.constant 1.000000e+00 : f32
    %178 = vector.broadcast %cst_98 : f32 to vector<32x16xf32>
    %179 = arith.addf %178, %177 : vector<32x16xf32>
    %180 = arith.divf %178, %179 : vector<32x16xf32>
    %181 = arith.mulf %174, %180 : vector<32x16xf32>
    %c1_99 = arith.constant 1 : index
    %c1_100 = arith.constant 1 : index
    %c0_101 = arith.constant 0 : index
    %c0_102 = arith.constant 0 : index
    %182 = vector.load %arg7[%c1_99, %c1_100, %c0_101, %c0_102] : memref<4x2x64x32xf32, #tpu.memory_space<vmem>>, vector<1x1x64x32xf32>
    %183 = vector.shape_cast %182 : vector<1x1x64x32xf32> to vector<64x32xf32>
    %184 = vector.extract_strided_slice %183 {offsets = [0, 0], sizes = [32, 32], strides = [1, 1]} : vector<64x32xf32> to vector<32x32xf32>
    %cst_103 = arith.constant dense<0.000000e+00> : vector<32x16xf32>
    %185 = tpu.matmul %184, %181, %cst_103 {dimension_numbers = #tpu.dot_dimension_numbers<[1], [0], [0], [1], [0, 0, 1, 1], [], []>} : vector<32x32xf32>, vector<32x16xf32>, vector<32x16xf32> -> vector<32x16xf32>
    %c1_104 = arith.constant 1 : index
    %c1_105 = arith.constant 1 : index
    %c0_106 = arith.constant 0 : index
    %c0_107 = arith.constant 0 : index
    %186 = vector.load %arg8[%c1_104, %c1_105, %c0_106, %c0_107] : memref<4x2x64x1xf32, #tpu.memory_space<vmem>>, vector<1x1x64x1xf32>
    %187 = vector.shape_cast %186 : vector<1x1x64x1xf32> to vector<64x1xf32>
    %188 = vector.extract_strided_slice %187 {offsets = [0, 0], sizes = [32, 1], strides = [1, 1]} : vector<64x1xf32> to vector<32x1xf32>
    %189 = vector.broadcast %188 : vector<32x1xf32> to vector<32x16xf32>
    %190 = arith.addf %185, %189 : vector<32x16xf32>
    %191 = arith.addf %157, %190 : vector<32x16xf32>
    %192 = arith.mulf %191, %5 : vector<32x16xf32>
    %c1_108 = arith.constant 1 : index
    %c0_109 = arith.constant 0 : index
    %c0_110 = arith.constant 0 : index
    %193 = vector.load %arg9[%c1_108, %c0_109, %c0_110] : memref<4x4x32xf32, #tpu.memory_space<vmem>>, vector<1x4x32xf32>
    %194 = vector.shape_cast %193 : vector<1x4x32xf32> to vector<4x32xf32>
    %cst_111 = arith.constant dense<0.000000e+00> : vector<4x16xf32>
    %195 = tpu.matmul %194, %192, %cst_111 {dimension_numbers = #tpu.dot_dimension_numbers<[1], [0], [0], [1], [0, 0, 1, 1], [], []>} : vector<4x32xf32>, vector<32x16xf32>, vector<4x16xf32> -> vector<4x16xf32>
    %c1_112 = arith.constant 1 : index
    %c0_113 = arith.constant 0 : index
    %c0_114 = arith.constant 0 : index
    %196 = vector.load %arg10[%c1_112, %c0_113, %c0_114] : memref<4x4x1xf32, #tpu.memory_space<vmem>>, vector<1x4x1xf32>
    %197 = vector.shape_cast %196 : vector<1x4x1xf32> to vector<4x1xf32>
    %198 = vector.broadcast %197 : vector<4x1xf32> to vector<4x16xf32>
    %199 = arith.addf %195, %198 : vector<4x16xf32>
    %200 = arith.mulf %199, %7 : vector<4x16xf32>
    %201 = vector.broadcast %16 : vector<4x1xf32> to vector<4x16xf32>
    %202 = arith.mulf %7, %201 : vector<4x16xf32>
    %cst_115 = arith.constant 1.000000e+00 : f32
    %203 = vector.broadcast %cst_115 : f32 to vector<4x1xf32>
    %204 = arith.subf %203, %16 : vector<4x1xf32>
    %205 = vector.broadcast %204 : vector<4x1xf32> to vector<4x16xf32>
    %206 = arith.addf %202, %205 : vector<4x16xf32>
    %207 = arith.mulf %112, %206 : vector<4x16xf32>
    %208 = arith.addf %207, %200 : vector<4x16xf32>
    %c2 = arith.constant 2 : index
    %c0_116 = arith.constant 0 : index
    %c0_117 = arith.constant 0 : index
    %209 = vector.load %arg3[%c2, %c0_116, %c0_117] : memref<4x32x4xf32, #tpu.memory_space<vmem>>, vector<1x32x4xf32>
    %210 = vector.shape_cast %209 : vector<1x32x4xf32> to vector<32x4xf32>
    %cst_118 = arith.constant dense<0.000000e+00> : vector<32x16xf32>
    %211 = tpu.matmul %210, %208, %cst_118 {dimension_numbers = #tpu.dot_dimension_numbers<[1], [0], [0], [1], [0, 0, 1, 1], [], []>} : vector<32x4xf32>, vector<4x16xf32>, vector<32x16xf32> -> vector<32x16xf32>
    %c2_119 = arith.constant 2 : index
    %c0_120 = arith.constant 0 : index
    %c0_121 = arith.constant 0 : index
    %212 = vector.load %arg4[%c2_119, %c0_120, %c0_121] : memref<4x32x1xf32, #tpu.memory_space<vmem>>, vector<1x32x1xf32>
    %213 = vector.shape_cast %212 : vector<1x32x1xf32> to vector<32x1xf32>
    %214 = vector.broadcast %213 : vector<32x1xf32> to vector<32x16xf32>
    %215 = arith.addf %211, %214 : vector<32x16xf32>
    %216 = arith.mulf %215, %5 : vector<32x16xf32>
    %cst_122 = arith.constant 0.000000e+00 : f32
    %217 = vector.broadcast %cst_122 : f32 to vector<32x16xf32>
    %cst_123 = arith.constant 0.000000e+00 : f32
    %218 = vector.broadcast %cst_123 : f32 to vector<32x2xf32>
    %219 = tpu.concatenate %218, %216, %218 in 1 : vector<32x2xf32>, vector<32x16xf32>, vector<32x2xf32> -> vector<32x20xf32>
    %220 = vector.extract_strided_slice %219 {offsets = [0, 0], sizes = [32, 16], strides = [1, 1]} : vector<32x20xf32> to vector<32x16xf32>
    %221 = vector.extract_strided_slice %219 {offsets = [0, 1], sizes = [32, 16], strides = [1, 1]} : vector<32x20xf32> to vector<32x16xf32>
    %222 = vector.extract_strided_slice %219 {offsets = [0, 2], sizes = [32, 16], strides = [1, 1]} : vector<32x20xf32> to vector<32x16xf32>
    %223 = vector.extract_strided_slice %219 {offsets = [0, 3], sizes = [32, 16], strides = [1, 1]} : vector<32x20xf32> to vector<32x16xf32>
    %224 = vector.extract_strided_slice %219 {offsets = [0, 4], sizes = [32, 16], strides = [1, 1]} : vector<32x20xf32> to vector<32x16xf32>
    %225 = tpu.concatenate %220, %221, %222, %223, %224 in 0 : vector<32x16xf32>, vector<32x16xf32>, vector<32x16xf32>, vector<32x16xf32>, vector<32x16xf32> -> vector<160x16xf32>
    %c2_124 = arith.constant 2 : index
    %c0_125 = arith.constant 0 : index
    %c0_126 = arith.constant 0 : index
    %c0_127 = arith.constant 0 : index
    %226 = vector.load %arg5[%c2_124, %c0_125, %c0_126, %c0_127] : memref<4x2x64x160xf32, #tpu.memory_space<vmem>>, vector<1x1x64x160xf32>
    %227 = vector.shape_cast %226 : vector<1x1x64x160xf32> to vector<64x160xf32>
    %cst_128 = arith.constant dense<0.000000e+00> : vector<64x16xf32>
    %228 = tpu.matmul %227, %225, %cst_128 {dimension_numbers = #tpu.dot_dimension_numbers<[1], [0], [0], [1], [0, 0, 1, 1], [], []>} : vector<64x160xf32>, vector<160x16xf32>, vector<64x16xf32> -> vector<64x16xf32>
    %c2_129 = arith.constant 2 : index
    %c0_130 = arith.constant 0 : index
    %c0_131 = arith.constant 0 : index
    %c0_132 = arith.constant 0 : index
    %229 = vector.load %arg6[%c2_129, %c0_130, %c0_131, %c0_132] : memref<4x2x64x1xf32, #tpu.memory_space<vmem>>, vector<1x1x64x1xf32>
    %230 = vector.shape_cast %229 : vector<1x1x64x1xf32> to vector<64x1xf32>
    %231 = vector.broadcast %230 : vector<64x1xf32> to vector<64x16xf32>
    %232 = arith.addf %228, %231 : vector<64x16xf32>
    %233 = vector.extract_strided_slice %232 {offsets = [0, 0], sizes = [32, 16], strides = [1, 1]} : vector<64x16xf32> to vector<32x16xf32>
    %234 = math.tanh %233 : vector<32x16xf32>
    %235 = vector.extract_strided_slice %232 {offsets = [32, 0], sizes = [32, 16], strides = [1, 1]} : vector<64x16xf32> to vector<32x16xf32>
    %236 = arith.negf %235 : vector<32x16xf32>
    %237 = math.exp %236 : vector<32x16xf32>
    %cst_133 = arith.constant 1.000000e+00 : f32
    %238 = vector.broadcast %cst_133 : f32 to vector<32x16xf32>
    %239 = arith.addf %238, %237 : vector<32x16xf32>
    %240 = arith.divf %238, %239 : vector<32x16xf32>
    %241 = arith.mulf %234, %240 : vector<32x16xf32>
    %c2_134 = arith.constant 2 : index
    %c0_135 = arith.constant 0 : index
    %c0_136 = arith.constant 0 : index
    %c0_137 = arith.constant 0 : index
    %242 = vector.load %arg7[%c2_134, %c0_135, %c0_136, %c0_137] : memref<4x2x64x32xf32, #tpu.memory_space<vmem>>, vector<1x1x64x32xf32>
    %243 = vector.shape_cast %242 : vector<1x1x64x32xf32> to vector<64x32xf32>
    %cst_138 = arith.constant dense<0.000000e+00> : vector<64x16xf32>
    %244 = tpu.matmul %243, %241, %cst_138 {dimension_numbers = #tpu.dot_dimension_numbers<[1], [0], [0], [1], [0, 0, 1, 1], [], []>} : vector<64x32xf32>, vector<32x16xf32>, vector<64x16xf32> -> vector<64x16xf32>
    %c2_139 = arith.constant 2 : index
    %c0_140 = arith.constant 0 : index
    %c0_141 = arith.constant 0 : index
    %c0_142 = arith.constant 0 : index
    %245 = vector.load %arg8[%c2_139, %c0_140, %c0_141, %c0_142] : memref<4x2x64x1xf32, #tpu.memory_space<vmem>>, vector<1x1x64x1xf32>
    %246 = vector.shape_cast %245 : vector<1x1x64x1xf32> to vector<64x1xf32>
    %247 = vector.broadcast %246 : vector<64x1xf32> to vector<64x16xf32>
    %248 = arith.addf %244, %247 : vector<64x16xf32>
    %249 = vector.extract_strided_slice %248 {offsets = [0, 0], sizes = [32, 16], strides = [1, 1]} : vector<64x16xf32> to vector<32x16xf32>
    %250 = arith.addf %216, %249 : vector<32x16xf32>
    %251 = arith.mulf %250, %5 : vector<32x16xf32>
    %252 = vector.extract_strided_slice %248 {offsets = [32, 0], sizes = [32, 16], strides = [1, 1]} : vector<64x16xf32> to vector<32x16xf32>
    %253 = arith.addf %217, %252 : vector<32x16xf32>
    %cst_143 = arith.constant 0.000000e+00 : f32
    %254 = vector.broadcast %cst_143 : f32 to vector<32x2xf32>
    %255 = tpu.concatenate %254, %251, %254 in 1 : vector<32x2xf32>, vector<32x16xf32>, vector<32x2xf32> -> vector<32x20xf32>
    %256 = vector.extract_strided_slice %255 {offsets = [0, 0], sizes = [32, 16], strides = [1, 1]} : vector<32x20xf32> to vector<32x16xf32>
    %257 = vector.extract_strided_slice %255 {offsets = [0, 1], sizes = [32, 16], strides = [1, 1]} : vector<32x20xf32> to vector<32x16xf32>
    %258 = vector.extract_strided_slice %255 {offsets = [0, 2], sizes = [32, 16], strides = [1, 1]} : vector<32x20xf32> to vector<32x16xf32>
    %259 = vector.extract_strided_slice %255 {offsets = [0, 3], sizes = [32, 16], strides = [1, 1]} : vector<32x20xf32> to vector<32x16xf32>
    %260 = vector.extract_strided_slice %255 {offsets = [0, 4], sizes = [32, 16], strides = [1, 1]} : vector<32x20xf32> to vector<32x16xf32>
    %261 = tpu.concatenate %256, %257, %258, %259, %260 in 0 : vector<32x16xf32>, vector<32x16xf32>, vector<32x16xf32>, vector<32x16xf32>, vector<32x16xf32> -> vector<160x16xf32>
    %c2_144 = arith.constant 2 : index
    %c1_145 = arith.constant 1 : index
    %c0_146 = arith.constant 0 : index
    %c0_147 = arith.constant 0 : index
    %262 = vector.load %arg5[%c2_144, %c1_145, %c0_146, %c0_147] : memref<4x2x64x160xf32, #tpu.memory_space<vmem>>, vector<1x1x64x160xf32>
    %263 = vector.shape_cast %262 : vector<1x1x64x160xf32> to vector<64x160xf32>
    %cst_148 = arith.constant dense<0.000000e+00> : vector<64x16xf32>
    %264 = tpu.matmul %263, %261, %cst_148 {dimension_numbers = #tpu.dot_dimension_numbers<[1], [0], [0], [1], [0, 0, 1, 1], [], []>} : vector<64x160xf32>, vector<160x16xf32>, vector<64x16xf32> -> vector<64x16xf32>
    %c2_149 = arith.constant 2 : index
    %c1_150 = arith.constant 1 : index
    %c0_151 = arith.constant 0 : index
    %c0_152 = arith.constant 0 : index
    %265 = vector.load %arg6[%c2_149, %c1_150, %c0_151, %c0_152] : memref<4x2x64x1xf32, #tpu.memory_space<vmem>>, vector<1x1x64x1xf32>
    %266 = vector.shape_cast %265 : vector<1x1x64x1xf32> to vector<64x1xf32>
    %267 = vector.broadcast %266 : vector<64x1xf32> to vector<64x16xf32>
    %268 = arith.addf %264, %267 : vector<64x16xf32>
    %269 = vector.extract_strided_slice %268 {offsets = [0, 0], sizes = [32, 16], strides = [1, 1]} : vector<64x16xf32> to vector<32x16xf32>
    %270 = math.tanh %269 : vector<32x16xf32>
    %271 = vector.extract_strided_slice %268 {offsets = [32, 0], sizes = [32, 16], strides = [1, 1]} : vector<64x16xf32> to vector<32x16xf32>
    %272 = arith.negf %271 : vector<32x16xf32>
    %273 = math.exp %272 : vector<32x16xf32>
    %cst_153 = arith.constant 1.000000e+00 : f32
    %274 = vector.broadcast %cst_153 : f32 to vector<32x16xf32>
    %275 = arith.addf %274, %273 : vector<32x16xf32>
    %276 = arith.divf %274, %275 : vector<32x16xf32>
    %277 = arith.mulf %270, %276 : vector<32x16xf32>
    %c2_154 = arith.constant 2 : index
    %c1_155 = arith.constant 1 : index
    %c0_156 = arith.constant 0 : index
    %c0_157 = arith.constant 0 : index
    %278 = vector.load %arg7[%c2_154, %c1_155, %c0_156, %c0_157] : memref<4x2x64x32xf32, #tpu.memory_space<vmem>>, vector<1x1x64x32xf32>
    %279 = vector.shape_cast %278 : vector<1x1x64x32xf32> to vector<64x32xf32>
    %280 = vector.extract_strided_slice %279 {offsets = [0, 0], sizes = [32, 32], strides = [1, 1]} : vector<64x32xf32> to vector<32x32xf32>
    %cst_158 = arith.constant dense<0.000000e+00> : vector<32x16xf32>
    %281 = tpu.matmul %280, %277, %cst_158 {dimension_numbers = #tpu.dot_dimension_numbers<[1], [0], [0], [1], [0, 0, 1, 1], [], []>} : vector<32x32xf32>, vector<32x16xf32>, vector<32x16xf32> -> vector<32x16xf32>
    %c2_159 = arith.constant 2 : index
    %c1_160 = arith.constant 1 : index
    %c0_161 = arith.constant 0 : index
    %c0_162 = arith.constant 0 : index
    %282 = vector.load %arg8[%c2_159, %c1_160, %c0_161, %c0_162] : memref<4x2x64x1xf32, #tpu.memory_space<vmem>>, vector<1x1x64x1xf32>
    %283 = vector.shape_cast %282 : vector<1x1x64x1xf32> to vector<64x1xf32>
    %284 = vector.extract_strided_slice %283 {offsets = [0, 0], sizes = [32, 1], strides = [1, 1]} : vector<64x1xf32> to vector<32x1xf32>
    %285 = vector.broadcast %284 : vector<32x1xf32> to vector<32x16xf32>
    %286 = arith.addf %281, %285 : vector<32x16xf32>
    %287 = arith.addf %253, %286 : vector<32x16xf32>
    %288 = arith.mulf %287, %5 : vector<32x16xf32>
    %c2_163 = arith.constant 2 : index
    %c0_164 = arith.constant 0 : index
    %c0_165 = arith.constant 0 : index
    %289 = vector.load %arg9[%c2_163, %c0_164, %c0_165] : memref<4x4x32xf32, #tpu.memory_space<vmem>>, vector<1x4x32xf32>
    %290 = vector.shape_cast %289 : vector<1x4x32xf32> to vector<4x32xf32>
    %cst_166 = arith.constant dense<0.000000e+00> : vector<4x16xf32>
    %291 = tpu.matmul %290, %288, %cst_166 {dimension_numbers = #tpu.dot_dimension_numbers<[1], [0], [0], [1], [0, 0, 1, 1], [], []>} : vector<4x32xf32>, vector<32x16xf32>, vector<4x16xf32> -> vector<4x16xf32>
    %c2_167 = arith.constant 2 : index
    %c0_168 = arith.constant 0 : index
    %c0_169 = arith.constant 0 : index
    %292 = vector.load %arg10[%c2_167, %c0_168, %c0_169] : memref<4x4x1xf32, #tpu.memory_space<vmem>>, vector<1x4x1xf32>
    %293 = vector.shape_cast %292 : vector<1x4x1xf32> to vector<4x1xf32>
    %294 = vector.broadcast %293 : vector<4x1xf32> to vector<4x16xf32>
    %295 = arith.addf %291, %294 : vector<4x16xf32>
    %296 = arith.mulf %295, %7 : vector<4x16xf32>
    %297 = vector.broadcast %12 : vector<4x1xf32> to vector<4x16xf32>
    %298 = arith.mulf %7, %297 : vector<4x16xf32>
    %cst_170 = arith.constant 1.000000e+00 : f32
    %299 = vector.broadcast %cst_170 : f32 to vector<4x1xf32>
    %300 = arith.subf %299, %12 : vector<4x1xf32>
    %301 = vector.broadcast %300 : vector<4x1xf32> to vector<4x16xf32>
    %302 = arith.addf %298, %301 : vector<4x16xf32>
    %303 = arith.mulf %208, %302 : vector<4x16xf32>
    %304 = arith.addf %303, %296 : vector<4x16xf32>
    %c3 = arith.constant 3 : index
    %c0_171 = arith.constant 0 : index
    %c0_172 = arith.constant 0 : index
    %305 = vector.load %arg3[%c3, %c0_171, %c0_172] : memref<4x32x4xf32, #tpu.memory_space<vmem>>, vector<1x32x4xf32>
    %306 = vector.shape_cast %305 : vector<1x32x4xf32> to vector<32x4xf32>
    %cst_173 = arith.constant dense<0.000000e+00> : vector<32x16xf32>
    %307 = tpu.matmul %306, %304, %cst_173 {dimension_numbers = #tpu.dot_dimension_numbers<[1], [0], [0], [1], [0, 0, 1, 1], [], []>} : vector<32x4xf32>, vector<4x16xf32>, vector<32x16xf32> -> vector<32x16xf32>
    %c3_174 = arith.constant 3 : index
    %c0_175 = arith.constant 0 : index
    %c0_176 = arith.constant 0 : index
    %308 = vector.load %arg4[%c3_174, %c0_175, %c0_176] : memref<4x32x1xf32, #tpu.memory_space<vmem>>, vector<1x32x1xf32>
    %309 = vector.shape_cast %308 : vector<1x32x1xf32> to vector<32x1xf32>
    %310 = vector.broadcast %309 : vector<32x1xf32> to vector<32x16xf32>
    %311 = arith.addf %307, %310 : vector<32x16xf32>
    %312 = arith.mulf %311, %5 : vector<32x16xf32>
    %cst_177 = arith.constant 0.000000e+00 : f32
    %313 = vector.broadcast %cst_177 : f32 to vector<32x16xf32>
    %cst_178 = arith.constant 0.000000e+00 : f32
    %314 = vector.broadcast %cst_178 : f32 to vector<32x2xf32>
    %315 = tpu.concatenate %314, %312, %314 in 1 : vector<32x2xf32>, vector<32x16xf32>, vector<32x2xf32> -> vector<32x20xf32>
    %316 = vector.extract_strided_slice %315 {offsets = [0, 0], sizes = [32, 16], strides = [1, 1]} : vector<32x20xf32> to vector<32x16xf32>
    %317 = vector.extract_strided_slice %315 {offsets = [0, 1], sizes = [32, 16], strides = [1, 1]} : vector<32x20xf32> to vector<32x16xf32>
    %318 = vector.extract_strided_slice %315 {offsets = [0, 2], sizes = [32, 16], strides = [1, 1]} : vector<32x20xf32> to vector<32x16xf32>
    %319 = vector.extract_strided_slice %315 {offsets = [0, 3], sizes = [32, 16], strides = [1, 1]} : vector<32x20xf32> to vector<32x16xf32>
    %320 = vector.extract_strided_slice %315 {offsets = [0, 4], sizes = [32, 16], strides = [1, 1]} : vector<32x20xf32> to vector<32x16xf32>
    %321 = tpu.concatenate %316, %317, %318, %319, %320 in 0 : vector<32x16xf32>, vector<32x16xf32>, vector<32x16xf32>, vector<32x16xf32>, vector<32x16xf32> -> vector<160x16xf32>
    %c3_179 = arith.constant 3 : index
    %c0_180 = arith.constant 0 : index
    %c0_181 = arith.constant 0 : index
    %c0_182 = arith.constant 0 : index
    %322 = vector.load %arg5[%c3_179, %c0_180, %c0_181, %c0_182] : memref<4x2x64x160xf32, #tpu.memory_space<vmem>>, vector<1x1x64x160xf32>
    %323 = vector.shape_cast %322 : vector<1x1x64x160xf32> to vector<64x160xf32>
    %cst_183 = arith.constant dense<0.000000e+00> : vector<64x16xf32>
    %324 = tpu.matmul %323, %321, %cst_183 {dimension_numbers = #tpu.dot_dimension_numbers<[1], [0], [0], [1], [0, 0, 1, 1], [], []>} : vector<64x160xf32>, vector<160x16xf32>, vector<64x16xf32> -> vector<64x16xf32>
    %c3_184 = arith.constant 3 : index
    %c0_185 = arith.constant 0 : index
    %c0_186 = arith.constant 0 : index
    %c0_187 = arith.constant 0 : index
    %325 = vector.load %arg6[%c3_184, %c0_185, %c0_186, %c0_187] : memref<4x2x64x1xf32, #tpu.memory_space<vmem>>, vector<1x1x64x1xf32>
    %326 = vector.shape_cast %325 : vector<1x1x64x1xf32> to vector<64x1xf32>
    %327 = vector.broadcast %326 : vector<64x1xf32> to vector<64x16xf32>
    %328 = arith.addf %324, %327 : vector<64x16xf32>
    %329 = vector.extract_strided_slice %328 {offsets = [0, 0], sizes = [32, 16], strides = [1, 1]} : vector<64x16xf32> to vector<32x16xf32>
    %330 = math.tanh %329 : vector<32x16xf32>
    %331 = vector.extract_strided_slice %328 {offsets = [32, 0], sizes = [32, 16], strides = [1, 1]} : vector<64x16xf32> to vector<32x16xf32>
    %332 = arith.negf %331 : vector<32x16xf32>
    %333 = math.exp %332 : vector<32x16xf32>
    %cst_188 = arith.constant 1.000000e+00 : f32
    %334 = vector.broadcast %cst_188 : f32 to vector<32x16xf32>
    %335 = arith.addf %334, %333 : vector<32x16xf32>
    %336 = arith.divf %334, %335 : vector<32x16xf32>
    %337 = arith.mulf %330, %336 : vector<32x16xf32>
    %c3_189 = arith.constant 3 : index
    %c0_190 = arith.constant 0 : index
    %c0_191 = arith.constant 0 : index
    %c0_192 = arith.constant 0 : index
    %338 = vector.load %arg7[%c3_189, %c0_190, %c0_191, %c0_192] : memref<4x2x64x32xf32, #tpu.memory_space<vmem>>, vector<1x1x64x32xf32>
    %339 = vector.shape_cast %338 : vector<1x1x64x32xf32> to vector<64x32xf32>
    %cst_193 = arith.constant dense<0.000000e+00> : vector<64x16xf32>
    %340 = tpu.matmul %339, %337, %cst_193 {dimension_numbers = #tpu.dot_dimension_numbers<[1], [0], [0], [1], [0, 0, 1, 1], [], []>} : vector<64x32xf32>, vector<32x16xf32>, vector<64x16xf32> -> vector<64x16xf32>
    %c3_194 = arith.constant 3 : index
    %c0_195 = arith.constant 0 : index
    %c0_196 = arith.constant 0 : index
    %c0_197 = arith.constant 0 : index
    %341 = vector.load %arg8[%c3_194, %c0_195, %c0_196, %c0_197] : memref<4x2x64x1xf32, #tpu.memory_space<vmem>>, vector<1x1x64x1xf32>
    %342 = vector.shape_cast %341 : vector<1x1x64x1xf32> to vector<64x1xf32>
    %343 = vector.broadcast %342 : vector<64x1xf32> to vector<64x16xf32>
    %344 = arith.addf %340, %343 : vector<64x16xf32>
    %345 = vector.extract_strided_slice %344 {offsets = [0, 0], sizes = [32, 16], strides = [1, 1]} : vector<64x16xf32> to vector<32x16xf32>
    %346 = arith.addf %312, %345 : vector<32x16xf32>
    %347 = arith.mulf %346, %5 : vector<32x16xf32>
    %348 = vector.extract_strided_slice %344 {offsets = [32, 0], sizes = [32, 16], strides = [1, 1]} : vector<64x16xf32> to vector<32x16xf32>
    %349 = arith.addf %313, %348 : vector<32x16xf32>
    %cst_198 = arith.constant 0.000000e+00 : f32
    %350 = vector.broadcast %cst_198 : f32 to vector<32x4xf32>
    %351 = tpu.concatenate %350, %347, %350 in 1 : vector<32x4xf32>, vector<32x16xf32>, vector<32x4xf32> -> vector<32x24xf32>
    %352 = vector.extract_strided_slice %351 {offsets = [0, 0], sizes = [32, 16], strides = [1, 1]} : vector<32x24xf32> to vector<32x16xf32>
    %353 = vector.extract_strided_slice %351 {offsets = [0, 2], sizes = [32, 16], strides = [1, 1]} : vector<32x24xf32> to vector<32x16xf32>
    %354 = vector.extract_strided_slice %351 {offsets = [0, 4], sizes = [32, 16], strides = [1, 1]} : vector<32x24xf32> to vector<32x16xf32>
    %355 = vector.extract_strided_slice %351 {offsets = [0, 6], sizes = [32, 16], strides = [1, 1]} : vector<32x24xf32> to vector<32x16xf32>
    %356 = vector.extract_strided_slice %351 {offsets = [0, 8], sizes = [32, 16], strides = [1, 1]} : vector<32x24xf32> to vector<32x16xf32>
    %357 = tpu.concatenate %352, %353, %354, %355, %356 in 0 : vector<32x16xf32>, vector<32x16xf32>, vector<32x16xf32>, vector<32x16xf32>, vector<32x16xf32> -> vector<160x16xf32>
    %c3_199 = arith.constant 3 : index
    %c1_200 = arith.constant 1 : index
    %c0_201 = arith.constant 0 : index
    %c0_202 = arith.constant 0 : index
    %358 = vector.load %arg5[%c3_199, %c1_200, %c0_201, %c0_202] : memref<4x2x64x160xf32, #tpu.memory_space<vmem>>, vector<1x1x64x160xf32>
    %359 = vector.shape_cast %358 : vector<1x1x64x160xf32> to vector<64x160xf32>
    %cst_203 = arith.constant dense<0.000000e+00> : vector<64x16xf32>
    %360 = tpu.matmul %359, %357, %cst_203 {dimension_numbers = #tpu.dot_dimension_numbers<[1], [0], [0], [1], [0, 0, 1, 1], [], []>} : vector<64x160xf32>, vector<160x16xf32>, vector<64x16xf32> -> vector<64x16xf32>
    %c3_204 = arith.constant 3 : index
    %c1_205 = arith.constant 1 : index
    %c0_206 = arith.constant 0 : index
    %c0_207 = arith.constant 0 : index
    %361 = vector.load %arg6[%c3_204, %c1_205, %c0_206, %c0_207] : memref<4x2x64x1xf32, #tpu.memory_space<vmem>>, vector<1x1x64x1xf32>
    %362 = vector.shape_cast %361 : vector<1x1x64x1xf32> to vector<64x1xf32>
    %363 = vector.broadcast %362 : vector<64x1xf32> to vector<64x16xf32>
    %364 = arith.addf %360, %363 : vector<64x16xf32>
    %365 = vector.extract_strided_slice %364 {offsets = [0, 0], sizes = [32, 16], strides = [1, 1]} : vector<64x16xf32> to vector<32x16xf32>
    %366 = math.tanh %365 : vector<32x16xf32>
    %367 = vector.extract_strided_slice %364 {offsets = [32, 0], sizes = [32, 16], strides = [1, 1]} : vector<64x16xf32> to vector<32x16xf32>
    %368 = arith.negf %367 : vector<32x16xf32>
    %369 = math.exp %368 : vector<32x16xf32>
    %cst_208 = arith.constant 1.000000e+00 : f32
    %370 = vector.broadcast %cst_208 : f32 to vector<32x16xf32>
    %371 = arith.addf %370, %369 : vector<32x16xf32>
    %372 = arith.divf %370, %371 : vector<32x16xf32>
    %373 = arith.mulf %366, %372 : vector<32x16xf32>
    %c3_209 = arith.constant 3 : index
    %c1_210 = arith.constant 1 : index
    %c0_211 = arith.constant 0 : index
    %c0_212 = arith.constant 0 : index
    %374 = vector.load %arg7[%c3_209, %c1_210, %c0_211, %c0_212] : memref<4x2x64x32xf32, #tpu.memory_space<vmem>>, vector<1x1x64x32xf32>
    %375 = vector.shape_cast %374 : vector<1x1x64x32xf32> to vector<64x32xf32>
    %376 = vector.extract_strided_slice %375 {offsets = [0, 0], sizes = [32, 32], strides = [1, 1]} : vector<64x32xf32> to vector<32x32xf32>
    %cst_213 = arith.constant dense<0.000000e+00> : vector<32x16xf32>
    %377 = tpu.matmul %376, %373, %cst_213 {dimension_numbers = #tpu.dot_dimension_numbers<[1], [0], [0], [1], [0, 0, 1, 1], [], []>} : vector<32x32xf32>, vector<32x16xf32>, vector<32x16xf32> -> vector<32x16xf32>
    %c3_214 = arith.constant 3 : index
    %c1_215 = arith.constant 1 : index
    %c0_216 = arith.constant 0 : index
    %c0_217 = arith.constant 0 : index
    %378 = vector.load %arg8[%c3_214, %c1_215, %c0_216, %c0_217] : memref<4x2x64x1xf32, #tpu.memory_space<vmem>>, vector<1x1x64x1xf32>
    %379 = vector.shape_cast %378 : vector<1x1x64x1xf32> to vector<64x1xf32>
    %380 = vector.extract_strided_slice %379 {offsets = [0, 0], sizes = [32, 1], strides = [1, 1]} : vector<64x1xf32> to vector<32x1xf32>
    %381 = vector.broadcast %380 : vector<32x1xf32> to vector<32x16xf32>
    %382 = arith.addf %377, %381 : vector<32x16xf32>
    %383 = arith.addf %349, %382 : vector<32x16xf32>
    %384 = arith.mulf %383, %5 : vector<32x16xf32>
    %c3_218 = arith.constant 3 : index
    %c0_219 = arith.constant 0 : index
    %c0_220 = arith.constant 0 : index
    %385 = vector.load %arg9[%c3_218, %c0_219, %c0_220] : memref<4x4x32xf32, #tpu.memory_space<vmem>>, vector<1x4x32xf32>
    %386 = vector.shape_cast %385 : vector<1x4x32xf32> to vector<4x32xf32>
    %cst_221 = arith.constant dense<0.000000e+00> : vector<4x16xf32>
    %387 = tpu.matmul %386, %384, %cst_221 {dimension_numbers = #tpu.dot_dimension_numbers<[1], [0], [0], [1], [0, 0, 1, 1], [], []>} : vector<4x32xf32>, vector<32x16xf32>, vector<4x16xf32> -> vector<4x16xf32>
    %c3_222 = arith.constant 3 : index
    %c0_223 = arith.constant 0 : index
    %c0_224 = arith.constant 0 : index
    %388 = vector.load %arg10[%c3_222, %c0_223, %c0_224] : memref<4x4x1xf32, #tpu.memory_space<vmem>>, vector<1x4x1xf32>
    %389 = vector.shape_cast %388 : vector<1x4x1xf32> to vector<4x1xf32>
    %390 = vector.broadcast %389 : vector<4x1xf32> to vector<4x16xf32>
    %391 = arith.addf %387, %390 : vector<4x16xf32>
    %392 = arith.mulf %391, %7 : vector<4x16xf32>
    %393 = vector.broadcast %16 : vector<4x1xf32> to vector<4x16xf32>
    %394 = arith.mulf %7, %393 : vector<4x16xf32>
    %cst_225 = arith.constant 1.000000e+00 : f32
    %395 = vector.broadcast %cst_225 : f32 to vector<4x1xf32>
    %396 = arith.subf %395, %16 : vector<4x1xf32>
    %397 = vector.broadcast %396 : vector<4x1xf32> to vector<4x16xf32>
    %398 = arith.addf %394, %397 : vector<4x16xf32>
    %399 = arith.mulf %304, %398 : vector<4x16xf32>
    %400 = arith.addf %399, %392 : vector<4x16xf32>
    %c0_226 = arith.constant 0 : index
    %c0_227 = arith.constant 0 : index
    %c0_228 = arith.constant 0 : index
    %401 = vector.load %arg11[%c0_226, %c0_227, %c0_228] : memref<1x4x16xf32, #tpu.memory_space<vmem>>, vector<1x4x16xf32>
    %402 = vector.shape_cast %401 : vector<1x4x16xf32> to vector<4x16xf32>
    %403 = vector.shape_cast %400 : vector<4x16xf32> to vector<1x4x16xf32>
    tpu.vector_store %arg11[%c0_226, %c0_227, %c0_228], %403 {strides = array<i32>} : memref<1x4x16xf32, #tpu.memory_space<vmem>>, vector<1x4x16xf32>,
    return
  }
  func.func @transform_0(%arg0: i32) -> (i32, i32, i32) {
    %c0_i32 = arith.constant 0 : i32
    %c0_i32_0 = arith.constant 0 : i32
    %c0_i32_1 = arith.constant 0 : i32
    return %arg0, %c0_i32, %c0_i32_0 : i32, i32, i32
  }
  func.func @transform_1(%arg0: i32) -> (i32, i32, i32) {
    %c0_i32 = arith.constant 0 : i32
    %c0_i32_0 = arith.constant 0 : i32
    %c0_i32_1 = arith.constant 0 : i32
    return %arg0, %c0_i32, %c0_i32_0 : i32, i32, i32
  }
  func.func @transform_2(%arg0: i32) -> (i32, i32, i32) {
    %c0_i32 = arith.constant 0 : i32
    %c0_i32_0 = arith.constant 0 : i32
    %c0_i32_1 = arith.constant 0 : i32
    %c0_i32_2 = arith.constant 0 : i32
    return %c0_i32, %c0_i32_0, %c0_i32_1 : i32, i32, i32
  }
  func.func @transform_3(%arg0: i32) -> (i32, i32, i32) {
    %c0_i32 = arith.constant 0 : i32
    %c0_i32_0 = arith.constant 0 : i32
    %c0_i32_1 = arith.constant 0 : i32
    %c0_i32_2 = arith.constant 0 : i32
    return %c0_i32, %c0_i32_0, %c0_i32_1 : i32, i32, i32
  }
  func.func @transform_4(%arg0: i32) -> (i32, i32, i32, i32) {
    %c0_i32 = arith.constant 0 : i32
    %c0_i32_0 = arith.constant 0 : i32
    %c0_i32_1 = arith.constant 0 : i32
    %c0_i32_2 = arith.constant 0 : i32
    %c0_i32_3 = arith.constant 0 : i32
    return %c0_i32, %c0_i32_0, %c0_i32_1, %c0_i32_2 : i32, i32, i32, i32
  }
  func.func @transform_5(%arg0: i32) -> (i32, i32, i32, i32) {
    %c0_i32 = arith.constant 0 : i32
    %c0_i32_0 = arith.constant 0 : i32
    %c0_i32_1 = arith.constant 0 : i32
    %c0_i32_2 = arith.constant 0 : i32
    %c0_i32_3 = arith.constant 0 : i32
    return %c0_i32, %c0_i32_0, %c0_i32_1, %c0_i32_2 : i32, i32, i32, i32
  }
  func.func @transform_6(%arg0: i32) -> (i32, i32, i32, i32) {
    %c0_i32 = arith.constant 0 : i32
    %c0_i32_0 = arith.constant 0 : i32
    %c0_i32_1 = arith.constant 0 : i32
    %c0_i32_2 = arith.constant 0 : i32
    %c0_i32_3 = arith.constant 0 : i32
    return %c0_i32, %c0_i32_0, %c0_i32_1, %c0_i32_2 : i32, i32, i32, i32
  }
  func.func @transform_7(%arg0: i32) -> (i32, i32, i32, i32) {
    %c0_i32 = arith.constant 0 : i32
    %c0_i32_0 = arith.constant 0 : i32
    %c0_i32_1 = arith.constant 0 : i32
    %c0_i32_2 = arith.constant 0 : i32
    %c0_i32_3 = arith.constant 0 : i32
    return %c0_i32, %c0_i32_0, %c0_i32_1, %c0_i32_2 : i32, i32, i32, i32
  }
  func.func @transform_8(%arg0: i32) -> (i32, i32, i32) {
    %c0_i32 = arith.constant 0 : i32
    %c0_i32_0 = arith.constant 0 : i32
    %c0_i32_1 = arith.constant 0 : i32
    %c0_i32_2 = arith.constant 0 : i32
    return %c0_i32, %c0_i32_0, %c0_i32_1 : i32, i32, i32
  }
  func.func @transform_9(%arg0: i32) -> (i32, i32, i32) {
    %c0_i32 = arith.constant 0 : i32
    %c0_i32_0 = arith.constant 0 : i32
    %c0_i32_1 = arith.constant 0 : i32
    %c0_i32_2 = arith.constant 0 : i32
    return %c0_i32, %c0_i32_0, %c0_i32_1 : i32, i32, i32
  }
  func.func @transform_10(%arg0: i32) -> (i32, i32, i32) {
    %c0_i32 = arith.constant 0 : i32
    %c0_i32_0 = arith.constant 0 : i32
    %c0_i32_1 = arith.constant 0 : i32
    return %arg0, %c0_i32, %c0_i32_0 : i32, i32, i32
  }
}

</mosaic_0001>

<bundles_post_ra>
// kernel: forward.1
= control target key start
LH: loop header
LB: loop body
LE: loop exit
PB: predicated region body
PF: predicated region fallthrough
CT: control target
= control target key end

     0   :  { %s8790_s0 = inlined_call_operand.vmem [shape: f32[2,4,16], index: 0, kind: input, shape index: {}]   ;;  %s8791_s1 = inlined_call_operand.vmem [shape: f32[2,1,16], index: 1, kind: input, shape index: {}]   ;;  %s8792_s2 = inlined_call_operand.vmem [shape: f32[4,32,4], index: 2, kind: input, shape index: {}]   ;;  %s8793_s3 = inlined_call_operand.vmem [shape: f32[4,32,1], index: 3, kind: input, shape index: {}]   ;;  %s8794_s4 = inlined_call_operand.vmem [shape: f32[4,2,64,160], index: 4, kind: input, shape index: {}]   ;;  %s8795_s5 = inlined_call_operand.vmem [shape: f32[4,2,64,1], index: 5, kind: input, shape index: {}]   ;;  %s8796_s6 = inlined_call_operand.vmem [shape: f32[4,2,64,32], index: 6, kind: input, shape index: {}]   ;;  %s8797_s7 = inlined_call_operand.vmem [shape: f32[4,2,64,1], index: 7, kind: input, shape index: {}]   ;;  %s8798_s8 = inlined_call_operand.vmem [shape: f32[4,4,32], index: 8, kind: input, shape index: {}]   ;;  %s8799_s9 = inlined_call_operand.vmem [shape: f32[4,4,1], index: 9, kind: input, shape index: {}]   ;;  %s8800_s10 = inlined_call_operand.hbm [shape: f32[2,4,16], index: 10, kind: output, shape index: {}]  }
   0x1   :  { %8819 = sst [smem:[#allocation9_spill]] %s8790_s0 }
   0x2   :  { %8820 = sst [smem:[#allocation10_spill]] %s8791_s1 }
   0x3   :  { %15 = vsyncpa [#allocation3], 0 }
   0x4   :  { %17 = vsyncpa [#allocation3 + $0x1], 0  ;;  %s7106_s13 = smov 0   ;;  %s7108_s14 = smov 0  }
   0x5   :  { %s7110_s15 = smov 0   ;;  %s7112_s16 = smov 0  }
   0x6 LB: > { %8821 = sst [smem:[#allocation5_spill]] %s7032_s15  ;;  %s7127_s17 = sadd.s32 4294967295, %s7036_s16   ;;  %s7036_s16 = sphi %s7112_s16, %s8841_s16   ;;  %s7032_s15 = sphi %s7110_s15, %s8843_s15   ;;  %s7028_s14 = sphi %s7108_s14, %s8845_s14   ;;  %s7024_s13 = sphi %s7106_s13, %s8844_s13  }
   0x7   : > { %s5109_s18 = sadd.s32 4294967294, %s7036_s16   ;;  %s7131_s19 = sadd.s32 1, %s7036_s16  }
   0x8   : > { %8822 = sst [smem:[#allocation6_spill]] %s7131_s19  ;;  %s250_s20 = sadd.s32 1, %s7032_s15 }
   0x9   : > { %s247_s21 = ssub.s32 %s7036_s16, %s7131_s19  ;;  %p260_p0 = scmp.ne.s32.totalorder %s7032_s15, %s7028_s14 }
   0xa   : > { %p248_p1 = scmp.eq.s32.totalorder %s247_s21, 0  ;;  %p261_p2 = scmp.eq.s32.totalorder %s7127_s17, 1 }
   0xb   : > { %p266_p3 = scmp.ne.s32.totalorder %s7028_s14, %s7024_s13  ;;  %p267_p4 = scmp.eq.s32.totalorder %s5109_s18, 1 }
   0xc   : > { %s7142_s22 = scalar_select %p248_p1, %s7032_s15, %s250_s20  }
   0xd   : > { %p7144_p5 = por %p261_p2, %p260_p0  ;;  %p7148_p6 = por %p267_p4, %p266_p3 }
   0xe   : > { %8823 = sst [smem:[#allocation7_spill]] %s7142_s22  ;;  %p5112_p7 = scmp.ge.s32.totalorder %s7036_s16, 1 }
   0xf   : > { %s8825_s24 = scalar_select %p7148_p6, 1, 0 }
  0x10   : > { %p322_p8 = scmp.lt.s32.totalorder %s7036_s16, 3 }
  0x11   : > { %8826 = sst [smem:[#allocation8_spill]] %s8825_s24 }
  0x12   : > { %p323_p9 = pnand %p5112_p7, %p322_p8 }
  0x13   : > { %p362_p10 = scmp.lt.s32.totalorder (!%p323_p9), %s7127_s17, 1  ;;  %v385_v0 = vld [vmem:[%s8792_s2] sm:$0xff] (!%p323_p9)  ;;  %vm413_vm0 = vcmask (!%p323_p9), 31744   ;;  %v7038_v2 = vmov (!%p323_p9), 0   ;;  %v391_v3 = vld [vmem:[%s8793_s3 + $0x10] sm:$0xff] (!%p323_p9)  ;;  %vm426_vm1 = vcmask (!%p323_p9), 1043456  }
  0x14   : > { %326 = sbr.rel (%p323_p9) target bundleno = 7966 (0x1f1e), region = 60  ;;  %5722 = vmatprep.mubr.msk.f32.mxu0 (!%p323_p9), %vm413_vm0, %v385_v0  ;;  %v389_v1 = vld [vmem:[%s8793_s3] sm:$0xff] (!%p323_p9)  ;;  %6375 = vset.pattern.permute.xlu0 (!%p323_p9), %v7038_v2  ;;  %v390_v4 = vld [vmem:[%s8793_s3 + $0x8] sm:$0xff] (!%p323_p9)  ;;  %s8827_s0 = sld [smem:[#allocation9_spill]] (!%p323_p9)  ;;  %v392_v5 = vld [vmem:[%s8793_s3 + $0x18] sm:$0xff] (!%p323_p9)  ;;  %v7039_v12 = vmov (!%p323_p9), 0.0|0.0  }
  0x15   : > { %6376 = vset.pattern.permute.xlu1 (!%p323_p9), %v7038_v2  ;;  %395 = vperm.xlu0 (!%p323_p9), %6375, %v389_v1   ;;  %v386_v7 = vld [vmem:[%s8792_s2 + $0x8] sm:$0xff] (!%p323_p9)  ;;  %v387_v8 = vld [vmem:[%s8792_s2 + $0x10] sm:$0xff] (!%p323_p9)  ;;  %v388_v9 = vld [vmem:[%s8792_s2 + $0x18] sm:$0xff] (!%p323_p9)  ;;  %s8828_s1 = sld [smem:[#allocation10_spill]] (!%p323_p9)  ;;  %vm535_vm2 = vcmask (!%p323_p9), 15360   ;;  %vm540_vm3 = vcmask (!%p323_p9), 146432  }
  0x16   : > { %405 = vperm.xlu1 (!%p323_p9), %6376, %v391_v3   ;;  %5932 = vmatprep.subr.bf16.mxu1 (!%p323_p9), %v7039_v12  ;;  %vm7224_vm4 = vmpackc.low (!%p323_p9), %vm540_vm3, %vm540_vm3  ;;  %s8803_s27 = smov (!%p323_p9), 127   ;;  %s8801_s28 = smov (!%p323_p9), 126   ;;  %v617_v49 = vld [vmem:[%s8795_s5 + $0x20] sm:$0xff] (!%p323_p9)  ;;  %v618_v50 = vld [vmem:[%s8795_s5 + $0x28] sm:$0xff] (!%p323_p9)  ;;  %vm661_vm5 = vcmask (!%p323_p9), 261120   ;;  %vm7045_vm6 = vmmov (!%p323_p9), 0  }
  0x17   : > { %s8805_s30 = smov (!%p323_p9), 125   ;;  %s8807_s11 = smov (!%p323_p9), 124   ;;  %v619_v51 = vld [vmem:[%s8795_s5 + $0x30] sm:$0xff] (!%p323_p9)  ;;  %v598_v52 = vld [vmem:[%s8794_s4 + $0x8] sm:$0xff] (!%p323_p9)  ;;  %v620_v53 = vld [vmem:[%s8795_s5 + $0x38] sm:$0xff] (!%p323_p9)  ;;  %vm2200_vm8 = vcmask (!%p323_p9), 162816  }
  0x18   : > { %v613_v54 = vld [vmem:[%s8795_s5] sm:$0xff] (!%p323_p9)  ;;  %5127 = vmatprep.mubr.msk.f32.mxu1 (!%p323_p9), %vm661_vm5, %v598_v52  ;;  %v614_v55 = vld [vmem:[%s8795_s5 + $0x8] sm:$0xff] (!%p323_p9)  ;;  %v615_v56 = vld [vmem:[%s8795_s5 + $0x10] sm:$0xff] (!%p323_p9)  ;;  %s8832_s20 = smov (!%p323_p9), 127   ;;  %s8835_s21 = smov (!%p323_p9), 124   ;;  %vm5025_vm11 = vcmask (!%p323_p9), 125952  }
  0x19   : > { %400 = vperm.xlu0 (!%p323_p9), %6375, %v390_v4   ;;  %v616_v57 = vld [vmem:[%s8795_s5 + $0x18] sm:$0xff] (!%p323_p9)  ;;  %v831_v58 = vld [vmem:[%s8797_s7] sm:$0xff] (!%p323_p9)  ;;  %v832_v59 = vld [vmem:[%s8797_s7 + $0x8] sm:$0xff] (!%p323_p9)  ;;  %s8817_s25 = smov (!%p323_p9), 122   ;;  %s8815_s15 = smov (!%p323_p9), 120  }
  0x1a   : > { %410 = vperm.xlu1 (!%p323_p9), %6376, %v392_v5   ;;  %v833_v60 = vld [vmem:[%s8797_s7 + $0x10] sm:$0xff] (!%p323_p9)  ;;  %v834_v61 = vld [vmem:[%s8797_s7 + $0x18] sm:$0xff] (!%p323_p9)  ;;  %v823_v52 = vld [vmem:[%s8796_s6] sm:$0xff] (!%p323_p9)  ;;  %s7050_s18 = smov (!%p323_p9), [#allocation2]  }
  0x1b   : > { %s363_s29 = scalar_select %p362_p10, %s7127_s17, 1  ;;  %vm7786_vm9 = vmpackc.low %vm2200_vm8, %vm2200_vm8  ;;  %v5498_v35 = vld [vmem:[%s8795_s5 + $0x1a8] sm:$0xff] }
  0x1c   : > { %s6978_s24 = sshll.u32 %s7050_s18, 4  ;;  %s6979_s24 = int_to_ptr.vmem [resolvable:$false] %s6978_s24 }
  0x1d   : > { %s5114_s12 = sshll.u32 %s363_s29, 2  ;;  %s7195_s22 = scalar_lea.vmem %s8828_s1, %s363_s29 }
  0x1e   : > { %s7172_s26 = scalar_lea.vmem %s8827_s0, %s5114_s12  ;;  %v7200_v13 = vld [vmem:[%s7195_s22] ss:$0 sm:$0xff]  ;;  %s8809_s29 = smov 2  }
  0x1f   : > { %v369_v6 = vld [vmem:[%s7172_s26] sm:$0xf]  ;;  %s8839_s0 = smov 120  }
  0x20   : > { %5720 = vmatprep.subr.msk.mxu0 %vm426_vm1, %v369_v6 }
  0x21   : > { %5721 = vmatpush3.msk.msra.mxu0 %vm426_vm1, %v369_v6 }
  0x22   : > { %5723 = vmatmul.mubr.msk.f32.vlgmr.msra.gmra.mrb[0].mxu0 %vm413_vm0, %v386_v7  ;;  %5972 = vmatprep.subr.bf16.mxu0 %v7039_v12 }
  0x23   : > { %5725 = vmatprep.mubr.msk.f32.mxu0 %vm413_vm0, %v387_v8 }
  0x26   : > { %5726 = vmatmul.mubr.msk.f32.gmra.mrb[2].mxu0 %vm413_vm0, %v388_v9 }
  0x94   : > { %v396_v10 = vpop.permute.xlu0 %395 }
  0x95   : > { %v406_v11 = vpop.permute.xlu1 %405 }
  0x98   : > { %v401_v14 = vpop.permute.xlu0 %400 }
  0x99   : > { %v411_v20 = vpop.permute.xlu1 %410 }
  0xf5   : > { %v5724_v15 = vpop.f32.mrb[0].mxu0 }
  0xf6   : > { %v502_v16 = vadd.f32 %v5724_v15, %v401_v14  ;;  %v496_v17 = vpop.f32.mrb[1].mxu0 }
  0xf7   : > { %v497_v18 = vadd.f32 %v496_v17, %v396_v10 }
  0xf8   : > { %v7203_v19 = vmul.f32 %v7200_v13, %v502_v16 }
  0xf9   : > { %v7206_v21 = vmul.f32 %v7200_v13, %v497_v18  ;;  %v5727_v22 = vpop.f32.mrb[2].mxu0 }
  0xfa   : > { %v512_v23 = vadd.f32 %v5727_v22, %v411_v20  ;;  %v506_v24 = vpop.f32.mrb[3].mxu0 }
  0xfb   : > { %v507_v25 = vadd.f32 %v506_v24, %v406_v11  ;;  %v6377_v26 = vpack.i.bf16 %v7203_v19, %v7206_v21 }
  0xfc   : > { %v7211_v27 = vmul.f32 %v7200_v13, %v512_v23 }
  0xfd   : > { %v7214_v28 = vmul.f32 %v7200_v13, %v507_v25  ;;  %6378 = vrot.lane.b32.xlu0 %v6377_v26, %s8809_s29 }
  0xff   : > { %v6382_v29 = vpack.i.bf16 %v7211_v27, %v7214_v28 }
 0x101   : > { %6383 = vrot.lane.b32.xlu1 %v6382_v29, %s8809_s29 }
 0x16f   : > { %v6379_v30 = vpop.permute.xlu0 %6378 }
 0x170   : > { %v6381_v31 = vunpack.i.h.bf16 %v6379_v30  ;;  %v6380_v32 = vunpack.i.l.bf16 %v6379_v30 }
 0x172   : > { %v536_v33 = vsel %vm535_vm2, 0.0, %v6380_v32  ;;  %v537_v34 = vsel %vm535_vm2, 0.0, %v6381_v31 }
 0x173   : > { %v6384_v36 = vpop.permute.xlu1 %6383  ;;  %v541_v37 = vsel %vm540_vm3, %v536_v33, 0.0  ;;  %v542_v38 = vsel %vm540_vm3, %v537_v34, 0.0  ;;  %v5933_v39 = vpack.c.bf16 %v537_v34, %v536_v33 }
 0x174   : > { %v6386_v40 = vunpack.i.h.bf16 %v6384_v36  ;;  %v6385_v41 = vunpack.i.l.bf16 %v6384_v36  ;;  %v6387_v42 = vpack.i.bf16 %v542_v38, %v541_v37  ;;  %v597_v37 = vld [vmem:[%s8794_s4] sm:$0xff]  ;;  %v600_v38 = vld [vmem:[%s8794_s4 + $0x18] sm:$0xff] }
 0x175   : > { %5935 = vmatpush1.bf16.msk.msra.mxu1 %vm7224_vm4, %v5933_v39  ;;  %v599_v39 = vld [vmem:[%s8794_s4 + $0x10] sm:$0xff] }
 0x176   : > { %v539_v43 = vsel %vm535_vm2, 0.0, %v6386_v40  ;;  %v538_v44 = vsel %vm535_vm2, 0.0, %v6385_v41  ;;  %6388 = vrot.lane.b32.xlu0 %v6387_v42, %s8803_s27  ;;  %5936 = vmatprep.subr.bf16.mxu1 %v7039_v12  ;;  %v602_v40 = vld [vmem:[%s8794_s4 + $0x28] sm:$0xff]  ;;  %v601_v41 = vld [vmem:[%s8794_s4 + $0x20] sm:$0xff] }
 0x177   : > { %v544_v45 = vsel %vm540_vm3, %v539_v43, 0.0  ;;  %v543_v46 = vsel %vm540_vm3, %v538_v44, 0.0  ;;  %v5937_v47 = vpack.c.bf16 %v539_v43, %v538_v44  ;;  %v603_v43 = vld [vmem:[%s8794_s4 + $0x30] sm:$0xff]  ;;  %v606_v44 = vld [vmem:[%s8794_s4 + $0x48] sm:$0xff] }
 0x178   : > { %v6392_v48 = vpack.i.bf16 %v544_v45, %v543_v46  ;;  %v605_v45 = vld [vmem:[%s8794_s4 + $0x40] sm:$0xff]  ;;  %v608_v46 = vld [vmem:[%s8794_s4 + $0x58] sm:$0xff] }
 0x179   : > { %5939 = vmatpush1.bf16.msk.msra.mxu1 %vm7224_vm4, %v5937_v47  ;;  %v607_v47 = vld [vmem:[%s8794_s4 + $0x50] sm:$0xff] }
 0x17a   : > { %6393 = vrot.lane.b32.xlu1 %v6392_v48, %s8803_s27  ;;  %6398 = vrot.lane.b32.xlu0 %v6387_v42, %s8801_s28  ;;  %s8833_s27 = smov 126  }
 0x17b   : > { %5940 = vmatprep.subr.bf16.mxu1 %v7039_v12 }
 0x17e   : > { %6403 = vrot.lane.b32.xlu1 %v6392_v48, %s8801_s28  ;;  %6408 = vrot.lane.b32.xlu0 %v6387_v42, %s8805_s30  ;;  %s8831_s28 = smov 2  }
 0x182   : > { %6413 = vrot.lane.b32.xlu1 %v6392_v48, %s8805_s30  ;;  %6418 = vrot.lane.b32.xlu0 %v6387_v42, %s8807_s11  ;;  %v604_v42 = vld [vmem:[%s8794_s4 + $0x38] sm:$0xff]  ;;  %s8834_s30 = smov 125  }
 0x186   : > { %6423 = vrot.lane.b32.xlu1 %v6392_v48, %s8807_s11  ;;  %643 = vperm.xlu0 %6375, %v617_v49   ;;  %v610_v48 = vld [vmem:[%s8794_s4 + $0x68] sm:$0xff]  ;;  %v609_v49 = vld [vmem:[%s8794_s4 + $0x60] sm:$0xff]  ;;  %s5597_s11 = sshll.u32 %s7127_s17, 6 }
 0x18a   : > { %648 = vperm.xlu1 %6376, %v618_v50   ;;  %653 = vperm.xlu0 %6375, %v619_v51   ;;  %v612_v50 = vld [vmem:[%s8794_s4 + $0x78] sm:$0xff]  ;;  %v611_v51 = vld [vmem:[%s8794_s4 + $0x70] sm:$0xff] }
 0x18e   : > { %658 = vperm.xlu1 %6376, %v620_v53   ;;  %623 = vperm.xlu0 %6375, %v613_v54  }
 0x192   : > { %628 = vperm.xlu1 %6376, %v614_v55   ;;  %633 = vperm.xlu0 %6375, %v615_v56  }
 0x196   : > { %638 = vperm.xlu1 %6376, %v616_v57   ;;  %841 = vperm.xlu0 %6375, %v831_v58  }
 0x19a   : > { %846 = vperm.xlu1 %6376, %v832_v59   ;;  %851 = vperm.xlu0 %6375, %v833_v60  }
 0x19e   : > { %856 = vperm.xlu1 %6376, %v834_v61  }
 0x1e8   : > { %v6389_v62 = vpop.permute.xlu0 %6388 }
 0x1e9   : > { %v6391_v63 = vunpack.i.h.bf16 %v6389_v62  ;;  %v6390_v0 = vunpack.i.l.bf16 %v6389_v62 }
 0x1eb   : > { %v5941_v1 = vpack.c.bf16 %v6391_v63, %v6390_v0 }
 0x1ec   : > { %v6394_v2 = vpop.permute.xlu1 %6393  ;;  %v6399_v3 = vpop.permute.xlu0 %6398 }
 0x1ed   : > { %v6396_v4 = vunpack.i.h.bf16 %v6394_v2  ;;  %v6395_v5 = vunpack.i.l.bf16 %v6394_v2  ;;  %5942 = vmatpush1.bf16.msra.mxu1 %v5941_v1  ;;  %v6401_v6 = vunpack.i.h.bf16 %v6399_v3  ;;  %v6400_v7 = vunpack.i.l.bf16 %v6399_v3 }
 0x1ee   : > { %5943 = vmatprep.subr.bf16.mxu1 %v7039_v12 }
 0x1ef   : > { %v5944_v8 = vpack.c.bf16 %v6396_v4, %v6395_v5  ;;  %v5947_v14 = vpack.c.bf16 %v6401_v6, %v6400_v7 }
 0x1f0   : > { %v6404_v9 = vpop.permute.xlu1 %6403  ;;  %v6409_v15 = vpop.permute.xlu0 %6408 }
 0x1f1   : > { %5945 = vmatpush1.bf16.msra.mxu1 %v5944_v8  ;;  %v6406_v10 = vunpack.i.h.bf16 %v6404_v9  ;;  %v6405_v11 = vunpack.i.l.bf16 %v6404_v9  ;;  %v6411_v16 = vunpack.i.h.bf16 %v6409_v15  ;;  %v6410_v17 = vunpack.i.l.bf16 %v6409_v15 }
 0x1f2   : > { %5946 = vmatprep.subr.bf16.mxu1 %v7039_v12 }
 0x1f3   : > { %v5950_v18 = vpack.c.bf16 %v6406_v10, %v6405_v11  ;;  %v5953_v24 = vpack.c.bf16 %v6411_v16, %v6410_v17 }
 0x1f4   : > { %v6414_v20 = vpop.permute.xlu1 %6413  ;;  %v6419_v25 = vpop.permute.xlu0 %6418 }
 0x1f5   : > { %5948 = vmatpush1.bf16.msra.mxu1 %v5947_v14  ;;  %v6416_v22 = vunpack.i.h.bf16 %v6414_v20  ;;  %v6415_v23 = vunpack.i.l.bf16 %v6414_v20  ;;  %v6421_v26 = vunpack.i.h.bf16 %v6419_v25  ;;  %v6420_v29 = vunpack.i.l.bf16 %v6419_v25 }
 0x1f6   : > { %5949 = vmatprep.subr.bf16.mxu1 %v7039_v12 }
 0x1f7   : > { %v5956_v30 = vpack.c.bf16 %v6416_v22, %v6415_v23  ;;  %v5959_v34 = vpack.c.bf16 %v6421_v26, %v6420_v29 }
 0x1f8   : > { %v6424_v31 = vpop.permute.xlu1 %6423 }
 0x1f9   : > { %5951 = vmatpush1.bf16.msra.mxu1 %v5950_v18  ;;  %v6426_v32 = vunpack.i.h.bf16 %v6424_v31  ;;  %v6425_v33 = vunpack.i.l.bf16 %v6424_v31 }
 0x1fa   : > { %5952 = vmatprep.subr.bf16.mxu1 %v7039_v12 }
 0x1fb   : > { %v5962_v36 = vpack.c.bf16 %v6426_v32, %v6425_v33 }
 0x1fd   : > { %5954 = vmatpush1.bf16.msra.mxu1 %v5953_v24 }
 0x1fe   : > { %5955 = vmatprep.subr.bf16.mxu1 %v7039_v12 }
 0x201   : > { %5957 = vmatpush1.bf16.msra.mxu1 %v5956_v30 }
 0x202   : > { %5958 = vmatprep.subr.bf16.mxu1 %v7039_v12 }
 0x205   : > { %5960 = vmatpush1.bf16.msra.mxu1 %v5959_v34  ;;  %v644_v61 = vpop.permute.xlu0 %643 }
 0x206   : > { %5961 = vmatprep.subr.bf16.mxu1 %v7039_v12 }
 0x209   : > { %5963 = vmatpush1.bf16.msra.mxu1 %v5962_v36  ;;  %v649_v2 = vpop.permute.xlu1 %648  ;;  %v654_v4 = vpop.permute.xlu0 %653 }
 0x20c   : > { %751 = vmatmul.mubr.f32.vlgmr.msra.gmra.mrb[0].mxu1 %v597_v37 }
 0x20d   : > { %5128 = vmatprep.mubr.msk.f32.mxu1 %vm661_vm5, %v600_v38  ;;  %v659_v11 = vpop.permute.xlu1 %658  ;;  %v624_v14 = vpop.permute.xlu0 %623 }
 0x210   : > { %756 = vmatmul.mubr.f32.gmra.mrb[2].mxu1 %v599_v39 }
 0x211   : > { %5129 = vmatprep.mubr.msk.f32.mxu1 %vm661_vm5, %v602_v40  ;;  %v629_v24 = vpop.permute.xlu1 %628  ;;  %v634_v30 = vpop.permute.xlu0 %633 }
 0x214   : > { %761 = vmatmul.mubr.f32.gmra.mrb[4].mxu1 %v601_v41 }
 0x215   : > { %5130 = vmatprep.mubr.msk.f32.mxu1 %vm661_vm5, %v604_v42  ;;  %v639_v34 = vpop.permute.xlu1 %638 }
 0x218   : > { %766 = vmatmul.mubr.f32.gmra.mrb[6].mxu1 %v603_v43 }
 0x219   : > { %5131 = vmatprep.mubr.msk.f32.mxu1 %vm661_vm5, %v606_v44 }
 0x21c   : > { %771 = vmatmul.mubr.f32.gmra.mrb[8].mxu1 %v605_v45 }
 0x21d   : > { %5132 = vmatprep.mubr.msk.f32.mxu1 %vm661_vm5, %v608_v46 }
 0x220   : > { %776 = vmatmul.mubr.f32.gmra.mrb[10].mxu1 %v607_v47 }
 0x221   : > { %5133 = vmatprep.mubr.msk.f32.mxu1 %vm661_vm5, %v610_v48 }
 0x224   : > { %781 = vmatmul.mubr.f32.gmra.mrb[12].mxu1 %v609_v49 }
 0x225   : > { %5134 = vmatprep.mubr.msk.f32.mxu1 %vm661_vm5, %v612_v50 }
 0x228   : > { %786 = vmatmul.mubr.f32.gmra.mrb[14].mxu1 %v611_v51 }
 0x229   : > { %5736 = vmatprep.mubr.msk.f32.mxu1 %vm661_vm5, %v823_v52 }
 0x2df   : > { %v752_v53 = vpop.f32.mrb[0].mxu1 }
 0x2e0   : > { %v754_v54 = vpop.f32.mrb[1].mxu1  ;;  %v753_v16 = vadd.f32 %v752_v53, %v624_v14 }
 0x2e1   : > { %v824_v54 = vld [vmem:[%s8796_s6 + $0x8] sm:$0xff] }
 0x2e3   : > { %v757_v55 = vpop.f32.mrb[2].mxu1 }
 0x2e4   : > { %v759_v56 = vpop.f32.mrb[3].mxu1  ;;  %v758_v26 = vadd.f32 %v757_v55, %v629_v24  ;;  %v825_v55 = vld [vmem:[%s8796_s6 + $0x10] sm:$0xff] }
 0x2e5   : > { %v826_v56 = vld [vmem:[%s8796_s6 + $0x18] sm:$0xff] }
 0x2e7   : > { %v762_v57 = vpop.f32.mrb[4].mxu1 }
 0x2e8   : > { %v764_v58 = vpop.f32.mrb[5].mxu1  ;;  %v763_v32 = vadd.f32 %v762_v57, %v634_v30  ;;  %v827_v57 = vld [vmem:[%s8796_s6 + $0x20] sm:$0xff] }
 0x2e9   : > { %v828_v58 = vld [vmem:[%s8796_s6 + $0x28] sm:$0xff] }
 0x2eb   : > { %v767_v59 = vpop.f32.mrb[6].mxu1 }
 0x2ec   : > { %v769_v60 = vpop.f32.mrb[7].mxu1  ;;  %v768_v37 = vadd.f32 %v767_v59, %v639_v34  ;;  %v829_v59 = vld [vmem:[%s8796_s6 + $0x30] sm:$0xff] }
 0x2ed   : > { %v830_v60 = vld [vmem:[%s8796_s6 + $0x38] sm:$0xff] }
 0x2ef   : > { %v772_v62 = vpop.f32.mrb[8].mxu1 }
 0x2f0   : > { %v773_v63 = vadd.f32 %v772_v62, %v644_v61  ;;  %v774_v0 = vpop.f32.mrb[9].mxu1  ;;  %v847_v61 = vpop.permute.xlu1 %846 }
 0x2f1   : > { %v842_v62 = vpop.permute.xlu0 %841 }
 0x2f2   : > { %v5135_v1 = vmul.f32 -1.442695, %v773_v63 }
 0x2f3   : > { %v777_v3 = vpop.f32.mrb[10].mxu1 }
 0x2f4   : > { %6777 = vpow2.f32 %v5135_v1  ;;  %v778_v5 = vadd.f32 %v777_v3, %v649_v2  ;;  %v779_v6 = vpop.f32.mrb[11].mxu1 }
 0x2f6   : > { %v5136_v7 = vmul.f32 -1.442695, %v778_v5 }
 0x2f7   : > { %v782_v8 = vpop.f32.mrb[12].mxu1 }
 0x2f8   : > { %6779 = vpow2.f32 %v5136_v7  ;;  %v783_v9 = vadd.f32 %v782_v8, %v654_v4  ;;  %v784_v10 = vpop.f32.mrb[13].mxu1  ;;  %v857_v4 = vpop.permute.xlu1 %856 }
 0x2f9   : > { %v852_v7 = vpop.permute.xlu0 %851 }
 0x2fa   : > { %v5137_v15 = vmul.f32 -1.442695, %v783_v9 }
 0x2fb   : > { %v787_v17 = vpop.f32.mrb[14].mxu1 }
 0x2fc   : > { %6781 = vpow2.f32 %v5137_v15  ;;  %v788_v18 = vadd.f32 %v787_v17, %v659_v11  ;;  %v789_v20 = vpop.f32.mrb[15].mxu1 }
 0x2fd   : > { %6783 = vtanh.f32 %v753_v16 }
 0x2fe   : > { %v6778_v22 = vpop.eup %6777  ;;  %v5138_v23 = vmul.f32 -1.442695, %v788_v18 }
 0x2ff   : > { %v807_v25 = vadd.f32 1.0, %v6778_v22 }
 0x300   : > { %6785 = vpow2.f32 %v5138_v23 }
 0x301   : > { %6787 = vrcp.f32 %v807_v25 }
 0x302   : > { %v6780_v29 = vpop.eup %6779  ;;  %6789 = vtanh.f32 %v758_v26 }
 0x303   : > { %v808_v31 = vadd.f32 1.0, %v6780_v29 }
 0x305   : > { %6791 = vrcp.f32 %v808_v31 }
 0x306   : > { %v6782_v33 = vpop.eup %6781  ;;  %6793 = vtanh.f32 %v763_v32 }
 0x307   : > { %v809_v36 = vadd.f32 1.0, %v6782_v33  ;;  %v6784_v38 = vpop.eup %6783 }
 0x309   : > { %6795 = vrcp.f32 %v809_v36 }
 0x30a   : > { %v6786_v39 = vpop.eup %6785  ;;  %6797 = vtanh.f32 %v768_v37 }
 0x30b   : > { %v6788_v40 = vpop.eup %6787  ;;  %v810_v41 = vadd.f32 1.0, %v6786_v39  ;;  %v5167_v39 = vld [vmem:[%s8795_s5 + $0x60] sm:$0xff] }
 0x30c   : > { %v819_v42 = vmul.f32 %v6788_v40, %v6784_v38  ;;  %v6790_v43 = vpop.eup %6789  ;;  %v5168_v40 = vld [vmem:[%s8795_s5 + $0x68] sm:$0xff] }
 0x30d   : > { %6799 = vrcp.f32 %v810_v41  ;;  %v5169_v41 = vld [vmem:[%s8795_s5 + $0x70] sm:$0xff] }
 0x30f   : > { %v6792_v44 = vpop.eup %6791 }
 0x310   : > { %v820_v45 = vmul.f32 %v6792_v44, %v6790_v43  ;;  %v6794_v46 = vpop.eup %6793  ;;  %v5170_v43 = vld [vmem:[%s8795_s5 + $0x78] sm:$0xff]  ;;  %v5163_v44 = vld [vmem:[%s8795_s5 + $0x40] sm:$0xff] }
 0x312   : > { %v5964_v47 = vpack.c.bf16 %v820_v45, %v819_v42  ;;  %v5148_v42 = vld [vmem:[%s8794_s4 + $0x88] sm:$0xff] }
 0x313   : > { %v6796_v48 = vpop.eup %6795  ;;  %5175 = vmatprep.mubr.msk.f32.mxu0 %vm661_vm5, %v5148_v42  ;;  %v5164_v45 = vld [vmem:[%s8795_s5 + $0x48] sm:$0xff] }
 0x314   : > { %5965 = vmatprep.subr.bf16.mxu1 %v5964_v47  ;;  %v821_v49 = vmul.f32 %v6796_v48, %v6794_v46  ;;  %v6798_v50 = vpop.eup %6797  ;;  %v5165_v46 = vld [vmem:[%s8795_s5 + $0x50] sm:$0xff]  ;;  %v5166_v48 = vld [vmem:[%s8795_s5 + $0x58] sm:$0xff]  ;;  %v5156_v42 = vld [vmem:[%s8794_s4 + $0xc8] sm:$0xff] }
 0x315   : > { %5967 = vmatpush3.bf16.msra.mxu1 %v5964_v47 }
 0x317   : > { %v6800_v51 = vpop.eup %6799 }
 0x318   : > { %v822_v52 = vmul.f32 %v6800_v51, %v6798_v50  ;;  %v836_v51 = vld [vmem:[%s8797_s7 + $0x28] sm:$0xff] }
 0x31a   : > { %v5968_v53 = vpack.c.bf16 %v822_v52, %v821_v49  ;;  %v835_v49 = vld [vmem:[%s8797_s7 + $0x20] sm:$0xff] }
 0x31b   : > { %v5191_v52 = vld [vmem:[%s8797_s7 + $0x40] sm:$0xff] }
 0x31c   : > { %5969 = vmatprep.subr.bf16.mxu1 %v5968_v53 }
 0x31d   : > { %5971 = vmatpush3.bf16.msra.mxu1 %v5968_v53 }
 0x31e   : > { %6012 = vmatprep.subr.bf16.mxu1 %v7039_v12 }
 0x320   : > { %5737 = vmatmul.mubr.msk.f32.vlgmr.msra.gmra.mrb[16].mxu1 %vm661_vm5, %v824_v54  ;;  %v5192_v54 = vld [vmem:[%s8797_s7 + $0x48] sm:$0xff] }
 0x321   : > { %5739 = vmatprep.mubr.msk.f32.mxu1 %vm661_vm5, %v825_v55  ;;  %v837_v55 = vld [vmem:[%s8797_s7 + $0x30] sm:$0xff] }
 0x324   : > { %5740 = vmatmul.mubr.msk.f32.gmra.mrb[18].mxu1 %vm661_vm5, %v826_v56 }
 0x325   : > { %5742 = vmatprep.mubr.msk.f32.mxu1 %vm661_vm5, %v827_v57  ;;  %v838_v57 = vld [vmem:[%s8797_s7 + $0x38] sm:$0xff] }
 0x328   : > { %5743 = vmatmul.mubr.msk.f32.gmra.mrb[20].mxu1 %vm661_vm5, %v828_v58  ;;  %v5193_v58 = vld [vmem:[%s8797_s7 + $0x50] sm:$0xff] }
 0x329   : > { %5745 = vmatprep.mubr.msk.f32.mxu1 %vm661_vm5, %v829_v59  ;;  %v5194_v59 = vld [vmem:[%s8797_s7 + $0x58] sm:$0xff] }
 0x32c   : > { %5746 = vmatmul.mubr.msk.f32.gmra.mrb[22].mxu1 %vm661_vm5, %v830_v60  ;;  %v1459_v60 = vld [vmem:[%s8799_s9] sm:$0xf] }
 0x3f3   : > { %v5738_v63 = vpop.f32.mrb[16].mxu1 }
 0x3f4   : > { %v975_v0 = vadd.f32 %v5738_v63, %v847_v61  ;;  %v969_v1 = vpop.f32.mrb[17].mxu1  ;;  %v5204_v61 = vld [vmem:[%s8793_s3 + $0x20] sm:$0xff]  ;;  %v5206_v63 = vld [vmem:[%s8793_s3 + $0x30] sm:$0xff] }
 0x3f5   : > { %v970_v2 = vadd.f32 %v969_v1, %v842_v62  ;;  %v5205_v62 = vld [vmem:[%s8793_s3 + $0x28] sm:$0xff] }
 0x3f6   : > { %v1009_v3 = vadd.f32 %v975_v0, %v7203_v19  ;;  %v5207_v0 = vld [vmem:[%s8793_s3 + $0x38] sm:$0xff] }
 0x3f7   : > { %v1008_v5 = vadd.f32 %v970_v2, %v7206_v21  ;;  %v5741_v6 = vpop.f32.mrb[18].mxu1 }
 0x3f8   : > { %v1013_v8 = vmul.f32 %v7200_v13, %v1009_v3  ;;  %v985_v9 = vadd.f32 %v5741_v6, %v857_v4  ;;  %v979_v10 = vpop.f32.mrb[19].mxu1 }
 0x3f9   : > { %v1012_v11 = vmul.f32 %v7200_v13, %v1008_v5  ;;  %v980_v14 = vadd.f32 %v979_v10, %v852_v7 }
 0x3fa   : > { %v1011_v15 = vadd.f32 %v985_v9, %v7211_v27 }
 0x3fb   : > { %v1010_v16 = vadd.f32 %v980_v14, %v7214_v28  ;;  %v6427_v17 = vpack.i.bf16 %v1013_v8, %v1012_v11  ;;  %v7437_v47 = vpop.f32.mrb[20].mxu1 }
 0x3fc   : > { %v1015_v18 = vmul.f32 %v7200_v13, %v1011_v15  ;;  %v7445_v50 = vpop.f32.mrb[21].mxu1 }
 0x3fd   : > { %v1014_v19 = vmul.f32 %v7200_v13, %v1010_v16  ;;  %6428 = vrot.lane.b32.xlu0 %v6427_v17, %s8831_s28 }
 0x3ff   : > { %v6432_v21 = vpack.i.bf16 %v1015_v18, %v1014_v19  ;;  %v7453_v53 = vpop.f32.mrb[22].mxu1 }
 0x400   : > { %v7461_v56 = vpop.f32.mrb[23].mxu1 }
 0x401   : > { %6433 = vrot.lane.b32.xlu1 %v6432_v21, %s8831_s28 }
 0x46f   : > { %v6429_v20 = vpop.permute.xlu0 %6428 }
 0x470   : > { %v6431_v22 = vunpack.i.h.bf16 %v6429_v20  ;;  %v6430_v23 = vunpack.i.l.bf16 %v6429_v20 }
 0x472   : > { %v1037_v24 = vsel %vm535_vm2, 0.0, %v6431_v22  ;;  %v1036_v25 = vsel %vm535_vm2, 0.0, %v6430_v23 }
 0x473   : > { %v1041_v27 = vsel %vm540_vm3, %v1037_v24, 0.0  ;;  %v1040_v28 = vsel %vm540_vm3, %v1036_v25, 0.0  ;;  %v5973_v26 = vpack.c.bf16 %v1037_v24, %v1036_v25  ;;  %v6434_v29 = vpop.permute.xlu1 %6433 }
 0x474   : > { %v6436_v30 = vunpack.i.h.bf16 %v6434_v29  ;;  %v6435_v13 = vunpack.i.l.bf16 %v6434_v29  ;;  %v6437_v31 = vpack.i.bf16 %v1041_v27, %v1040_v28 }
 0x475   : > { %5975 = vmatpush1.bf16.msk.msra.mxu0 %vm7224_vm4, %v5973_v26 }
 0x476   : > { %v1039_v32 = vsel %vm535_vm2, 0.0, %v6436_v30  ;;  %v1038_v33 = vsel %vm535_vm2, 0.0, %v6435_v13  ;;  %6438 = vrot.lane.b32.xlu0 %v6437_v31, %s8832_s20  ;;  %5976 = vmatprep.subr.bf16.mxu0 %v7039_v12 }
 0x477   : > { %v1043_v34 = vsel %vm540_vm3, %v1039_v32, 0.0  ;;  %v1042_v36 = vsel %vm540_vm3, %v1038_v33, 0.0  ;;  %v5977_v37 = vpack.c.bf16 %v1039_v32, %v1038_v33 }
 0x478   : > { %v6442_v38 = vpack.i.bf16 %v1043_v34, %v1042_v36  ;;  %v5147_v34 = vld [vmem:[%s8794_s4 + $0x80] sm:$0xff]  ;;  %v5150_v36 = vld [vmem:[%s8794_s4 + $0x98] sm:$0xff] }
 0x479   : > { %5979 = vmatpush1.bf16.msk.msra.mxu0 %vm7224_vm4, %v5977_v37  ;;  %v5149_v37 = vld [vmem:[%s8794_s4 + $0x90] sm:$0xff] }
 0x47a   : > { %6443 = vrot.lane.b32.xlu1 %v6442_v38, %s8832_s20  ;;  %6448 = vrot.lane.b32.xlu0 %v6437_v31, %s8833_s27 }
 0x47b   : > { %5980 = vmatprep.subr.bf16.mxu0 %v7039_v12 }
 0x47e   : > { %6453 = vrot.lane.b32.xlu1 %v6442_v38, %s8833_s27  ;;  %6458 = vrot.lane.b32.xlu0 %v6437_v31, %s8834_s30 }
 0x482   : > { %6463 = vrot.lane.b32.xlu1 %v6442_v38, %s8834_s30  ;;  %6468 = vrot.lane.b32.xlu0 %v6437_v31, %s8835_s21 }
 0x486   : > { %6473 = vrot.lane.b32.xlu1 %v6442_v38, %s8835_s21  ;;  %1144 = vperm.xlu0 %6375, %v5167_v39   ;;  %v5152_v38 = vld [vmem:[%s8794_s4 + $0xa8] sm:$0xff]  ;;  %v5151_v39 = vld [vmem:[%s8794_s4 + $0xa0] sm:$0xff] }
 0x48a   : > { %1149 = vperm.xlu1 %6376, %v5168_v40   ;;  %1154 = vperm.xlu0 %6375, %v5169_v41   ;;  %v5154_v40 = vld [vmem:[%s8794_s4 + $0xb8] sm:$0xff]  ;;  %v5153_v41 = vld [vmem:[%s8794_s4 + $0xb0] sm:$0xff] }
 0x48e   : > { %1159 = vperm.xlu1 %6376, %v5170_v43   ;;  %1124 = vperm.xlu0 %6375, %v5163_v44   ;;  %v5155_v43 = vld [vmem:[%s8794_s4 + $0xc0] sm:$0xff]  ;;  %v5158_v44 = vld [vmem:[%s8794_s4 + $0xd8] sm:$0xff] }
 0x492   : > { %1129 = vperm.xlu1 %6376, %v5164_v45   ;;  %1134 = vperm.xlu0 %6375, %v5165_v46   ;;  %v5157_v45 = vld [vmem:[%s8794_s4 + $0xd0] sm:$0xff]  ;;  %v5160_v46 = vld [vmem:[%s8794_s4 + $0xe8] sm:$0xff] }
 0x496   : > { %1139 = vperm.xlu1 %6376, %v5166_v48   ;;  %861 = vperm.xlu0 %6375, %v835_v49   ;;  %v5159_v48 = vld [vmem:[%s8794_s4 + $0xe0] sm:$0xff]  ;;  %v5162_v49 = vld [vmem:[%s8794_s4 + $0xf8] sm:$0xff] }
 0x49a   : > { %866 = vperm.xlu1 %6376, %v836_v51   ;;  %1335 = vperm.xlu0 %6375, %v5191_v52   ;;  %v5161_v51 = vld [vmem:[%s8794_s4 + $0xf0] sm:$0xff]  ;;  %v5187_v52 = vld [vmem:[%s8796_s6 + $0x40] sm:$0xff] }
 0x49e   : > { %1340 = vperm.xlu1 %6376, %v5192_v54   ;;  %871 = vperm.xlu0 %6375, %v837_v55  }
 0x4a2   : > { %876 = vperm.xlu1 %6376, %v838_v57   ;;  %1345 = vperm.xlu0 %6375, %v5193_v58  }
 0x4a6   : > { %1350 = vperm.xlu1 %6376, %v5194_v59   ;;  %1462 = vperm.xlu0 %6375, %v1459_v60  }
 0x4aa   : > { %1556 = vperm.xlu1 %6376, %v5204_v61   ;;  %1561 = vperm.xlu0 %6375, %v5205_v62  }
 0x4ae   : > { %1566 = vperm.xlu1 %6376, %v5206_v63   ;;  %1571 = vperm.xlu0 %6375, %v5207_v0  }
 0x4e8   : > { %v6439_v1 = vpop.permute.xlu0 %6438 }
 0x4e9   : > { %v6441_v2 = vunpack.i.h.bf16 %v6439_v1  ;;  %v6440_v3 = vunpack.i.l.bf16 %v6439_v1 }
 0x4eb   : > { %v5981_v4 = vpack.c.bf16 %v6441_v2, %v6440_v3 }
 0x4ec   : > { %v6444_v5 = vpop.permute.xlu1 %6443  ;;  %v6449_v6 = vpop.permute.xlu0 %6448 }
 0x4ed   : > { %v6446_v7 = vunpack.i.h.bf16 %v6444_v5  ;;  %v6445_v8 = vunpack.i.l.bf16 %v6444_v5  ;;  %5982 = vmatpush1.bf16.msra.mxu0 %v5981_v4  ;;  %v6451_v10 = vunpack.i.h.bf16 %v6449_v6  ;;  %v6450_v11 = vunpack.i.l.bf16 %v6449_v6 }
 0x4ee   : > { %5983 = vmatprep.subr.bf16.mxu0 %v7039_v12 }
 0x4ef   : > { %v5984_v9 = vpack.c.bf16 %v6446_v7, %v6445_v8  ;;  %v5987_v15 = vpack.c.bf16 %v6451_v10, %v6450_v11 }
 0x4f0   : > { %v6454_v14 = vpop.permute.xlu1 %6453  ;;  %v6459_v18 = vpop.permute.xlu0 %6458 }
 0x4f1   : > { %5985 = vmatpush1.bf16.msra.mxu0 %v5984_v9  ;;  %v6456_v16 = vunpack.i.h.bf16 %v6454_v14  ;;  %v6455_v17 = vunpack.i.l.bf16 %v6454_v14  ;;  %v6461_v21 = vunpack.i.h.bf16 %v6459_v18  ;;  %v6460_v20 = vunpack.i.l.bf16 %v6459_v18 }
 0x4f2   : > { %5986 = vmatprep.subr.bf16.mxu0 %v7039_v12 }
 0x4f3   : > { %v5990_v19 = vpack.c.bf16 %v6456_v16, %v6455_v17  ;;  %v5993_v23 = vpack.c.bf16 %v6461_v21, %v6460_v20 }
 0x4f4   : > { %v6464_v22 = vpop.permute.xlu1 %6463  ;;  %v6469_v27 = vpop.permute.xlu0 %6468 }
 0x4f5   : > { %5988 = vmatpush1.bf16.msra.mxu0 %v5987_v15  ;;  %v6466_v24 = vunpack.i.h.bf16 %v6464_v22  ;;  %v6465_v25 = vunpack.i.l.bf16 %v6464_v22  ;;  %v6471_v26 = vunpack.i.h.bf16 %v6469_v27  ;;  %v6470_v29 = vunpack.i.l.bf16 %v6469_v27 }
 0x4f6   : > { %5989 = vmatprep.subr.bf16.mxu0 %v7039_v12 }
 0x4f7   : > { %v5996_v28 = vpack.c.bf16 %v6466_v24, %v6465_v25  ;;  %v5999_v13 = vpack.c.bf16 %v6471_v26, %v6470_v29 }
 0x4f8   : > { %v6474_v30 = vpop.permute.xlu1 %6473 }
 0x4f9   : > { %5991 = vmatpush1.bf16.msra.mxu0 %v5990_v19  ;;  %v6476_v31 = vunpack.i.h.bf16 %v6474_v30  ;;  %v6475_v32 = vunpack.i.l.bf16 %v6474_v30 }
 0x4fa   : > { %5992 = vmatprep.subr.bf16.mxu0 %v7039_v12 }
 0x4fb   : > { %v6002_v33 = vpack.c.bf16 %v6476_v31, %v6475_v32 }
 0x4fd   : > { %5994 = vmatpush1.bf16.msra.mxu0 %v5993_v23 }
 0x4fe   : > { %5995 = vmatprep.subr.bf16.mxu0 %v7039_v12 }
 0x501   : > { %5997 = vmatpush1.bf16.msra.mxu0 %v5996_v28 }
 0x502   : > { %5998 = vmatprep.subr.bf16.mxu0 %v7039_v12 }
 0x505   : > { %6000 = vmatpush1.bf16.msra.mxu0 %v5999_v13  ;;  %v1145_v63 = vpop.permute.xlu0 %1144 }
 0x506   : > { %6001 = vmatprep.subr.bf16.mxu0 %v7039_v12 }
 0x509   : > { %6003 = vmatpush1.bf16.msra.mxu0 %v6002_v33  ;;  %v1150_v4 = vpop.permute.xlu1 %1149  ;;  %v1155_v6 = vpop.permute.xlu0 %1154 }
 0x50c   : > { %1251 = vmatmul.mubr.f32.vlgmr.msra.gmra.mrb[4].mxu0 %v5147_v34 }
 0x50d   : > { %5176 = vmatprep.mubr.msk.f32.mxu0 %vm661_vm5, %v5150_v36  ;;  %v1160_v15 = vpop.permute.xlu1 %1159  ;;  %v1125_v16 = vpop.permute.xlu0 %1124 }
 0x510   : > { %1256 = vmatmul.mubr.f32.gmra.mrb[6].mxu0 %v5149_v37 }
 0x511   : > { %5177 = vmatprep.mubr.msk.f32.mxu0 %vm661_vm5, %v5152_v38  ;;  %v1130_v24 = vpop.permute.xlu1 %1129  ;;  %v1135_v26 = vpop.permute.xlu0 %1134 }
 0x514   : > { %1261 = vmatmul.mubr.f32.gmra.mrb[8].mxu0 %v5151_v39 }
 0x515   : > { %5178 = vmatprep.mubr.msk.f32.mxu0 %vm661_vm5, %v5154_v40  ;;  %v1140_v31 = vpop.permute.xlu1 %1139 }
 0x518   : > { %1266 = vmatmul.mubr.f32.gmra.mrb[10].mxu0 %v5153_v41 }
 0x519   : > { %5179 = vmatprep.mubr.msk.f32.mxu0 %vm661_vm5, %v5156_v42 }
 0x51c   : > { %1271 = vmatmul.mubr.f32.gmra.mrb[12].mxu0 %v5155_v43 }
 0x51d   : > { %5180 = vmatprep.mubr.msk.f32.mxu0 %vm661_vm5, %v5158_v44 }
 0x520   : > { %1276 = vmatmul.mubr.f32.gmra.mrb[14].mxu0 %v5157_v45 }
 0x521   : > { %5181 = vmatprep.mubr.msk.f32.mxu0 %vm661_vm5, %v5160_v46 }
 0x524   : > { %1281 = vmatmul.mubr.f32.gmra.mrb[16].mxu0 %v5159_v48 }
 0x525   : > { %5182 = vmatprep.mubr.msk.f32.mxu0 %vm661_vm5, %v5162_v49 }
 0x528   : > { %1286 = vmatmul.mubr.f32.gmra.mrb[18].mxu0 %v5161_v51 }
 0x529   : > { %5756 = vmatprep.mubr.msk.f32.mxu0 %vm661_vm5, %v5187_v52 }
 0x5df   : > { %v1252_v54 = vpop.f32.mrb[4].mxu0 }
 0x5e0   : > { %v1254_v55 = vpop.f32.mrb[5].mxu0  ;;  %v1253_v18 = vadd.f32 %v1252_v54, %v1125_v16  ;;  %v5188_v54 = vld [vmem:[%s8796_s6 + $0x48] sm:$0xff]  ;;  %v7569_v16 = vld [vmem:[%s7195_s22] ss:$0 sm:$0xff] }
 0x5e1   : > { %v5189_v55 = vld [vmem:[%s8796_s6 + $0x50] sm:$0xff] }
 0x5e3   : > { %v1257_v57 = vpop.f32.mrb[6].mxu0 }
 0x5e4   : > { %v1259_v58 = vpop.f32.mrb[7].mxu0  ;;  %v1258_v27 = vadd.f32 %v1257_v57, %v1130_v24  ;;  %v5190_v57 = vld [vmem:[%s8796_s6 + $0x58] sm:$0xff]  ;;  %v1458_v24 = vld [vmem:[%s8798_s8] sm:$0xf] }
 0x5e5   : > { %v7046_v58 = vmov 0.0  }
 0x5e6   : > { %5770 = vmatprep.mubr.msk.f32.mxu1 %vm7045_vm6, %v7046_v58 }
 0x5e7   : > { %v1262_v59 = vpop.f32.mrb[8].mxu0 }
 0x5e8   : > { %v1264_v60 = vpop.f32.mrb[9].mxu0  ;;  %v1263_v30 = vadd.f32 %v1262_v59, %v1135_v26  ;;  %v867_v59 = vpop.permute.xlu1 %866 }
 0x5e9   : > { %v862_v60 = vpop.permute.xlu0 %861 }
 0x5eb   : > { %v1267_v61 = vpop.f32.mrb[10].mxu0 }
 0x5ec   : > { %v1269_v62 = vpop.f32.mrb[11].mxu0  ;;  %v1268_v33 = vadd.f32 %v1267_v61, %v1140_v31  ;;  %v1341_v61 = vpop.permute.xlu1 %1340 }
 0x5ed   : > { %v1336_v62 = vpop.permute.xlu0 %1335 }
 0x5ef   : > { %v1272_v0 = vpop.f32.mrb[12].mxu0 }
 0x5f0   : > { %v1273_v1 = vadd.f32 %v1272_v0, %v1145_v63  ;;  %v1274_v2 = vpop.f32.mrb[13].mxu0  ;;  %v877_v63 = vpop.permute.xlu1 %876 }
 0x5f1   : > { %v872_v0 = vpop.permute.xlu0 %871  ;;  %v990_v2 = vadd.f32 %v7445_v50, %v862_v60 }
 0x5f2   : > { %v5183_v3 = vmul.f32 -1.442695, %v1273_v1  ;;  %v995_v1 = vadd.f32 %v7437_v47, %v867_v59 }
 0x5f3   : > { %v1277_v5 = vpop.f32.mrb[14].mxu0 }
 0x5f4   : > { %6801 = vpow2.f32 %v5183_v3  ;;  %v1278_v7 = vadd.f32 %v1277_v5, %v1150_v4  ;;  %v1279_v8 = vpop.f32.mrb[15].mxu0  ;;  %v6277_v3 = vadd.f32 %v1341_v61, %v995_v1  ;;  %v6280_v4 = vadd.f32 %v1336_v62, %v990_v2  ;;  %v1351_v5 = vpop.permute.xlu1 %1350 }
 0x5f5   : > { %v1346_v8 = vpop.permute.xlu0 %1345 }
 0x5f6   : > { %v5184_v9 = vmul.f32 -1.442695, %v1278_v7  ;;  %v1005_v7 = vadd.f32 %v7453_v53, %v877_v63 }
 0x5f7   : > { %v1282_v10 = vpop.f32.mrb[16].mxu0 }
 0x5f8   : > { %6803 = vpow2.f32 %v5184_v9  ;;  %v1283_v11 = vadd.f32 %v1282_v10, %v1155_v6  ;;  %v1284_v14 = vpop.f32.mrb[17].mxu0 }
 0x5f9   : > { %v1463_v31 = vpop.permute.xlu0 %1462 }
 0x5fa   : > { %v5185_v17 = vmul.f32 -1.442695, %v1283_v11  ;;  %v1000_v11 = vadd.f32 %v7461_v56, %v872_v0 }
 0x5fb   : > { %v1287_v19 = vpop.f32.mrb[18].mxu0 }
 0x5fc   : > { %6805 = vpow2.f32 %v5185_v17  ;;  %v1288_v21 = vadd.f32 %v1287_v19, %v1160_v15  ;;  %v1289_v20 = vpop.f32.mrb[19].mxu0  ;;  %v6283_v15 = vadd.f32 %v1351_v5, %v1005_v7  ;;  %v6286_v47 = vadd.f32 %v1346_v8, %v1000_v11 }
 0x5fd   : > { %6807 = vtanh.f32 %v1253_v18 }
 0x5fe   : > { %v6802_v22 = vpop.eup %6801  ;;  %v5186_v23 = vmul.f32 -1.442695, %v1288_v21 }
 0x5ff   : > { %v1307_v25 = vadd.f32 1.0, %v6802_v22 }
 0x600   : > { %6809 = vpow2.f32 %v5186_v23 }
 0x601   : > { %6811 = vrcp.f32 %v1307_v25  ;;  %v5200_v25 = vld [vmem:[%s8792_s2 + $0x20] sm:$0xff] }
 0x602   : > { %v6804_v28 = vpop.eup %6803  ;;  %6813 = vtanh.f32 %v1258_v27  ;;  %v377_v27 = vlaneseq }
 0x603   : > { %v1308_v29 = vadd.f32 1.0, %v6804_v28 }
 0x604   : > { %v7584_v28 = vshrl.u32 %v377_v27, 7  ;;  %v5231_v27 = vld [vmem:[%s8795_s5 + $0x90] sm:$0xff] }
 0x605   : > { %6815 = vrcp.f32 %v1308_v29 }
 0x606   : > { %v6806_v13 = vpop.eup %6805  ;;  %6817 = vtanh.f32 %v1263_v30  ;;  %vm379_vm7 = vcmp.ge.s32.totalorder %v7584_v28, 2  ;;  %vm382_vm10 = vcmp.lt.s32.totalorder %v7584_v28, 2  ;;  %v5333_v28 = vld [vmem:[%s8792_s2 + $0x48] sm:$0xff] }
 0x607   : > { %v1309_v32 = vadd.f32 1.0, %v6806_v13  ;;  %v6808_v34 = vpop.eup %6807  ;;  %v5116_v26 = vsel %vm379_vm7, 1.0, %v7046_v58 }
 0x608   : > { %v1539_v29 = vmul.f32 %v7569_v16, %v5116_v26  ;;  %v1540_v30 = vsub.f32 1.0, %v5116_v26  ;;  %v5232_v26 = vld [vmem:[%s8795_s5 + $0x98] sm:$0xff] }
 0x609   : > { %6819 = vrcp.f32 %v1309_v32 }
 0x60a   : > { %v6810_v36 = vpop.eup %6809  ;;  %6821 = vtanh.f32 %v1268_v33  ;;  %v7589_v13 = vadd.f32 %v1540_v30, %v1539_v29  ;;  %v6970_v33 = vld [vmem:[%s7172_s26] sm:$0xf]  ;;  %v5262_v30 = vld [vmem:[%s8797_s7 + $0x88] sm:$0xff]  ;;  %s7047_s26 = smov 4  }
 0x60b   : > { %v6812_v37 = vpop.eup %6811  ;;  %v1310_v38 = vadd.f32 1.0, %v6810_v36  ;;  %v5261_v29 = vld [vmem:[%s8797_s7 + $0x80] sm:$0xff] }
 0x60c   : > { %v1319_v39 = vmul.f32 %v6812_v37, %v6808_v34  ;;  %v6814_v40 = vpop.eup %6813  ;;  %v1542_v34 = vmul.f32 %v6970_v33, %v7589_v13 }
 0x60d   : > { %6823 = vrcp.f32 %v1310_v38 }
 0x60f   : > { %v6816_v41 = vpop.eup %6815 }
 0x610   : > { %v1320_v42 = vmul.f32 %v6816_v41, %v6814_v40  ;;  %v6818_v43 = vpop.eup %6817  ;;  %v5201_v40 = vld [vmem:[%s8792_s2 + $0x28] sm:$0xff]  ;;  %v5202_v41 = vld [vmem:[%s8792_s2 + $0x30] sm:$0xff] }
 0x612   : > { %v6004_v44 = vpack.c.bf16 %v1320_v42, %v1319_v39  ;;  %v5203_v42 = vld [vmem:[%s8792_s2 + $0x38] sm:$0xff] }
 0x613   : > { %v6820_v45 = vpop.eup %6819 }
 0x614   : > { %6005 = vmatprep.subr.bf16.mxu0 %v6004_v44  ;;  %v1321_v46 = vmul.f32 %v6820_v45, %v6818_v43  ;;  %v6822_v48 = vpop.eup %6821  ;;  %v1562_v43 = vpop.permute.xlu0 %1561 }
 0x615   : > { %6007 = vmatpush3.bf16.msra.mxu0 %v6004_v44  ;;  %v1557_v44 = vpop.permute.xlu1 %1556 }
 0x617   : > { %v6824_v49 = vpop.eup %6823 }
 0x618   : > { %v1322_v51 = vmul.f32 %v6824_v49, %v6822_v48 }
 0x61a   : > { %v6008_v52 = vpack.c.bf16 %v1322_v51, %v1321_v46 }
 0x61c   : > { %6009 = vmatprep.subr.bf16.mxu0 %v6008_v52 }
 0x61d   : > { %6011 = vmatpush3.bf16.msra.mxu0 %v6008_v52  ;;  %v1572_v52 = vpop.permute.xlu0 %1571 }
 0x620   : > { %5757 = vmatmul.mubr.msk.f32.vlgmr.msra.gmra.mrb[20].mxu0 %vm661_vm5, %v5188_v54 }
 0x621   : > { %5759 = vmatprep.mubr.msk.f32.mxu0 %vm661_vm5, %v5189_v55 }
 0x624   : > { %5760 = vmatmul.mubr.msk.f32.gmra.mrb[22].mxu0 %vm661_vm5, %v5190_v57  ;;  %v1567_v57 = vpop.permute.xlu1 %1566 }
 0x6f3   : > { %v5758_v6 = vpop.f32.mrb[20].mxu0 }
 0x6f4   : > { %v6278_v9 = vadd.f32 %v6277_v3, %v5758_v6  ;;  %v1431_v10 = vpop.f32.mrb[21].mxu0 }
 0x6f5   : > { %v6281_v14 = vadd.f32 %v6280_v4, %v1431_v10 }
 0x6f6   : > { %v1455_v17 = vmul.f32 %v7569_v16, %v6278_v9 }
 0x6f7   : > { %v1454_v50 = vmul.f32 %v7569_v16, %v6281_v14  ;;  %v5761_v18 = vpop.f32.mrb[22].mxu0 }
 0x6f8   : > { %v6284_v19 = vadd.f32 %v6283_v15, %v5761_v18  ;;  %v1441_v21 = vpop.f32.mrb[23].mxu0 }
 0x6f9   : > { %v6013_v20 = vpack.c.bf16 %v1455_v17, %v1454_v50  ;;  %v6287_v22 = vadd.f32 %v6286_v47, %v1441_v21 }
 0x6fa   : > { %v1457_v53 = vmul.f32 %v7569_v16, %v6284_v19 }
 0x6fb   : > { %v1456_v23 = vmul.f32 %v7569_v16, %v6287_v22  ;;  %6014 = vmatpush3.bf16.msra.mxu1 %v6013_v20  ;;  %v5233_v20 = vld [vmem:[%s8795_s5 + $0xa0] sm:$0xff]  ;;  %v5234_v22 = vld [vmem:[%s8795_s5 + $0xa8] sm:$0xff] }
 0x6fc   : > { %6015 = vmatprep.subr.bf16.mxu1 %v7039_v12 }
 0x6fd   : > { %v6016_v56 = vpack.c.bf16 %v1457_v53, %v1456_v23  ;;  %v5235_v53 = vld [vmem:[%s8795_s5 + $0xb0] sm:$0xff]  ;;  %v5214_v23 = vld [vmem:[%s8794_s4 + $0x108] sm:$0xff] }
 0x6ff   : > { %6017 = vmatpush3.bf16.msra.mxu1 %v6016_v56  ;;  %v5236_v56 = vld [vmem:[%s8795_s5 + $0xb8] sm:$0xff] }
 0x702   : > { %5771 = vmatmul.mubr.msk.f32.vlgmr.msra.gmra.mrb[24].mxu1 %vm661_vm5, %v1458_v24  ;;  %v5229_v24 = vld [vmem:[%s8795_s5 + $0x80] sm:$0xff] }
 0x703   : > { %5775 = vmatprep.mubr.msk.f32.mxu1 %vm413_vm0, %v5200_v25  ;;  %v5230_v25 = vld [vmem:[%s8795_s5 + $0x88] sm:$0xff] }
 0x7d5   : > { %v1534_v32 = vpop.f32.mrb[24].mxu1 }
 0x7d6   : > { %v1535_v36 = vadd.f32 %v1534_v32, %v1463_v31  ;;  %v5772_v37 = vpop.f32.mrb[25].mxu1  ;;  %v5263_v31 = vld [vmem:[%s8797_s7 + $0x90] sm:$0xff]  ;;  %v5264_v32 = vld [vmem:[%s8797_s7 + $0x98] sm:$0xff] }
 0x7d8   : > { %v1538_v38 = vmul.f32 %v7569_v16, %v1535_v36 }
 0x7da   : > { %v7594_v39 = vadd.f32 %v1542_v34, %v1538_v38 }
 0x7dc   : > { %5773 = vmatprep.subr.msk.mxu1 %vm426_vm1, %v7594_v39 }
 0x7dd   : > { %5774 = vmatpush3.msk.msra.mxu1 %vm426_vm1, %v7594_v39 }
 0x7de   : > { %5776 = vmatmul.mubr.msk.f32.vlgmr.msra.gmra.mrb[26].mxu1 %vm413_vm0, %v5201_v40  ;;  %6018 = vmatprep.subr.bf16.mxu1 %v7039_v12 }
 0x7df   : > { %5778 = vmatprep.mubr.msk.f32.mxu1 %vm413_vm0, %v5202_v41 }
 0x7e2   : > { %5779 = vmatmul.mubr.msk.f32.gmra.mrb[28].mxu1 %vm413_vm0, %v5203_v42 }
 0x7e3   : > { %5241 = vmatprep.mubr.msk.f32.mxu1 %vm661_vm5, %v5214_v23  ;;  %v5226_v23 = vld [vmem:[%s8794_s4 + $0x168] sm:$0xff] }
 0x8b1   : > { %v5777_v45 = vpop.f32.mrb[26].mxu1 }
 0x8b2   : > { %v1661_v46 = vadd.f32 %v5777_v45, %v1562_v43  ;;  %v1655_v48 = vpop.f32.mrb[27].mxu1 }
 0x8b3   : > { %v1656_v49 = vadd.f32 %v1655_v48, %v1557_v44 }
 0x8b4   : > { %v7614_v51 = vmul.f32 %v7569_v16, %v1661_v46 }
 0x8b5   : > { %v7617_v54 = vmul.f32 %v7569_v16, %v1656_v49  ;;  %v5780_v55 = vpop.f32.mrb[28].mxu1 }
 0x8b6   : > { %v1671_v59 = vadd.f32 %v5780_v55, %v1572_v52  ;;  %v1665_v60 = vpop.f32.mrb[29].mxu1 }
 0x8b7   : > { %v1666_v61 = vadd.f32 %v1665_v60, %v1567_v57  ;;  %v6477_v62 = vpack.i.bf16 %v7614_v51, %v7617_v54 }
 0x8b8   : > { %v7622_v63 = vmul.f32 %v7569_v16, %v1671_v59 }
 0x8b9   : > { %v7625_v0 = vmul.f32 %v7569_v16, %v1666_v61  ;;  %6478 = vrot.lane.b32.xlu1 %v6477_v62, %s8831_s28 }
 0x8bb   : > { %v6482_v1 = vpack.i.bf16 %v7622_v63, %v7625_v0 }
 0x8bd   : > { %6483 = vrot.lane.b32.xlu0 %v6482_v1, %s8831_s28 }
 0x92b   : > { %v6479_v2 = vpop.permute.xlu1 %6478 }
 0x92c   : > { %v6481_v3 = vunpack.i.h.bf16 %v6479_v2  ;;  %v6480_v4 = vunpack.i.l.bf16 %v6479_v2 }
 0x92e   : > { %v1695_v5 = vsel %vm535_vm2, 0.0, %v6481_v3  ;;  %v1694_v6 = vsel %vm535_vm2, 0.0, %v6480_v4 }
 0x92f   : > { %v1699_v7 = vsel %vm540_vm3, %v1695_v5, 0.0  ;;  %v1698_v8 = vsel %vm540_vm3, %v1694_v6, 0.0  ;;  %v6019_v9 = vpack.c.bf16 %v1695_v5, %v1694_v6  ;;  %v6484_v10 = vpop.permute.xlu0 %6483 }
 0x930   : > { %v6486_v11 = vunpack.i.h.bf16 %v6484_v10  ;;  %v6485_v14 = vunpack.i.l.bf16 %v6484_v10  ;;  %v6487_v15 = vpack.i.bf16 %v1699_v7, %v1698_v8 }
 0x931   : > { %6021 = vmatpush1.bf16.msk.msra.mxu1 %vm7224_vm4, %v6019_v9 }
 0x932   : > { %v1697_v17 = vsel %vm535_vm2, 0.0, %v6486_v11  ;;  %v1696_v47 = vsel %vm535_vm2, 0.0, %v6485_v14  ;;  %6488 = vrot.lane.b32.xlu1 %v6487_v15, %s8832_s20  ;;  %6022 = vmatprep.subr.bf16.mxu1 %v7039_v12  ;;  %v5213_v14 = vld [vmem:[%s8794_s4 + $0x100] sm:$0xff] }
 0x933   : > { %v1701_v50 = vsel %vm540_vm3, %v1697_v17, 0.0  ;;  %v1700_v18 = vsel %vm540_vm3, %v1696_v47, 0.0  ;;  %v6023_v19 = vpack.c.bf16 %v1697_v17, %v1696_v47  ;;  %v5215_v17 = vld [vmem:[%s8794_s4 + $0x110] sm:$0xff]  ;;  %v5218_v47 = vld [vmem:[%s8794_s4 + $0x128] sm:$0xff] }
 0x934   : > { %v6492_v21 = vpack.i.bf16 %v1701_v50, %v1700_v18  ;;  %v5217_v50 = vld [vmem:[%s8794_s4 + $0x120] sm:$0xff]  ;;  %v5220_v18 = vld [vmem:[%s8794_s4 + $0x138] sm:$0xff] }
 0x935   : > { %6025 = vmatpush1.bf16.msk.msra.mxu1 %vm7224_vm4, %v6023_v19  ;;  %v5219_v19 = vld [vmem:[%s8794_s4 + $0x130] sm:$0xff] }
 0x936   : > { %6493 = vrot.lane.b32.xlu0 %v6492_v21, %s8832_s20  ;;  %6498 = vrot.lane.b32.xlu1 %v6487_v15, %s8833_s27 }
 0x937   : > { %6026 = vmatprep.subr.bf16.mxu1 %v7039_v12 }
 0x93a   : > { %6503 = vrot.lane.b32.xlu0 %v6492_v21, %s8833_s27  ;;  %6508 = vrot.lane.b32.xlu1 %v6487_v15, %s8834_s30 }
 0x93e   : > { %6513 = vrot.lane.b32.xlu0 %v6492_v21, %s8834_s30  ;;  %6518 = vrot.lane.b32.xlu1 %v6487_v15, %s8835_s21  ;;  %v5216_v15 = vld [vmem:[%s8794_s4 + $0x118] sm:$0xff] }
 0x942   : > { %6523 = vrot.lane.b32.xlu0 %v6492_v21, %s8835_s21  ;;  %1802 = vperm.xlu1 %6376, %v5233_v20   ;;  %v5222_v21 = vld [vmem:[%s8794_s4 + $0x148] sm:$0xff]  ;;  %v5221_v20 = vld [vmem:[%s8794_s4 + $0x140] sm:$0xff] }
 0x946   : > { %1807 = vperm.xlu0 %6375, %v5234_v22   ;;  %1812 = vperm.xlu1 %6376, %v5235_v53   ;;  %v5224_v22 = vld [vmem:[%s8794_s4 + $0x158] sm:$0xff]  ;;  %v5223_v53 = vld [vmem:[%s8794_s4 + $0x150] sm:$0xff] }
 0x94a   : > { %1817 = vperm.xlu0 %6375, %v5236_v56   ;;  %1782 = vperm.xlu1 %6376, %v5229_v24   ;;  %v5225_v56 = vld [vmem:[%s8794_s4 + $0x160] sm:$0xff]  ;;  %v5228_v24 = vld [vmem:[%s8794_s4 + $0x178] sm:$0xff] }
 0x94e   : > { %1787 = vperm.xlu0 %6375, %v5230_v25   ;;  %1792 = vperm.xlu1 %6376, %v5231_v27   ;;  %v5227_v25 = vld [vmem:[%s8794_s4 + $0x170] sm:$0xff]  ;;  %v5253_v27 = vld [vmem:[%s8796_s6 + $0x80] sm:$0xff] }
 0x94f   : > { %5789 = vmatprep.mubr.msk.f32.mxu0 %vm661_vm5, %v5253_v27 }
 0x952   : > { %1797 = vperm.xlu0 %6375, %v5232_v26   ;;  %2001 = vperm.xlu1 %6376, %v5261_v29  }
 0x956   : > { %2006 = vperm.xlu0 %6375, %v5262_v30   ;;  %2011 = vperm.xlu1 %6376, %v5263_v31  }
 0x95a   : > { %2016 = vperm.xlu0 %6375, %v5264_v32  }
 0x9a4   : > { %v6489_v33 = vpop.permute.xlu1 %6488 }
 0x9a5   : > { %v6491_v34 = vunpack.i.h.bf16 %v6489_v33  ;;  %v6490_v36 = vunpack.i.l.bf16 %v6489_v33 }
 0x9a7   : > { %v6027_v37 = vpack.c.bf16 %v6491_v34, %v6490_v36 }
 0x9a8   : > { %v6494_v38 = vpop.permute.xlu0 %6493  ;;  %v6499_v40 = vpop.permute.xlu1 %6498 }
 0x9a9   : > { %v6496_v41 = vunpack.i.h.bf16 %v6494_v38  ;;  %v6495_v42 = vunpack.i.l.bf16 %v6494_v38  ;;  %6028 = vmatpush1.bf16.msra.mxu1 %v6027_v37  ;;  %v6501_v44 = vunpack.i.h.bf16 %v6499_v40  ;;  %v6500_v45 = vunpack.i.l.bf16 %v6499_v40 }
 0x9aa   : > { %6029 = vmatprep.subr.bf16.mxu1 %v7039_v12 }
 0x9ab   : > { %v6030_v43 = vpack.c.bf16 %v6496_v41, %v6495_v42  ;;  %v6033_v48 = vpack.c.bf16 %v6501_v44, %v6500_v45 }
 0x9ac   : > { %v6504_v46 = vpop.permute.xlu0 %6503  ;;  %v6509_v55 = vpop.permute.xlu1 %6508 }
 0x9ad   : > { %6031 = vmatpush1.bf16.msra.mxu1 %v6030_v43  ;;  %v6506_v49 = vunpack.i.h.bf16 %v6504_v46  ;;  %v6505_v52 = vunpack.i.l.bf16 %v6504_v46  ;;  %v6511_v59 = vunpack.i.h.bf16 %v6509_v55  ;;  %v6510_v60 = vunpack.i.l.bf16 %v6509_v55 }
 0x9ae   : > { %6032 = vmatprep.subr.bf16.mxu1 %v7039_v12 }
 0x9af   : > { %v6036_v57 = vpack.c.bf16 %v6506_v49, %v6505_v52  ;;  %v6039_v62 = vpack.c.bf16 %v6511_v59, %v6510_v60 }
 0x9b0   : > { %v6514_v61 = vpop.permute.xlu0 %6513  ;;  %v6519_v3 = vpop.permute.xlu1 %6518 }
 0x9b1   : > { %6034 = vmatpush1.bf16.msra.mxu1 %v6033_v48  ;;  %v6516_v1 = vunpack.i.h.bf16 %v6514_v61  ;;  %v6515_v2 = vunpack.i.l.bf16 %v6514_v61  ;;  %v6521_v5 = vunpack.i.h.bf16 %v6519_v3  ;;  %v6520_v6 = vunpack.i.l.bf16 %v6519_v3 }
 0x9b2   : > { %6035 = vmatprep.subr.bf16.mxu1 %v7039_v12 }
 0x9b3   : > { %v6042_v4 = vpack.c.bf16 %v6516_v1, %v6515_v2  ;;  %v6045_v8 = vpack.c.bf16 %v6521_v5, %v6520_v6 }
 0x9b4   : > { %v6524_v7 = vpop.permute.xlu0 %6523 }
 0x9b5   : > { %6037 = vmatpush1.bf16.msra.mxu1 %v6036_v57  ;;  %v6526_v9 = vunpack.i.h.bf16 %v6524_v7  ;;  %v6525_v10 = vunpack.i.l.bf16 %v6524_v7 }
 0x9b6   : > { %6038 = vmatprep.subr.bf16.mxu1 %v7039_v12 }
 0x9b7   : > { %v6048_v11 = vpack.c.bf16 %v6526_v9, %v6525_v10 }
 0x9b9   : > { %6040 = vmatpush1.bf16.msra.mxu1 %v6039_v62 }
 0x9ba   : > { %6041 = vmatprep.subr.bf16.mxu1 %v7039_v12 }
 0x9bd   : > { %6043 = vmatpush1.bf16.msra.mxu1 %v6042_v4 }
 0x9be   : > { %6044 = vmatprep.subr.bf16.mxu1 %v7039_v12 }
 0x9c1   : > { %6046 = vmatpush1.bf16.msra.mxu1 %v6045_v8  ;;  %v1803_v37 = vpop.permute.xlu1 %1802 }
 0x9c2   : > { %6047 = vmatprep.subr.bf16.mxu1 %v7039_v12 }
 0x9c5   : > { %6049 = vmatpush1.bf16.msra.mxu1 %v6048_v11  ;;  %v1808_v43 = vpop.permute.xlu0 %1807  ;;  %v1813_v45 = vpop.permute.xlu1 %1812 }
 0x9c6   : > { %6098 = vmatprep.subr.bf16.mxu1 %v7039_v12 }
 0x9c8   : > { %1909 = vmatmul.mubr.f32.vlgmr.msra.gmra.mrb[30].mxu1 %v5213_v14 }
 0x9c9   : > { %5242 = vmatprep.mubr.msk.f32.mxu1 %vm661_vm5, %v5216_v15  ;;  %v1818_v59 = vpop.permute.xlu0 %1817  ;;  %v1783_v60 = vpop.permute.xlu1 %1782 }
 0x9cc   : > { %1914 = vmatmul.mubr.f32.gmra.mrb[32].mxu1 %v5215_v17 }
 0x9cd   : > { %5243 = vmatprep.mubr.msk.f32.mxu1 %vm661_vm5, %v5218_v47  ;;  %v1788_v6 = vpop.permute.xlu0 %1787  ;;  %v1793_v10 = vpop.permute.xlu1 %1792 }
 0x9d0   : > { %1919 = vmatmul.mubr.f32.gmra.mrb[34].mxu1 %v5217_v50 }
 0x9d1   : > { %5244 = vmatprep.mubr.msk.f32.mxu1 %vm661_vm5, %v5220_v18  ;;  %v1798_v17 = vpop.permute.xlu0 %1797 }
 0x9d4   : > { %1924 = vmatmul.mubr.f32.gmra.mrb[36].mxu1 %v5219_v19 }
 0x9d5   : > { %5245 = vmatprep.mubr.msk.f32.mxu1 %vm661_vm5, %v5222_v21 }
 0x9d8   : > { %1929 = vmatmul.mubr.f32.gmra.mrb[38].mxu1 %v5221_v20 }
 0x9d9   : > { %5246 = vmatprep.mubr.msk.f32.mxu1 %vm661_vm5, %v5224_v22 }
 0x9dc   : > { %1934 = vmatmul.mubr.f32.gmra.mrb[40].mxu1 %v5223_v53 }
 0x9dd   : > { %5247 = vmatprep.mubr.msk.f32.mxu1 %vm661_vm5, %v5226_v23 }
 0x9e0   : > { %1939 = vmatmul.mubr.f32.gmra.mrb[42].mxu1 %v5225_v56 }
 0x9e1   : > { %5248 = vmatprep.mubr.msk.f32.mxu1 %vm661_vm5, %v5228_v24 }
 0x9e4   : > { %1944 = vmatmul.mubr.f32.gmra.mrb[44].mxu1 %v5227_v25 }
 0x9e5   : > { %5823 = vmatprep.mubr.msk.f32.mxu1 %vm7045_vm6, %v7046_v58 }
 0xa9b   : > { %v1910_v26 = vpop.f32.mrb[30].mxu1 }
 0xa9c   : > { %v1912_v29 = vpop.f32.mrb[31].mxu1  ;;  %v1911_v62 = vadd.f32 %v1910_v26, %v1783_v60 }
 0xa9f   : > { %v1915_v30 = vpop.f32.mrb[32].mxu1 }
 0xaa0   : > { %v1917_v31 = vpop.f32.mrb[33].mxu1  ;;  %v1916_v8 = vadd.f32 %v1915_v30, %v1788_v6 }
 0xaa3   : > { %v1920_v32 = vpop.f32.mrb[34].mxu1 }
 0xaa4   : > { %v1922_v33 = vpop.f32.mrb[35].mxu1  ;;  %v1921_v14 = vadd.f32 %v1920_v32, %v1793_v10 }
 0xaa5   : > { %v5254_v33 = vld [vmem:[%s8796_s6 + $0x88] sm:$0xff] }
 0xaa7   : > { %v1925_v34 = vpop.f32.mrb[36].mxu1 }
 0xaa8   : > { %v1927_v36 = vpop.f32.mrb[37].mxu1  ;;  %v1926_v50 = vadd.f32 %v1925_v34, %v1798_v17  ;;  %v5255_v34 = vld [vmem:[%s8796_s6 + $0x90] sm:$0xff] }
 0xaa9   : > { %v5256_v36 = vld [vmem:[%s8796_s6 + $0x98] sm:$0xff] }
 0xaab   : > { %v1930_v38 = vpop.f32.mrb[38].mxu1 }
 0xaac   : > { %v1931_v40 = vadd.f32 %v1930_v38, %v1803_v37  ;;  %v1932_v41 = vpop.f32.mrb[39].mxu1  ;;  %v2007_v37 = vpop.permute.xlu0 %2006 }
 0xaad   : > { %v2002_v38 = vpop.permute.xlu1 %2001 }
 0xaae   : > { %v5249_v42 = vmul.f32 -1.442695, %v1931_v40 }
 0xaaf   : > { %v1935_v44 = vpop.f32.mrb[40].mxu1 }
 0xab0   : > { %6825 = vpow2.f32 %v5249_v42  ;;  %v1936_v46 = vadd.f32 %v1935_v44, %v1808_v43  ;;  %v1937_v48 = vpop.f32.mrb[41].mxu1 }
 0xab2   : > { %v5250_v49 = vmul.f32 -1.442695, %v1936_v46 }
 0xab3   : > { %v1940_v52 = vpop.f32.mrb[42].mxu1 }
 0xab4   : > { %6827 = vpow2.f32 %v5250_v49  ;;  %v1941_v55 = vadd.f32 %v1940_v52, %v1813_v45  ;;  %v1942_v57 = vpop.f32.mrb[43].mxu1  ;;  %v2017_v45 = vpop.permute.xlu0 %2016 }
 0xab5   : > { %v2012_v49 = vpop.permute.xlu1 %2011 }
 0xab6   : > { %v5251_v61 = vmul.f32 -1.442695, %v1941_v55 }
 0xab7   : > { %v1945_v1 = vpop.f32.mrb[44].mxu1 }
 0xab8   : > { %6829 = vpow2.f32 %v5251_v61  ;;  %v1946_v2 = vadd.f32 %v1945_v1, %v1818_v59  ;;  %v1947_v3 = vpop.f32.mrb[45].mxu1 }
 0xab9   : > { %6831 = vtanh.f32 %v1911_v62 }
 0xaba   : > { %v6826_v4 = vpop.eup %6825  ;;  %v5252_v5 = vmul.f32 -1.442695, %v1946_v2 }
 0xabb   : > { %v1965_v7 = vadd.f32 1.0, %v6826_v4 }
 0xabc   : > { %6833 = vpow2.f32 %v5252_v5 }
 0xabd   : > { %6835 = vrcp.f32 %v1965_v7 }
 0xabe   : > { %v6828_v9 = vpop.eup %6827  ;;  %6837 = vtanh.f32 %v1916_v8 }
 0xabf   : > { %v1966_v11 = vadd.f32 1.0, %v6828_v9 }
 0xac1   : > { %6839 = vrcp.f32 %v1966_v11 }
 0xac2   : > { %v6830_v15 = vpop.eup %6829  ;;  %6841 = vtanh.f32 %v1921_v14 }
 0xac3   : > { %v1967_v47 = vadd.f32 1.0, %v6830_v15  ;;  %v6832_v18 = vpop.eup %6831 }
 0xac5   : > { %6843 = vrcp.f32 %v1967_v47 }
 0xac6   : > { %v6834_v19 = vpop.eup %6833  ;;  %6845 = vtanh.f32 %v1926_v50 }
 0xac7   : > { %v6836_v21 = vpop.eup %6835  ;;  %v1968_v20 = vadd.f32 1.0, %v6834_v19 }
 0xac8   : > { %v1977_v22 = vmul.f32 %v6836_v21, %v6832_v18  ;;  %v6838_v53 = vpop.eup %6837  ;;  %v5257_v21 = vld [vmem:[%s8796_s6 + $0xa0] sm:$0xff] }
 0xac9   : > { %6847 = vrcp.f32 %v1968_v20  ;;  %v5258_v20 = vld [vmem:[%s8796_s6 + $0xa8] sm:$0xff] }
 0xacb   : > { %v6840_v23 = vpop.eup %6839 }
 0xacc   : > { %v1978_v56 = vmul.f32 %v6840_v23, %v6838_v53  ;;  %v6842_v24 = vpop.eup %6841  ;;  %v5259_v53 = vld [vmem:[%s8796_s6 + $0xb0] sm:$0xff]  ;;  %v5260_v23 = vld [vmem:[%s8796_s6 + $0xb8] sm:$0xff] }
 0xace   : > { %v6050_v25 = vpack.c.bf16 %v1978_v56, %v1977_v22  ;;  %v5297_v22 = vld [vmem:[%s8795_s5 + $0xe0] sm:$0xff]  ;;  %v5298_v56 = vld [vmem:[%s8795_s5 + $0xe8] sm:$0xff] }
 0xacf   : > { %v6844_v27 = vpop.eup %6843 }
 0xad0   : > { %6051 = vmatprep.subr.bf16.mxu0 %v6050_v25  ;;  %v1979_v26 = vmul.f32 %v6844_v27, %v6842_v24  ;;  %v6846_v29 = vpop.eup %6845  ;;  %v5299_v24 = vld [vmem:[%s8795_s5 + $0xf0] sm:$0xff]  ;;  %v5300_v27 = vld [vmem:[%s8795_s5 + $0xf8] sm:$0xff] }
 0xad1   : > { %6053 = vmatpush3.bf16.msra.mxu0 %v6050_v25  ;;  %v5278_v25 = vld [vmem:[%s8794_s4 + $0x188] sm:$0xff] }
 0xad3   : > { %v6848_v30 = vpop.eup %6847 }
 0xad4   : > { %v1980_v31 = vmul.f32 %v6848_v30, %v6846_v29  ;;  %v5294_v29 = vld [vmem:[%s8795_s5 + $0xc8] sm:$0xff]  ;;  %v5295_v30 = vld [vmem:[%s8795_s5 + $0xd0] sm:$0xff] }
 0xad6   : > { %v6054_v32 = vpack.c.bf16 %v1980_v31, %v1979_v26  ;;  %v5293_v26 = vld [vmem:[%s8795_s5 + $0xc0] sm:$0xff]  ;;  %v5296_v31 = vld [vmem:[%s8795_s5 + $0xd8] sm:$0xff] }
 0xad8   : > { %6055 = vmatprep.subr.bf16.mxu0 %v6054_v32 }
 0xad9   : > { %6057 = vmatpush3.bf16.msra.mxu0 %v6054_v32  ;;  %v5265_v32 = vld [vmem:[%s8797_s7 + $0xa0] sm:$0xff] }
 0xada   : > { %6058 = vmatprep.subr.bf16.mxu0 %v7039_v12 }
 0xadc   : > { %5790 = vmatmul.mubr.msk.f32.vlgmr.msra.gmra.mrb[24].mxu0 %vm661_vm5, %v5254_v33  ;;  %v5266_v33 = vld [vmem:[%s8797_s7 + $0xa8] sm:$0xff] }
 0xadd   : > { %5792 = vmatprep.mubr.msk.f32.mxu0 %vm661_vm5, %v5255_v34  ;;  %v5321_v34 = vld [vmem:[%s8797_s7 + $0xc0] sm:$0xff] }
 0xae0   : > { %5793 = vmatmul.mubr.msk.f32.gmra.mrb[26].mxu0 %vm661_vm5, %v5256_v36  ;;  %v5322_v36 = vld [vmem:[%s8797_s7 + $0xc8] sm:$0xff] }
 0xae1   : > { %5795 = vmatprep.mubr.msk.f32.mxu0 %vm661_vm5, %v5257_v21 }
 0xae4   : > { %5796 = vmatmul.mubr.msk.f32.gmra.mrb[28].mxu0 %vm661_vm5, %v5258_v20  ;;  %v5277_v20 = vld [vmem:[%s8794_s4 + $0x180] sm:$0xff] }
 0xae5   : > { %5798 = vmatprep.mubr.msk.f32.mxu0 %vm661_vm5, %v5259_v53  ;;  %v5279_v53 = vld [vmem:[%s8794_s4 + $0x190] sm:$0xff] }
 0xae8   : > { %5799 = vmatmul.mubr.msk.f32.gmra.mrb[30].mxu0 %vm661_vm5, %v5260_v23  ;;  %v5282_v23 = vld [vmem:[%s8794_s4 + $0x1a8] sm:$0xff] }
 0xae9   : > { %5305 = vmatprep.mubr.msk.f32.mxu0 %vm661_vm5, %v5278_v25  ;;  %v5283_v25 = vld [vmem:[%s8794_s4 + $0x1b0] sm:$0xff] }
 0xbaf   : > { %v5791_v40 = vpop.f32.mrb[24].mxu0 }
 0xbb0   : > { %v2135_v41 = vadd.f32 %v5791_v40, %v2007_v37  ;;  %v2129_v42 = vpop.f32.mrb[25].mxu0  ;;  %v5267_v37 = vld [vmem:[%s8797_s7 + $0xb0] sm:$0xff] }
 0xbb1   : > { %v2130_v43 = vadd.f32 %v2129_v42, %v2002_v38  ;;  %v5268_v38 = vld [vmem:[%s8797_s7 + $0xb8] sm:$0xff]  ;;  %v5323_v40 = vld [vmem:[%s8797_s7 + $0xd0] sm:$0xff]  ;;  %v5330_v42 = vld [vmem:[%s8799_s9 + $0x4] sm:$0xf] }
 0xbb2   : > { %v2169_v44 = vadd.f32 %v2135_v41, %v7614_v51  ;;  %v5324_v41 = vld [vmem:[%s8797_s7 + $0xd8] sm:$0xff] }
 0xbb3   : > { %v2168_v46 = vadd.f32 %v2130_v43, %v7617_v54  ;;  %v5794_v48 = vpop.f32.mrb[26].mxu0  ;;  %v5336_v43 = vld [vmem:[%s8793_s3 + $0x40] sm:$0xff] }
 0xbb4   : > { %v2173_v52 = vmul.f32 %v7569_v16, %v2169_v44  ;;  %v2145_v55 = vadd.f32 %v5794_v48, %v2017_v45  ;;  %v2139_v57 = vpop.f32.mrb[27].mxu0  ;;  %v5337_v44 = vld [vmem:[%s8793_s3 + $0x48] sm:$0xff]  ;;  %v5338_v45 = vld [vmem:[%s8793_s3 + $0x50] sm:$0xff] }
 0xbb5   : > { %v2172_v59 = vmul.f32 %v7569_v16, %v2168_v46  ;;  %v2140_v60 = vadd.f32 %v2139_v57, %v2012_v49  ;;  %v5339_v46 = vld [vmem:[%s8793_s3 + $0x58] sm:$0xff] }
 0xbb6   : > { %v2171_v61 = vadd.f32 %v2145_v55, %v7622_v63 }
 0xbb7   : > { %v2170_v62 = vadd.f32 %v2140_v60, %v7625_v0  ;;  %v6527_v1 = vpack.i.bf16 %v2173_v52, %v2172_v59  ;;  %v5561_v0 = vld [vmem:[%s8795_s5 + $0x1e0] sm:$0xff] }
 0xbb8   : > { %v2175_v2 = vmul.f32 %v7569_v16, %v2171_v61 }
 0xbb9   : > { %v2174_v51 = vmul.f32 %v7569_v16, %v2170_v62  ;;  %6528 = vrot.lane.b32.xlu1 %v6527_v1, %s7047_s26 }
 0xbbb   : > { %v6532_v54 = vpack.i.bf16 %v2175_v2, %v2174_v51 }
 0xbbd   : > { %6533 = vrot.lane.b32.xlu0 %v6532_v54, %s7047_s26 }
 0xc2b   : > { %v6529_v3 = vpop.permute.xlu1 %6528 }
 0xc2c   : > { %v6531_v4 = vunpack.i.h.bf16 %v6529_v3  ;;  %v6530_v5 = vunpack.i.l.bf16 %v6529_v3 }
 0xc2e   : > { %v2197_v6 = vsel %vm413_vm0, 0.0, %v6531_v4  ;;  %v2196_v63 = vsel %vm413_vm0, 0.0, %v6530_v5 }
 0xc2f   : > { %v2202_v16 = vsel %vm2200_vm8, %v2197_v6, 0.0  ;;  %v2201_v7 = vsel %vm2200_vm8, %v2196_v63, 0.0  ;;  %v6059_v8 = vpack.c.bf16 %v2197_v6, %v2196_v63  ;;  %v6534_v9 = vpop.permute.xlu0 %6533 }
 0xc30   : > { %v6536_v10 = vunpack.i.h.bf16 %v6534_v9  ;;  %v6535_v11 = vunpack.i.l.bf16 %v6534_v9  ;;  %v6537_v14 = vpack.i.bf16 %v2202_v16, %v2201_v7 }
 0xc31   : > { %6061 = vmatpush1.bf16.msk.msra.mxu0 %vm7786_vm9, %v6059_v8 }
 0xc32   : > { %v2199_v15 = vsel %vm413_vm0, 0.0, %v6536_v10  ;;  %v2198_v17 = vsel %vm413_vm0, 0.0, %v6535_v11  ;;  %6538 = vrot.lane.b32.xlu1 %v6537_v14, %s8833_s27  ;;  %6062 = vmatprep.subr.bf16.mxu0 %v7039_v12 }
 0xc33   : > { %v2204_v47 = vsel %vm2200_vm8, %v2199_v15, 0.0  ;;  %v2203_v50 = vsel %vm2200_vm8, %v2198_v17, 0.0  ;;  %v6063_v18 = vpack.c.bf16 %v2199_v15, %v2198_v17 }
 0xc34   : > { %v6542_v19 = vpack.i.bf16 %v2204_v47, %v2203_v50 }
 0xc35   : > { %6065 = vmatpush1.bf16.msk.msra.mxu0 %vm7786_vm9, %v6063_v18 }
 0xc36   : > { %6543 = vrot.lane.b32.xlu0 %v6542_v19, %s8833_s27  ;;  %6548 = vrot.lane.b32.xlu1 %v6537_v14, %s8835_s21 }
 0xc37   : > { %6066 = vmatprep.subr.bf16.mxu0 %v7039_v12 }
 0xc3a   : > { %6553 = vrot.lane.b32.xlu0 %v6542_v19, %s8835_s21  ;;  %6558 = vrot.lane.b32.xlu1 %v6537_v14, %s8817_s25 }
 0xc3e   : > { %6563 = vrot.lane.b32.xlu0 %v6542_v19, %s8817_s25  ;;  %6568 = vrot.lane.b32.xlu1 %v6537_v14, %s8815_s15 }
 0xc42   : > { %6573 = vrot.lane.b32.xlu0 %v6542_v19, %s8815_s15  ;;  %2305 = vperm.xlu1 %6376, %v5297_v22   ;;  %v5280_v22 = vld [vmem:[%s8794_s4 + $0x198] sm:$0xff] }
 0xc46   : > { %2310 = vperm.xlu0 %6375, %v5298_v56   ;;  %2315 = vperm.xlu1 %6376, %v5299_v24   ;;  %v5281_v56 = vld [vmem:[%s8794_s4 + $0x1a0] sm:$0xff]  ;;  %v5284_v24 = vld [vmem:[%s8794_s4 + $0x1b8] sm:$0xff] }
 0xc4a   : > { %2320 = vperm.xlu0 %6375, %v5300_v27   ;;  %2285 = vperm.xlu1 %6376, %v5293_v26   ;;  %v5286_v27 = vld [vmem:[%s8794_s4 + $0x1c8] sm:$0xff]  ;;  %v5285_v26 = vld [vmem:[%s8794_s4 + $0x1c0] sm:$0xff] }
 0xc4e   : > { %2290 = vperm.xlu0 %6375, %v5294_v29   ;;  %2295 = vperm.xlu1 %6376, %v5295_v30   ;;  %v5288_v29 = vld [vmem:[%s8794_s4 + $0x1d8] sm:$0xff]  ;;  %v5287_v30 = vld [vmem:[%s8794_s4 + $0x1d0] sm:$0xff] }
 0xc52   : > { %2300 = vperm.xlu0 %6375, %v5296_v31   ;;  %2021 = vperm.xlu1 %6376, %v5265_v32   ;;  %v5290_v31 = vld [vmem:[%s8794_s4 + $0x1e8] sm:$0xff]  ;;  %v5289_v32 = vld [vmem:[%s8794_s4 + $0x1e0] sm:$0xff] }
 0xc56   : > { %2026 = vperm.xlu0 %6375, %v5266_v33   ;;  %2496 = vperm.xlu1 %6376, %v5321_v34   ;;  %v5292_v33 = vld [vmem:[%s8794_s4 + $0x1f8] sm:$0xff]  ;;  %v5291_v34 = vld [vmem:[%s8794_s4 + $0x1f0] sm:$0xff] }
 0xc5a   : > { %2501 = vperm.xlu0 %6375, %v5322_v36   ;;  %2031 = vperm.xlu1 %6376, %v5267_v37   ;;  %v5317_v36 = vld [vmem:[%s8796_s6 + $0xc0] sm:$0xff] }
 0xc5e   : > { %2036 = vperm.xlu0 %6375, %v5268_v38   ;;  %2506 = vperm.xlu1 %6376, %v5323_v40  }
 0xc62   : > { %2511 = vperm.xlu0 %6375, %v5324_v41   ;;  %2625 = vperm.xlu1 %6376, %v5330_v42  }
 0xc66   : > { %2719 = vperm.xlu0 %6375, %v5336_v43   ;;  %2724 = vperm.xlu1 %6376, %v5337_v44  }
 0xc6a   : > { %2729 = vperm.xlu0 %6375, %v5338_v45   ;;  %2734 = vperm.xlu1 %6376, %v5339_v46  }
 0xca4   : > { %v6539_v48 = vpop.permute.xlu1 %6538 }
 0xca5   : > { %v6541_v49 = vunpack.i.h.bf16 %v6539_v48  ;;  %v6540_v52 = vunpack.i.l.bf16 %v6539_v48 }
 0xca7   : > { %v6067_v55 = vpack.c.bf16 %v6541_v49, %v6540_v52 }
 0xca8   : > { %v6544_v57 = vpop.permute.xlu0 %6543  ;;  %v6549_v59 = vpop.permute.xlu1 %6548 }
 0xca9   : > { %v6546_v60 = vunpack.i.h.bf16 %v6544_v57  ;;  %v6545_v61 = vunpack.i.l.bf16 %v6544_v57  ;;  %6068 = vmatpush1.bf16.msra.mxu0 %v6067_v55  ;;  %v6551_v1 = vunpack.i.h.bf16 %v6549_v59  ;;  %v6550_v2 = vunpack.i.l.bf16 %v6549_v59 }
 0xcaa   : > { %6069 = vmatprep.subr.bf16.mxu0 %v7039_v12 }
 0xcab   : > { %v6070_v62 = vpack.c.bf16 %v6546_v60, %v6545_v61  ;;  %v6073_v54 = vpack.c.bf16 %v6551_v1, %v6550_v2 }
 0xcac   : > { %v6554_v51 = vpop.permute.xlu0 %6553  ;;  %v6559_v5 = vpop.permute.xlu1 %6558 }
 0xcad   : > { %6071 = vmatpush1.bf16.msra.mxu0 %v6070_v62  ;;  %v6556_v3 = vunpack.i.h.bf16 %v6554_v51  ;;  %v6555_v4 = vunpack.i.l.bf16 %v6554_v51  ;;  %v6561_v63 = vunpack.i.h.bf16 %v6559_v5  ;;  %v6560_v16 = vunpack.i.l.bf16 %v6559_v5 }
 0xcae   : > { %6072 = vmatprep.subr.bf16.mxu0 %v7039_v12 }
 0xcaf   : > { %v6076_v6 = vpack.c.bf16 %v6556_v3, %v6555_v4  ;;  %v6079_v8 = vpack.c.bf16 %v6561_v63, %v6560_v16 }
 0xcb0   : > { %v6564_v7 = vpop.permute.xlu0 %6563  ;;  %v6569_v11 = vpop.permute.xlu1 %6568 }
 0xcb1   : > { %6074 = vmatpush1.bf16.msra.mxu0 %v6073_v54  ;;  %v6566_v9 = vunpack.i.h.bf16 %v6564_v7  ;;  %v6565_v10 = vunpack.i.l.bf16 %v6564_v7  ;;  %v6571_v15 = vunpack.i.h.bf16 %v6569_v11  ;;  %v6570_v17 = vunpack.i.l.bf16 %v6569_v11 }
 0xcb2   : > { %6075 = vmatprep.subr.bf16.mxu0 %v7039_v12 }
 0xcb3   : > { %v6082_v14 = vpack.c.bf16 %v6566_v9, %v6565_v10  ;;  %v6085_v50 = vpack.c.bf16 %v6571_v15, %v6570_v17 }
 0xcb4   : > { %v6574_v47 = vpop.permute.xlu0 %6573 }
 0xcb5   : > { %6077 = vmatpush1.bf16.msra.mxu0 %v6076_v6  ;;  %v6576_v18 = vunpack.i.h.bf16 %v6574_v47  ;;  %v6575_v19 = vunpack.i.l.bf16 %v6574_v47 }
 0xcb6   : > { %6078 = vmatprep.subr.bf16.mxu0 %v7039_v12 }
 0xcb7   : > { %v6088_v21 = vpack.c.bf16 %v6576_v18, %v6575_v19 }
 0xcb9   : > { %6080 = vmatpush1.bf16.msra.mxu0 %v6079_v8 }
 0xcba   : > { %6081 = vmatprep.subr.bf16.mxu0 %v7039_v12 }
 0xcbd   : > { %6083 = vmatpush1.bf16.msra.mxu0 %v6082_v14 }
 0xcbe   : > { %6084 = vmatprep.subr.bf16.mxu0 %v7039_v12 }
 0xcc1   : > { %6086 = vmatpush1.bf16.msra.mxu0 %v6085_v50  ;;  %v2306_v46 = vpop.permute.xlu1 %2305 }
 0xcc2   : > { %6087 = vmatprep.subr.bf16.mxu0 %v7039_v12 }
 0xcc5   : > { %6089 = vmatpush1.bf16.msra.mxu0 %v6088_v21  ;;  %v2311_v57 = vpop.permute.xlu0 %2310  ;;  %v2316_v60 = vpop.permute.xlu1 %2315 }
 0xcc8   : > { %2412 = vmatmul.mubr.f32.vlgmr.msra.gmra.mrb[32].mxu0 %v5277_v20 }
 0xcc9   : > { %5306 = vmatprep.mubr.msk.f32.mxu0 %vm661_vm5, %v5280_v22  ;;  %v2321_v3 = vpop.permute.xlu0 %2320  ;;  %v2286_v4 = vpop.permute.xlu1 %2285 }
 0xccc   : > { %2417 = vmatmul.mubr.f32.gmra.mrb[34].mxu0 %v5279_v53 }
 0xccd   : > { %5307 = vmatprep.mubr.msk.f32.mxu0 %vm661_vm5, %v5282_v23  ;;  %v2291_v10 = vpop.permute.xlu0 %2290  ;;  %v2296_v17 = vpop.permute.xlu1 %2295 }
 0xcd0   : > { %2422 = vmatmul.mubr.f32.gmra.mrb[36].mxu0 %v5281_v56 }
 0xcd1   : > { %5308 = vmatprep.mubr.msk.f32.mxu0 %vm661_vm5, %v5284_v24  ;;  %v2301_v19 = vpop.permute.xlu0 %2300 }
 0xcd4   : > { %2427 = vmatmul.mubr.f32.gmra.mrb[38].mxu0 %v5283_v25 }
 0xcd5   : > { %5309 = vmatprep.mubr.msk.f32.mxu0 %vm661_vm5, %v5286_v27 }
 0xcd8   : > { %2432 = vmatmul.mubr.f32.gmra.mrb[40].mxu0 %v5285_v26 }
 0xcd9   : > { %5310 = vmatprep.mubr.msk.f32.mxu0 %vm661_vm5, %v5288_v29 }
 0xcdc   : > { %2437 = vmatmul.mubr.f32.gmra.mrb[42].mxu0 %v5287_v30 }
 0xcdd   : > { %5311 = vmatprep.mubr.msk.f32.mxu0 %vm661_vm5, %v5290_v31 }
 0xce0   : > { %2442 = vmatmul.mubr.f32.gmra.mrb[44].mxu0 %v5289_v32 }
 0xce1   : > { %5312 = vmatprep.mubr.msk.f32.mxu0 %vm661_vm5, %v5292_v33 }
 0xce4   : > { %2447 = vmatmul.mubr.f32.gmra.mrb[46].mxu0 %v5291_v34 }
 0xce5   : > { %5809 = vmatprep.mubr.msk.f32.mxu0 %vm661_vm5, %v5317_v36 }
 0xd9b   : > { %v2413_v37 = vpop.f32.mrb[32].mxu0 }
 0xd9c   : > { %v2415_v38 = vpop.f32.mrb[33].mxu0  ;;  %v2414_v6 = vadd.f32 %v2413_v37, %v2286_v4 }
 0xd9d   : > { %v5318_v38 = vld [vmem:[%s8796_s6 + $0xc8] sm:$0xff] }
 0xd9f   : > { %v2418_v40 = vpop.f32.mrb[34].mxu0 }
 0xda0   : > { %v2420_v41 = vpop.f32.mrb[35].mxu0  ;;  %v2419_v14 = vadd.f32 %v2418_v40, %v2291_v10  ;;  %v5319_v40 = vld [vmem:[%s8796_s6 + $0xd0] sm:$0xff]  ;;  %v5329_v10 = vld [vmem:[%s8798_s8 + $0x4] sm:$0xf] }
 0xda1   : > { %v5320_v41 = vld [vmem:[%s8796_s6 + $0xd8] sm:$0xff] }
 0xda3   : > { %v2423_v42 = vpop.f32.mrb[36].mxu0 }
 0xda4   : > { %v2425_v43 = vpop.f32.mrb[37].mxu0  ;;  %v2424_v50 = vadd.f32 %v2423_v42, %v2296_v17  ;;  %v2027_v42 = vpop.permute.xlu0 %2026 }
 0xda5   : > { %v2022_v43 = vpop.permute.xlu1 %2021 }
 0xda7   : > { %v2428_v44 = vpop.f32.mrb[38].mxu0 }
 0xda8   : > { %v2430_v45 = vpop.f32.mrb[39].mxu0  ;;  %v2429_v20 = vadd.f32 %v2428_v44, %v2301_v19  ;;  %v2502_v44 = vpop.permute.xlu0 %2501 }
 0xda9   : > { %v2497_v45 = vpop.permute.xlu1 %2496 }
 0xdab   : > { %v2433_v48 = vpop.f32.mrb[40].mxu0 }
 0xdac   : > { %v2434_v49 = vadd.f32 %v2433_v48, %v2306_v46  ;;  %v2435_v52 = vpop.f32.mrb[41].mxu0  ;;  %v2037_v46 = vpop.permute.xlu0 %2036 }
 0xdad   : > { %v2032_v48 = vpop.permute.xlu1 %2031  ;;  %v6290_v52 = vadd.f32 %v2497_v45, %v2022_v43 }
 0xdae   : > { %v5313_v55 = vmul.f32 -1.442695, %v2434_v49  ;;  %v6288_v49 = vadd.f32 %v2502_v44, %v2027_v42 }
 0xdaf   : > { %v2438_v59 = vpop.f32.mrb[42].mxu0 }
 0xdb0   : > { %6849 = vpow2.f32 %v5313_v55  ;;  %v2439_v61 = vadd.f32 %v2438_v59, %v2311_v57  ;;  %v2440_v62 = vpop.f32.mrb[43].mxu0  ;;  %v2512_v55 = vpop.permute.xlu0 %2511 }
 0xdb1   : > { %v2507_v59 = vpop.permute.xlu1 %2506 }
 0xdb2   : > { %v5314_v1 = vmul.f32 -1.442695, %v2439_v61 }
 0xdb3   : > { %v2443_v2 = vpop.f32.mrb[44].mxu0 }
 0xdb4   : > { %6851 = vpow2.f32 %v5314_v1  ;;  %v2444_v51 = vadd.f32 %v2443_v2, %v2316_v60  ;;  %v2445_v54 = vpop.f32.mrb[45].mxu0  ;;  %v6292_v1 = vadd.f32 %v2512_v55, %v2037_v46  ;;  %v7969_v2 = vld [vmem:[%s7195_s22] ss:$0 sm:$0xff] }
 0xdb5   : > { %v6294_v54 = vadd.f32 %v2507_v59, %v2032_v48 }
 0xdb6   : > { %v5315_v5 = vmul.f32 -1.442695, %v2444_v51 }
 0xdb7   : > { %v2448_v63 = vpop.f32.mrb[46].mxu0 }
 0xdb8   : > { %6853 = vpow2.f32 %v5315_v5  ;;  %v2449_v16 = vadd.f32 %v2448_v63, %v2321_v3  ;;  %v2450_v7 = vpop.f32.mrb[47].mxu0 }
 0xdb9   : > { %6855 = vtanh.f32 %v2414_v6 }
 0xdba   : > { %v6850_v8 = vpop.eup %6849  ;;  %v5316_v9 = vmul.f32 -1.442695, %v2449_v16 }
 0xdbb   : > { %v2468_v11 = vadd.f32 1.0, %v6850_v8 }
 0xdbc   : > { %6857 = vpow2.f32 %v5316_v9 }
 0xdbd   : > { %6859 = vrcp.f32 %v2468_v11  ;;  %v5332_v11 = vld [vmem:[%s8792_s2 + $0x40] sm:$0xff] }
 0xdbe   : > { %v6852_v15 = vpop.eup %6851  ;;  %6861 = vtanh.f32 %v2419_v14  ;;  %v5117_v14 = vsel %vm382_vm10, 1.0, %v7046_v58 }
 0xdbf   : > { %v2469_v47 = vadd.f32 1.0, %v6852_v15  ;;  %v2702_v15 = vmul.f32 %v7969_v2, %v5117_v14  ;;  %v2703_v17 = vsub.f32 1.0, %v5117_v14  ;;  %v5364_v14 = vld [vmem:[%s8795_s5 + $0x118] sm:$0xff] }
 0xdc1   : > { %6863 = vrcp.f32 %v2469_v47  ;;  %v7987_v47 = vadd.f32 %v2703_v17, %v2702_v15  ;;  %v5393_v15 = vld [vmem:[%s8797_s7 + $0x100] sm:$0xff]  ;;  %v5394_v17 = vld [vmem:[%s8797_s7 + $0x108] sm:$0xff] }
 0xdc2   : > { %v6854_v18 = vpop.eup %6853  ;;  %6865 = vtanh.f32 %v2424_v50  ;;  %v2626_v50 = vpop.permute.xlu1 %2625 }
 0xdc3   : > { %v2470_v21 = vadd.f32 1.0, %v6854_v18  ;;  %v6856_v22 = vpop.eup %6855 }
 0xdc5   : > { %6867 = vrcp.f32 %v2470_v21 }
 0xdc6   : > { %v6858_v53 = vpop.eup %6857  ;;  %6869 = vtanh.f32 %v2429_v20 }
 0xdc7   : > { %v6860_v23 = vpop.eup %6859  ;;  %v2471_v56 = vadd.f32 1.0, %v6858_v53 }
 0xdc8   : > { %v2480_v24 = vmul.f32 %v6860_v23, %v6856_v22  ;;  %v6862_v25 = vpop.eup %6861  ;;  %v2705_v22 = vmul.f32 %v7987_v47, %v7594_v39  ;;  %v5334_v23 = vld [vmem:[%s8792_s2 + $0x50] sm:$0xff]  ;;  %v5335_v39 = vld [vmem:[%s8792_s2 + $0x58] sm:$0xff] }
 0xdc9   : > { %6871 = vrcp.f32 %v2471_v56  ;;  %v2725_v56 = vpop.permute.xlu1 %2724 }
 0xdcb   : > { %v6864_v27 = vpop.eup %6863 }
 0xdcc   : > { %v2481_v26 = vmul.f32 %v6864_v27, %v6862_v25  ;;  %v6866_v29 = vpop.eup %6865 }
 0xdce   : > { %v6090_v30 = vpack.c.bf16 %v2481_v26, %v2480_v24  ;;  %v2720_v24 = vpop.permute.xlu0 %2719 }
 0xdcf   : > { %v6868_v31 = vpop.eup %6867 }
 0xdd0   : > { %6091 = vmatprep.subr.bf16.mxu0 %v6090_v30  ;;  %v2482_v32 = vmul.f32 %v6868_v31, %v6866_v29  ;;  %v6870_v33 = vpop.eup %6869  ;;  %v2735_v31 = vpop.permute.xlu1 %2734 }
 0xdd1   : > { %6093 = vmatpush3.bf16.msra.mxu0 %v6090_v30 }
 0xdd3   : > { %v6872_v34 = vpop.eup %6871 }
 0xdd4   : > { %v2483_v36 = vmul.f32 %v6872_v34, %v6870_v33  ;;  %v2730_v34 = vpop.permute.xlu0 %2729 }
 0xdd6   : > { %v6094_v37 = vpack.c.bf16 %v2483_v36, %v2482_v32 }
 0xdd8   : > { %6095 = vmatprep.subr.bf16.mxu0 %v6094_v37 }
 0xdd9   : > { %6097 = vmatpush3.bf16.msra.mxu0 %v6094_v37 }
 0xddc   : > { %5810 = vmatmul.mubr.msk.f32.vlgmr.msra.gmra.mrb[28].mxu0 %vm661_vm5, %v5318_v38 }
 0xddd   : > { %5812 = vmatprep.mubr.msk.f32.mxu0 %vm661_vm5, %v5319_v40 }
 0xde0   : > { %5813 = vmatmul.mubr.msk.f32.gmra.mrb[30].mxu0 %vm661_vm5, %v5320_v41 }
 0xeaf   : > { %v5811_v57 = vpop.f32.mrb[28].mxu0 }
 0xeb0   : > { %v6289_v60 = vadd.f32 %v6288_v49, %v5811_v57  ;;  %v2592_v61 = vpop.f32.mrb[29].mxu0 }
 0xeb1   : > { %v6291_v62 = vadd.f32 %v6290_v52, %v2592_v61 }
 0xeb2   : > { %v2616_v51 = vmul.f32 %v7969_v2, %v6289_v60 }
 0xeb3   : > { %v2615_v3 = vmul.f32 %v7969_v2, %v6291_v62  ;;  %v5814_v4 = vpop.f32.mrb[30].mxu0 }
 0xeb4   : > { %v6293_v5 = vadd.f32 %v6292_v1, %v5814_v4  ;;  %v2602_v6 = vpop.f32.mrb[31].mxu0 }
 0xeb5   : > { %v6099_v63 = vpack.c.bf16 %v2616_v51, %v2615_v3  ;;  %v6295_v16 = vadd.f32 %v6294_v54, %v2602_v6  ;;  %v5365_v6 = vld [vmem:[%s8795_s5 + $0x120] sm:$0xff] }
 0xeb6   : > { %v2618_v7 = vmul.f32 %v7969_v2, %v6293_v5 }
 0xeb7   : > { %v2617_v8 = vmul.f32 %v7969_v2, %v6295_v16  ;;  %6100 = vmatpush3.bf16.msra.mxu1 %v6099_v63  ;;  %v5366_v63 = vld [vmem:[%s8795_s5 + $0x128] sm:$0xff]  ;;  %v5367_v16 = vld [vmem:[%s8795_s5 + $0x130] sm:$0xff] }
 0xeb8   : > { %6101 = vmatprep.subr.bf16.mxu1 %v7039_v12 }
 0xeb9   : > { %v6102_v9 = vpack.c.bf16 %v2618_v7, %v2617_v8  ;;  %v5346_v7 = vld [vmem:[%s8794_s4 + $0x208] sm:$0xff]  ;;  %v5368_v8 = vld [vmem:[%s8795_s5 + $0x138] sm:$0xff] }
 0xebb   : > { %6103 = vmatpush3.bf16.msra.mxu1 %v6102_v9  ;;  %v5361_v9 = vld [vmem:[%s8795_s5 + $0x100] sm:$0xff] }
 0xebe   : > { %5824 = vmatmul.mubr.msk.f32.vlgmr.msra.gmra.mrb[46].mxu1 %vm661_vm5, %v5329_v10  ;;  %v5362_v10 = vld [vmem:[%s8795_s5 + $0x108] sm:$0xff] }
 0xebf   : > { %5828 = vmatprep.mubr.msk.f32.mxu1 %vm413_vm0, %v5332_v11  ;;  %v5363_v11 = vld [vmem:[%s8795_s5 + $0x110] sm:$0xff] }
 0xf91   : > { %v2697_v18 = vpop.f32.mrb[46].mxu1 }
 0xf92   : > { %v2698_v19 = vadd.f32 %v2697_v18, %v2626_v50  ;;  %v5825_v21 = vpop.f32.mrb[47].mxu1  ;;  %v5395_v50 = vld [vmem:[%s8797_s7 + $0x110] sm:$0xff]  ;;  %v5396_v18 = vld [vmem:[%s8797_s7 + $0x118] sm:$0xff] }
 0xf94   : > { %v2701_v20 = vmul.f32 %v7969_v2, %v2698_v19 }
 0xf96   : > { %v7992_v53 = vadd.f32 %v2705_v22, %v2701_v20 }
 0xf98   : > { %5826 = vmatprep.subr.msk.mxu1 %vm426_vm1, %v7992_v53 }
 0xf99   : > { %5827 = vmatpush3.msk.msra.mxu1 %vm426_vm1, %v7992_v53 }
 0xf9a   : > { %5829 = vmatmul.mubr.msk.f32.vlgmr.msra.gmra.mrb[48].mxu1 %vm413_vm0, %v5333_v28  ;;  %6104 = vmatprep.subr.bf16.mxu1 %v7039_v12 }
 0xf9b   : > { %5831 = vmatprep.mubr.msk.f32.mxu1 %vm413_vm0, %v5334_v23 }
 0xf9e   : > { %5832 = vmatmul.mubr.msk.f32.gmra.mrb[50].mxu1 %vm413_vm0, %v5335_v39 }
 0xf9f   : > { %5373 = vmatprep.mubr.msk.f32.mxu1 %vm661_vm5, %v5346_v7  ;;  %v5355_v7 = vld [vmem:[%s8794_s4 + $0x250] sm:$0xff] }
0x106d   : > { %v5830_v25 = vpop.f32.mrb[48].mxu1 }
0x106e   : > { %v2824_v27 = vadd.f32 %v5830_v25, %v2725_v56  ;;  %v2818_v26 = vpop.f32.mrb[49].mxu1 }
0x106f   : > { %v2819_v29 = vadd.f32 %v2818_v26, %v2720_v24 }
0x1070   : > { %v8012_v30 = vmul.f32 %v7969_v2, %v2824_v27 }
0x1071   : > { %v8015_v32 = vmul.f32 %v7969_v2, %v2819_v29  ;;  %v5833_v33 = vpop.f32.mrb[50].mxu1 }
0x1072   : > { %v2834_v36 = vadd.f32 %v5833_v33, %v2735_v31  ;;  %v2828_v37 = vpop.f32.mrb[51].mxu1 }
0x1073   : > { %v6577_v38 = vpack.i.bf16 %v8012_v30, %v8015_v32  ;;  %v2829_v40 = vadd.f32 %v2828_v37, %v2730_v34 }
0x1074   : > { %v8020_v41 = vmul.f32 %v7969_v2, %v2834_v36 }
0x1075   : > { %v8023_v42 = vmul.f32 %v7969_v2, %v2829_v40  ;;  %6578 = vrot.lane.b32.xlu0 %v6577_v38, %s8831_s28 }
0x1077   : > { %v6582_v43 = vpack.i.bf16 %v8020_v41, %v8023_v42 }
0x1079   : > { %6583 = vrot.lane.b32.xlu1 %v6582_v43, %s8831_s28 }
0x10e7   : > { %v6579_v44 = vpop.permute.xlu0 %6578 }
0x10e8   : > { %v6581_v45 = vunpack.i.h.bf16 %v6579_v44  ;;  %v6580_v46 = vunpack.i.l.bf16 %v6579_v44 }
0x10ea   : > { %v2858_v48 = vsel %vm535_vm2, 0.0, %v6581_v45  ;;  %v2857_v49 = vsel %vm535_vm2, 0.0, %v6580_v46 }
0x10eb   : > { %v2862_v52 = vsel %vm540_vm3, %v2858_v48, 0.0  ;;  %v2861_v55 = vsel %vm540_vm3, %v2857_v49, 0.0  ;;  %v6105_v57 = vpack.c.bf16 %v2858_v48, %v2857_v49  ;;  %v6584_v59 = vpop.permute.xlu1 %6583 }
0x10ec   : > { %v6586_v60 = vunpack.i.h.bf16 %v6584_v59  ;;  %v6585_v61 = vunpack.i.l.bf16 %v6584_v59  ;;  %v6587_v62 = vpack.i.bf16 %v2862_v52, %v2861_v55 }
0x10ed   : > { %6107 = vmatpush1.bf16.msk.msra.mxu1 %vm7224_vm4, %v6105_v57 }
0x10ee   : > { %v2860_v1 = vsel %vm535_vm2, 0.0, %v6586_v60  ;;  %v2859_v51 = vsel %vm535_vm2, 0.0, %v6585_v61  ;;  %6588 = vrot.lane.b32.xlu0 %v6587_v62, %s8832_s20  ;;  %6108 = vmatprep.subr.bf16.mxu1 %v7039_v12 }
0x10ef   : > { %v2864_v54 = vsel %vm540_vm3, %v2860_v1, 0.0  ;;  %v2863_v3 = vsel %vm540_vm3, %v2859_v51, 0.0  ;;  %v6109_v4 = vpack.c.bf16 %v2860_v1, %v2859_v51  ;;  %v5348_v1 = vld [vmem:[%s8794_s4 + $0x218] sm:$0xff]  ;;  %v5347_v51 = vld [vmem:[%s8794_s4 + $0x210] sm:$0xff] }
0x10f0   : > { %v6592_v5 = vpack.i.bf16 %v2864_v54, %v2863_v3  ;;  %v5350_v54 = vld [vmem:[%s8794_s4 + $0x228] sm:$0xff]  ;;  %v5349_v3 = vld [vmem:[%s8794_s4 + $0x220] sm:$0xff] }
0x10f1   : > { %6111 = vmatpush1.bf16.msk.msra.mxu1 %vm7224_vm4, %v6109_v4  ;;  %v5352_v4 = vld [vmem:[%s8794_s4 + $0x238] sm:$0xff] }
0x10f2   : > { %6593 = vrot.lane.b32.xlu1 %v6592_v5, %s8832_s20  ;;  %6598 = vrot.lane.b32.xlu0 %v6587_v62, %s8833_s27 }
0x10f3   : > { %6112 = vmatprep.subr.bf16.mxu1 %v7039_v12 }
0x10f6   : > { %6603 = vrot.lane.b32.xlu1 %v6592_v5, %s8833_s27  ;;  %6608 = vrot.lane.b32.xlu0 %v6587_v62, %s8834_s30 }
0x10fa   : > { %6613 = vrot.lane.b32.xlu1 %v6592_v5, %s8834_s30  ;;  %6618 = vrot.lane.b32.xlu0 %v6587_v62, %s8835_s21  ;;  %v5345_v62 = vld [vmem:[%s8794_s4 + $0x200] sm:$0xff] }
0x10fe   : > { %6623 = vrot.lane.b32.xlu1 %v6592_v5, %s8835_s21  ;;  %2965 = vperm.xlu0 %6375, %v5365_v6   ;;  %v5351_v5 = vld [vmem:[%s8794_s4 + $0x230] sm:$0xff]  ;;  %v5354_v6 = vld [vmem:[%s8794_s4 + $0x248] sm:$0xff] }
0x1102   : > { %2970 = vperm.xlu1 %6376, %v5366_v63   ;;  %2975 = vperm.xlu0 %6375, %v5367_v16   ;;  %v5353_v63 = vld [vmem:[%s8794_s4 + $0x240] sm:$0xff]  ;;  %v5356_v16 = vld [vmem:[%s8794_s4 + $0x258] sm:$0xff] }
0x1106   : > { %2980 = vperm.xlu1 %6376, %v5368_v8   ;;  %2945 = vperm.xlu0 %6375, %v5361_v9   ;;  %v5358_v8 = vld [vmem:[%s8794_s4 + $0x268] sm:$0xff]  ;;  %v5357_v9 = vld [vmem:[%s8794_s4 + $0x260] sm:$0xff] }
0x110a   : > { %2950 = vperm.xlu1 %6376, %v5362_v10   ;;  %2955 = vperm.xlu0 %6375, %v5363_v11   ;;  %v5360_v10 = vld [vmem:[%s8794_s4 + $0x278] sm:$0xff]  ;;  %v5359_v11 = vld [vmem:[%s8794_s4 + $0x270] sm:$0xff] }
0x110e   : > { %2960 = vperm.xlu1 %6376, %v5364_v14   ;;  %3164 = vperm.xlu0 %6375, %v5393_v15   ;;  %v5385_v14 = vld [vmem:[%s8796_s6 + $0x100] sm:$0xff] }
0x110f   : > { %5842 = vmatprep.mubr.msk.f32.mxu0 %vm661_vm5, %v5385_v14 }
0x1112   : > { %3169 = vperm.xlu1 %6376, %v5394_v17   ;;  %3174 = vperm.xlu0 %6375, %v5395_v50  }
0x1116   : > { %3179 = vperm.xlu1 %6376, %v5396_v18  }
0x1160   : > { %v6589_v19 = vpop.permute.xlu0 %6588 }
0x1161   : > { %v6591_v21 = vunpack.i.h.bf16 %v6589_v19  ;;  %v6590_v20 = vunpack.i.l.bf16 %v6589_v19 }
0x1163   : > { %v6113_v22 = vpack.c.bf16 %v6591_v21, %v6590_v20 }
0x1164   : > { %v6594_v28 = vpop.permute.xlu1 %6593  ;;  %v6599_v23 = vpop.permute.xlu0 %6598 }
0x1165   : > { %v6596_v39 = vunpack.i.h.bf16 %v6594_v28  ;;  %v6595_v56 = vunpack.i.l.bf16 %v6594_v28  ;;  %6114 = vmatpush1.bf16.msra.mxu1 %v6113_v22  ;;  %v6601_v25 = vunpack.i.h.bf16 %v6599_v23  ;;  %v6600_v27 = vunpack.i.l.bf16 %v6599_v23 }
0x1166   : > { %6115 = vmatprep.subr.bf16.mxu1 %v7039_v12 }
0x1167   : > { %v6116_v24 = vpack.c.bf16 %v6596_v39, %v6595_v56  ;;  %v6119_v29 = vpack.c.bf16 %v6601_v25, %v6600_v27 }
0x1168   : > { %v6604_v26 = vpop.permute.xlu1 %6603  ;;  %v6609_v34 = vpop.permute.xlu0 %6608 }
0x1169   : > { %6117 = vmatpush1.bf16.msra.mxu1 %v6116_v24  ;;  %v6606_v31 = vunpack.i.h.bf16 %v6604_v26  ;;  %v6605_v33 = vunpack.i.l.bf16 %v6604_v26  ;;  %v6611_v37 = vunpack.i.h.bf16 %v6609_v34  ;;  %v6610_v38 = vunpack.i.l.bf16 %v6609_v34 }
0x116a   : > { %6118 = vmatprep.subr.bf16.mxu1 %v7039_v12 }
0x116b   : > { %v6122_v36 = vpack.c.bf16 %v6606_v31, %v6605_v33  ;;  %v6125_v43 = vpack.c.bf16 %v6611_v37, %v6610_v38 }
0x116c   : > { %v6614_v40 = vpop.permute.xlu1 %6613  ;;  %v6619_v46 = vpop.permute.xlu0 %6618 }
0x116d   : > { %6120 = vmatpush1.bf16.msra.mxu1 %v6119_v29  ;;  %v6616_v44 = vunpack.i.h.bf16 %v6614_v40  ;;  %v6615_v45 = vunpack.i.l.bf16 %v6614_v40  ;;  %v6621_v49 = vunpack.i.h.bf16 %v6619_v46  ;;  %v6620_v52 = vunpack.i.l.bf16 %v6619_v46 }
0x116e   : > { %6121 = vmatprep.subr.bf16.mxu1 %v7039_v12 }
0x116f   : > { %v6128_v48 = vpack.c.bf16 %v6616_v44, %v6615_v45  ;;  %v6131_v57 = vpack.c.bf16 %v6621_v49, %v6620_v52 }
0x1170   : > { %v6624_v55 = vpop.permute.xlu1 %6623 }
0x1171   : > { %6123 = vmatpush1.bf16.msra.mxu1 %v6122_v36  ;;  %v6626_v59 = vunpack.i.h.bf16 %v6624_v55  ;;  %v6625_v60 = vunpack.i.l.bf16 %v6624_v55 }
0x1172   : > { %6124 = vmatprep.subr.bf16.mxu1 %v7039_v12 }
0x1173   : > { %v6134_v61 = vpack.c.bf16 %v6626_v59, %v6625_v60 }
0x1175   : > { %6126 = vmatpush1.bf16.msra.mxu1 %v6125_v43 }
0x1176   : > { %6127 = vmatprep.subr.bf16.mxu1 %v7039_v12 }
0x1179   : > { %6129 = vmatpush1.bf16.msra.mxu1 %v6128_v48 }
0x117a   : > { %6130 = vmatprep.subr.bf16.mxu1 %v7039_v12 }
0x117d   : > { %6132 = vmatpush1.bf16.msra.mxu1 %v6131_v57  ;;  %v2966_v28 = vpop.permute.xlu0 %2965 }
0x117e   : > { %6133 = vmatprep.subr.bf16.mxu1 %v7039_v12 }
0x1181   : > { %6135 = vmatpush1.bf16.msra.mxu1 %v6134_v61  ;;  %v2971_v25 = vpop.permute.xlu1 %2970  ;;  %v2976_v26 = vpop.permute.xlu0 %2975 }
0x1182   : > { %6184 = vmatprep.subr.bf16.mxu1 %v7039_v12 }
0x1184   : > { %3072 = vmatmul.mubr.f32.vlgmr.msra.gmra.mrb[52].mxu1 %v5345_v62 }
0x1185   : > { %5374 = vmatprep.mubr.msk.f32.mxu1 %vm661_vm5, %v5348_v1  ;;  %v2981_v38 = vpop.permute.xlu1 %2980  ;;  %v2946_v40 = vpop.permute.xlu0 %2945 }
0x1188   : > { %3077 = vmatmul.mubr.f32.gmra.mrb[54].mxu1 %v5347_v51 }
0x1189   : > { %5375 = vmatprep.mubr.msk.f32.mxu1 %vm661_vm5, %v5350_v54  ;;  %v2951_v55 = vpop.permute.xlu1 %2950  ;;  %v2956_v61 = vpop.permute.xlu0 %2955 }
0x118c   : > { %3082 = vmatmul.mubr.f32.gmra.mrb[56].mxu1 %v5349_v3 }
0x118d   : > { %5376 = vmatprep.mubr.msk.f32.mxu1 %vm661_vm5, %v5352_v4  ;;  %v2961_v54 = vpop.permute.xlu1 %2960 }
0x1190   : > { %3087 = vmatmul.mubr.f32.gmra.mrb[58].mxu1 %v5351_v5 }
0x1191   : > { %5377 = vmatprep.mubr.msk.f32.mxu1 %vm661_vm5, %v5354_v6 }
0x1194   : > { %3092 = vmatmul.mubr.f32.gmra.mrb[60].mxu1 %v5353_v63 }
0x1195   : > { %5378 = vmatprep.mubr.msk.f32.mxu1 %vm661_vm5, %v5356_v16 }
0x1198   : > { %3097 = vmatmul.mubr.f32.gmra.mrb[62].mxu1 %v5355_v7 }
0x1199   : > { %5379 = vmatprep.mubr.msk.f32.mxu1 %vm661_vm5, %v5358_v8 }
0x119c   : > { %3102 = vmatmul.mubr.f32.gmra.mrb[64].mxu1 %v5357_v9 }
0x119d   : > { %5380 = vmatprep.mubr.msk.f32.mxu1 %vm661_vm5, %v5360_v10 }
0x11a0   : > { %3107 = vmatmul.mubr.f32.gmra.mrb[66].mxu1 %v5359_v11 }
0x11a1   : > { %5876 = vmatprep.mubr.msk.f32.mxu1 %vm7045_vm6, %v7046_v58 }
0x1257   : > { %v3073_v15 = vpop.f32.mrb[52].mxu1 }
0x1258   : > { %v3075_v17 = vpop.f32.mrb[53].mxu1  ;;  %v3074_v44 = vadd.f32 %v3073_v15, %v2946_v40 }
0x125b   : > { %v3078_v50 = vpop.f32.mrb[54].mxu1 }
0x125c   : > { %v3080_v18 = vpop.f32.mrb[55].mxu1  ;;  %v3079_v59 = vadd.f32 %v3078_v50, %v2951_v55 }
0x125f   : > { %v3083_v19 = vpop.f32.mrb[56].mxu1 }
0x1260   : > { %v3085_v21 = vpop.f32.mrb[57].mxu1  ;;  %v3084_v1 = vadd.f32 %v3083_v19, %v2956_v61 }
0x1263   : > { %v3088_v20 = vpop.f32.mrb[58].mxu1 }
0x1264   : > { %v3090_v22 = vpop.f32.mrb[59].mxu1  ;;  %v3089_v4 = vadd.f32 %v3088_v20, %v2961_v54  ;;  %v5386_v20 = vld [vmem:[%s8796_s6 + $0x108] sm:$0xff] }
0x1265   : > { %v5387_v22 = vld [vmem:[%s8796_s6 + $0x110] sm:$0xff] }
0x1267   : > { %v3093_v23 = vpop.f32.mrb[60].mxu1 }
0x1268   : > { %v3094_v39 = vadd.f32 %v3093_v23, %v2966_v28  ;;  %v3095_v56 = vpop.f32.mrb[61].mxu1  ;;  %v5388_v28 = vld [vmem:[%s8796_s6 + $0x118] sm:$0xff]  ;;  %v3170_v23 = vpop.permute.xlu1 %3169 }
0x126a   : > { %v5381_v24 = vmul.f32 -1.442695, %v3094_v39  ;;  %v3165_v39 = vpop.permute.xlu0 %3164 }
0x126b   : > { %v3098_v27 = vpop.f32.mrb[62].mxu1 }
0x126c   : > { %6873 = vpow2.f32 %v5381_v24  ;;  %v3099_v29 = vadd.f32 %v3098_v27, %v2971_v25  ;;  %v3100_v31 = vpop.f32.mrb[63].mxu1 }
0x126e   : > { %v5382_v33 = vmul.f32 -1.442695, %v3099_v29  ;;  %v3180_v29 = vpop.permute.xlu1 %3179 }
0x126f   : > { %v3103_v34 = vpop.f32.mrb[64].mxu1 }
0x1270   : > { %6875 = vpow2.f32 %v5382_v33  ;;  %v3104_v36 = vadd.f32 %v3103_v34, %v2976_v26  ;;  %v3105_v37 = vpop.f32.mrb[65].mxu1  ;;  %v3175_v34 = vpop.permute.xlu0 %3174 }
0x1272   : > { %v5383_v43 = vmul.f32 -1.442695, %v3104_v36 }
0x1273   : > { %v3108_v45 = vpop.f32.mrb[66].mxu1 }
0x1274   : > { %6877 = vpow2.f32 %v5383_v43  ;;  %v3109_v46 = vadd.f32 %v3108_v45, %v2981_v38  ;;  %v3110_v48 = vpop.f32.mrb[67].mxu1 }
0x1275   : > { %6879 = vtanh.f32 %v3074_v44 }
0x1276   : > { %v6874_v49 = vpop.eup %6873  ;;  %v5384_v52 = vmul.f32 -1.442695, %v3109_v46 }
0x1277   : > { %v3128_v57 = vadd.f32 1.0, %v6874_v49 }
0x1278   : > { %6881 = vpow2.f32 %v5384_v52 }
0x1279   : > { %6883 = vrcp.f32 %v3128_v57 }
0x127a   : > { %v6876_v60 = vpop.eup %6875  ;;  %6885 = vtanh.f32 %v3079_v59 }
0x127b   : > { %v3129_v62 = vadd.f32 1.0, %v6876_v60 }
0x127d   : > { %6887 = vrcp.f32 %v3129_v62 }
0x127e   : > { %v6878_v51 = vpop.eup %6877  ;;  %6889 = vtanh.f32 %v3084_v1 }
0x127f   : > { %v3130_v3 = vadd.f32 1.0, %v6878_v51  ;;  %v6880_v5 = vpop.eup %6879 }
0x1281   : > { %6891 = vrcp.f32 %v3130_v3 }
0x1282   : > { %v6882_v6 = vpop.eup %6881  ;;  %6893 = vtanh.f32 %v3089_v4 }
0x1283   : > { %v6884_v63 = vpop.eup %6883  ;;  %v3131_v16 = vadd.f32 1.0, %v6882_v6 }
0x1284   : > { %v3140_v7 = vmul.f32 %v6884_v63, %v6880_v5  ;;  %v6886_v8 = vpop.eup %6885  ;;  %v5389_v63 = vld [vmem:[%s8796_s6 + $0x120] sm:$0xff] }
0x1285   : > { %6895 = vrcp.f32 %v3131_v16  ;;  %v5390_v16 = vld [vmem:[%s8796_s6 + $0x128] sm:$0xff] }
0x1287   : > { %v6888_v9 = vpop.eup %6887 }
0x1288   : > { %v3141_v10 = vmul.f32 %v6888_v9, %v6886_v8  ;;  %v6890_v11 = vpop.eup %6889  ;;  %v5391_v8 = vld [vmem:[%s8796_s6 + $0x130] sm:$0xff]  ;;  %v5392_v9 = vld [vmem:[%s8796_s6 + $0x138] sm:$0xff] }
0x128a   : > { %v6136_v14 = vpack.c.bf16 %v3141_v10, %v3140_v7  ;;  %v5429_v7 = vld [vmem:[%s8795_s5 + $0x160] sm:$0xff]  ;;  %v5430_v10 = vld [vmem:[%s8795_s5 + $0x168] sm:$0xff] }
0x128b   : > { %v6892_v15 = vpop.eup %6891 }
0x128c   : > { %6137 = vmatprep.subr.bf16.mxu0 %v6136_v14  ;;  %v3142_v17 = vmul.f32 %v6892_v15, %v6890_v11  ;;  %v6894_v50 = vpop.eup %6893  ;;  %v5431_v11 = vld [vmem:[%s8795_s5 + $0x170] sm:$0xff]  ;;  %v5432_v15 = vld [vmem:[%s8795_s5 + $0x178] sm:$0xff] }
0x128d   : > { %6139 = vmatpush3.bf16.msra.mxu0 %v6136_v14  ;;  %v5410_v14 = vld [vmem:[%s8794_s4 + $0x288] sm:$0xff] }
0x128f   : > { %v6896_v18 = vpop.eup %6895 }
0x1290   : > { %v3143_v19 = vmul.f32 %v6896_v18, %v6894_v50  ;;  %v5426_v50 = vld [vmem:[%s8795_s5 + $0x148] sm:$0xff]  ;;  %v5427_v18 = vld [vmem:[%s8795_s5 + $0x150] sm:$0xff] }
0x1292   : > { %v6140_v21 = vpack.c.bf16 %v3143_v19, %v3142_v17  ;;  %v5425_v17 = vld [vmem:[%s8795_s5 + $0x140] sm:$0xff]  ;;  %v5428_v19 = vld [vmem:[%s8795_s5 + $0x158] sm:$0xff] }
0x1294   : > { %6141 = vmatprep.subr.bf16.mxu0 %v6140_v21 }
0x1295   : > { %6143 = vmatpush3.bf16.msra.mxu0 %v6140_v21  ;;  %v5397_v21 = vld [vmem:[%s8797_s7 + $0x120] sm:$0xff] }
0x1296   : > { %6144 = vmatprep.subr.bf16.mxu0 %v7039_v12 }
0x1298   : > { %5843 = vmatmul.mubr.msk.f32.vlgmr.msra.gmra.mrb[48].mxu0 %vm661_vm5, %v5386_v20  ;;  %v5398_v20 = vld [vmem:[%s8797_s7 + $0x128] sm:$0xff] }
0x1299   : > { %5845 = vmatprep.mubr.msk.f32.mxu0 %vm661_vm5, %v5387_v22  ;;  %v5453_v22 = vld [vmem:[%s8797_s7 + $0x140] sm:$0xff] }
0x129c   : > { %5846 = vmatmul.mubr.msk.f32.gmra.mrb[50].mxu0 %vm661_vm5, %v5388_v28  ;;  %v5454_v28 = vld [vmem:[%s8797_s7 + $0x148] sm:$0xff] }
0x129d   : > { %5848 = vmatprep.mubr.msk.f32.mxu0 %vm661_vm5, %v5389_v63 }
0x12a0   : > { %5849 = vmatmul.mubr.msk.f32.gmra.mrb[52].mxu0 %vm661_vm5, %v5390_v16  ;;  %v5409_v16 = vld [vmem:[%s8794_s4 + $0x280] sm:$0xff] }
0x12a1   : > { %5851 = vmatprep.mubr.msk.f32.mxu0 %vm661_vm5, %v5391_v8  ;;  %v5411_v8 = vld [vmem:[%s8794_s4 + $0x290] sm:$0xff] }
0x12a4   : > { %5852 = vmatmul.mubr.msk.f32.gmra.mrb[54].mxu0 %vm661_vm5, %v5392_v9  ;;  %v5414_v9 = vld [vmem:[%s8794_s4 + $0x2a8] sm:$0xff] }
0x12a5   : > { %5437 = vmatprep.mubr.msk.f32.mxu0 %vm661_vm5, %v5410_v14  ;;  %v5415_v14 = vld [vmem:[%s8794_s4 + $0x2b0] sm:$0xff] }
0x136b   : > { %v5844_v56 = vpop.f32.mrb[48].mxu0 }
0x136c   : > { %v3298_v24 = vadd.f32 %v5844_v56, %v3170_v23  ;;  %v3292_v25 = vpop.f32.mrb[49].mxu0  ;;  %v5399_v23 = vld [vmem:[%s8797_s7 + $0x130] sm:$0xff] }
0x136d   : > { %v3293_v27 = vadd.f32 %v3292_v25, %v3165_v39  ;;  %v5400_v39 = vld [vmem:[%s8797_s7 + $0x138] sm:$0xff]  ;;  %v5455_v56 = vld [vmem:[%s8797_s7 + $0x150] sm:$0xff]  ;;  %v5462_v25 = vld [vmem:[%s8799_s9 + $0x8] sm:$0xf] }
0x136e   : > { %v3332_v26 = vadd.f32 %v3298_v24, %v8012_v30  ;;  %v5456_v24 = vld [vmem:[%s8797_s7 + $0x158] sm:$0xff] }
0x136f   : > { %v3331_v31 = vadd.f32 %v3293_v27, %v8015_v32  ;;  %v5847_v33 = vpop.f32.mrb[50].mxu0  ;;  %v5468_v27 = vld [vmem:[%s8793_s3 + $0x60] sm:$0xff] }
0x1370   : > { %v3336_v36 = vmul.f32 %v7969_v2, %v3332_v26  ;;  %v3308_v37 = vadd.f32 %v5847_v33, %v3180_v29  ;;  %v3302_v38 = vpop.f32.mrb[51].mxu0  ;;  %v5469_v26 = vld [vmem:[%s8793_s3 + $0x68] sm:$0xff]  ;;  %v5470_v29 = vld [vmem:[%s8793_s3 + $0x70] sm:$0xff] }
0x1371   : > { %v3335_v40 = vmul.f32 %v7969_v2, %v3331_v31  ;;  %v3303_v43 = vadd.f32 %v3302_v38, %v3175_v34  ;;  %v5471_v31 = vld [vmem:[%s8793_s3 + $0x78] sm:$0xff] }
0x1372   : > { %v3334_v44 = vadd.f32 %v3308_v37, %v8020_v41 }
0x1373   : > { %v6627_v45 = vpack.i.bf16 %v3336_v36, %v3335_v40  ;;  %v3333_v46 = vadd.f32 %v3303_v43, %v8023_v42 }
0x1374   : > { %v3338_v48 = vmul.f32 %v7969_v2, %v3334_v44 }
0x1375   : > { %v3337_v30 = vmul.f32 %v7969_v2, %v3333_v46  ;;  %6628 = vrot.lane.b32.xlu0 %v6627_v45, %s8831_s28 }
0x1377   : > { %v6632_v32 = vpack.i.bf16 %v3338_v48, %v3337_v30 }
0x1379   : > { %6633 = vrot.lane.b32.xlu1 %v6632_v32, %s8831_s28 }
0x13e7   : > { %v6629_v49 = vpop.permute.xlu0 %6628 }
0x13e8   : > { %v6631_v52 = vunpack.i.h.bf16 %v6629_v49  ;;  %v6630_v55 = vunpack.i.l.bf16 %v6629_v49 }
0x13ea   : > { %v3360_v57 = vsel %vm535_vm2, 0.0, %v6631_v52  ;;  %v3359_v59 = vsel %vm535_vm2, 0.0, %v6630_v55 }
0x13eb   : > { %v3364_v41 = vsel %vm540_vm3, %v3360_v57, 0.0  ;;  %v3363_v42 = vsel %vm540_vm3, %v3359_v59, 0.0  ;;  %v6145_v60 = vpack.c.bf16 %v3360_v57, %v3359_v59  ;;  %v6634_v61 = vpop.permute.xlu1 %6633 }
0x13ec   : > { %v6636_v62 = vunpack.i.h.bf16 %v6634_v61  ;;  %v6635_v2 = vunpack.i.l.bf16 %v6634_v61  ;;  %v6637_v1 = vpack.i.bf16 %v3364_v41, %v3363_v42 }
0x13ed   : > { %6147 = vmatpush1.bf16.msk.msra.mxu0 %vm7224_vm4, %v6145_v60 }
0x13ee   : > { %v3362_v51 = vsel %vm535_vm2, 0.0, %v6636_v62  ;;  %v3361_v54 = vsel %vm535_vm2, 0.0, %v6635_v2  ;;  %6638 = vrot.lane.b32.xlu0 %v6637_v1, %s8832_s20  ;;  %6148 = vmatprep.subr.bf16.mxu0 %v7039_v12 }
0x13ef   : > { %v3366_v3 = vsel %vm540_vm3, %v3362_v51, 0.0  ;;  %v3365_v4 = vsel %vm540_vm3, %v3361_v54, 0.0  ;;  %v6149_v5 = vpack.c.bf16 %v3362_v51, %v3361_v54 }
0x13f0   : > { %v6642_v6 = vpack.i.bf16 %v3366_v3, %v3365_v4 }
0x13f1   : > { %6151 = vmatpush1.bf16.msk.msra.mxu0 %vm7224_vm4, %v6149_v5 }
0x13f2   : > { %6643 = vrot.lane.b32.xlu1 %v6642_v6, %s8832_s20  ;;  %6648 = vrot.lane.b32.xlu0 %v6637_v1, %s8833_s27 }
0x13f3   : > { %6152 = vmatprep.subr.bf16.mxu0 %v7039_v12 }
0x13f6   : > { %6653 = vrot.lane.b32.xlu1 %v6642_v6, %s8833_s27  ;;  %6658 = vrot.lane.b32.xlu0 %v6637_v1, %s8834_s30 }
0x13fa   : > { %6663 = vrot.lane.b32.xlu1 %v6642_v6, %s8834_s30  ;;  %6668 = vrot.lane.b32.xlu0 %v6637_v1, %s8835_s21 }
0x13fe   : > { %6673 = vrot.lane.b32.xlu1 %v6642_v6, %s8835_s21  ;;  %3467 = vperm.xlu0 %6375, %v5429_v7   ;;  %v5412_v7 = vld [vmem:[%s8794_s4 + $0x298] sm:$0xff] }
0x1402   : > { %3472 = vperm.xlu1 %6376, %v5430_v10   ;;  %3477 = vperm.xlu0 %6375, %v5431_v11   ;;  %v5413_v10 = vld [vmem:[%s8794_s4 + $0x2a0] sm:$0xff]  ;;  %v5416_v11 = vld [vmem:[%s8794_s4 + $0x2b8] sm:$0xff] }
0x1406   : > { %3482 = vperm.xlu1 %6376, %v5432_v15   ;;  %3447 = vperm.xlu0 %6375, %v5425_v17   ;;  %v5418_v15 = vld [vmem:[%s8794_s4 + $0x2c8] sm:$0xff]  ;;  %v5417_v17 = vld [vmem:[%s8794_s4 + $0x2c0] sm:$0xff] }
0x140a   : > { %3452 = vperm.xlu1 %6376, %v5426_v50   ;;  %3457 = vperm.xlu0 %6375, %v5427_v18   ;;  %v5420_v50 = vld [vmem:[%s8794_s4 + $0x2d8] sm:$0xff]  ;;  %v5419_v18 = vld [vmem:[%s8794_s4 + $0x2d0] sm:$0xff] }
0x140e   : > { %3462 = vperm.xlu1 %6376, %v5428_v19   ;;  %3184 = vperm.xlu0 %6375, %v5397_v21   ;;  %v5422_v19 = vld [vmem:[%s8794_s4 + $0x2e8] sm:$0xff]  ;;  %v5421_v21 = vld [vmem:[%s8794_s4 + $0x2e0] sm:$0xff] }
0x1412   : > { %3189 = vperm.xlu1 %6376, %v5398_v20   ;;  %3658 = vperm.xlu0 %6375, %v5453_v22   ;;  %v5424_v20 = vld [vmem:[%s8794_s4 + $0x2f8] sm:$0xff]  ;;  %v5423_v22 = vld [vmem:[%s8794_s4 + $0x2f0] sm:$0xff] }
0x1416   : > { %3663 = vperm.xlu1 %6376, %v5454_v28   ;;  %3194 = vperm.xlu0 %6375, %v5399_v23   ;;  %v5449_v28 = vld [vmem:[%s8796_s6 + $0x140] sm:$0xff] }
0x141a   : > { %3199 = vperm.xlu1 %6376, %v5400_v39   ;;  %3668 = vperm.xlu0 %6375, %v5455_v56  }
0x141e   : > { %3673 = vperm.xlu1 %6376, %v5456_v24   ;;  %3787 = vperm.xlu0 %6375, %v5462_v25  }
0x1422   : > { %3878 = vperm.xlu1 %6376, %v5468_v27   ;;  %3883 = vperm.xlu0 %6375, %v5469_v26  }
0x1426   : > { %3888 = vperm.xlu1 %6376, %v5470_v29   ;;  %3893 = vperm.xlu0 %6375, %v5471_v31  }
0x1460   : > { %v6639_v33 = vpop.permute.xlu0 %6638 }
0x1461   : > { %v6641_v34 = vunpack.i.h.bf16 %v6639_v33  ;;  %v6640_v36 = vunpack.i.l.bf16 %v6639_v33 }
0x1463   : > { %v6153_v37 = vpack.c.bf16 %v6641_v34, %v6640_v36 }
0x1464   : > { %v6644_v38 = vpop.permute.xlu1 %6643  ;;  %v6649_v40 = vpop.permute.xlu0 %6648 }
0x1465   : > { %v6646_v43 = vunpack.i.h.bf16 %v6644_v38  ;;  %v6645_v44 = vunpack.i.l.bf16 %v6644_v38  ;;  %6154 = vmatpush1.bf16.msra.mxu0 %v6153_v37  ;;  %v6651_v46 = vunpack.i.h.bf16 %v6649_v40  ;;  %v6650_v48 = vunpack.i.l.bf16 %v6649_v40 }
0x1466   : > { %6155 = vmatprep.subr.bf16.mxu0 %v7039_v12 }
0x1467   : > { %v6156_v45 = vpack.c.bf16 %v6646_v43, %v6645_v44  ;;  %v6159_v32 = vpack.c.bf16 %v6651_v46, %v6650_v48 }
0x1468   : > { %v6654_v30 = vpop.permute.xlu1 %6653  ;;  %v6659_v55 = vpop.permute.xlu0 %6658 }
0x1469   : > { %6157 = vmatpush1.bf16.msra.mxu0 %v6156_v45  ;;  %v6656_v49 = vunpack.i.h.bf16 %v6654_v30  ;;  %v6655_v52 = vunpack.i.l.bf16 %v6654_v30  ;;  %v6661_v59 = vunpack.i.h.bf16 %v6659_v55  ;;  %v6660_v41 = vunpack.i.l.bf16 %v6659_v55 }
0x146a   : > { %6158 = vmatprep.subr.bf16.mxu0 %v7039_v12 }
0x146b   : > { %v6162_v57 = vpack.c.bf16 %v6656_v49, %v6655_v52  ;;  %v6165_v60 = vpack.c.bf16 %v6661_v59, %v6660_v41 }
0x146c   : > { %v6664_v42 = vpop.permute.xlu1 %6663  ;;  %v6669_v2 = vpop.permute.xlu0 %6668 }
0x146d   : > { %6160 = vmatpush1.bf16.msra.mxu0 %v6159_v32  ;;  %v6666_v61 = vunpack.i.h.bf16 %v6664_v42  ;;  %v6665_v62 = vunpack.i.l.bf16 %v6664_v42  ;;  %v6671_v51 = vunpack.i.h.bf16 %v6669_v2  ;;  %v6670_v54 = vunpack.i.l.bf16 %v6669_v2 }
0x146e   : > { %6161 = vmatprep.subr.bf16.mxu0 %v7039_v12 }
0x146f   : > { %v6168_v1 = vpack.c.bf16 %v6666_v61, %v6665_v62  ;;  %v6171_v4 = vpack.c.bf16 %v6671_v51, %v6670_v54 }
0x1470   : > { %v6674_v3 = vpop.permute.xlu1 %6673 }
0x1471   : > { %6163 = vmatpush1.bf16.msra.mxu0 %v6162_v57  ;;  %v6676_v5 = vunpack.i.h.bf16 %v6674_v3  ;;  %v6675_v6 = vunpack.i.l.bf16 %v6674_v3 }
0x1472   : > { %6164 = vmatprep.subr.bf16.mxu0 %v7039_v12 }
0x1473   : > { %v6174_v63 = vpack.c.bf16 %v6676_v5, %v6675_v6 }
0x1475   : > { %6166 = vmatpush1.bf16.msra.mxu0 %v6165_v60 }
0x1476   : > { %6167 = vmatprep.subr.bf16.mxu0 %v7039_v12 }
0x1479   : > { %6169 = vmatpush1.bf16.msra.mxu0 %v6168_v1 }
0x147a   : > { %6170 = vmatprep.subr.bf16.mxu0 %v7039_v12 }
0x147d   : > { %6172 = vmatpush1.bf16.msra.mxu0 %v6171_v4  ;;  %v3468_v31 = vpop.permute.xlu0 %3467 }
0x147e   : > { %6173 = vmatprep.subr.bf16.mxu0 %v7039_v12 }
0x1481   : > { %6175 = vmatpush1.bf16.msra.mxu0 %v6174_v63  ;;  %v3473_v38 = vpop.permute.xlu1 %3472  ;;  %v3478_v43 = vpop.permute.xlu0 %3477 }
0x1484   : > { %3574 = vmatmul.mubr.f32.vlgmr.msra.gmra.mrb[56].mxu0 %v5409_v16 }
0x1485   : > { %5438 = vmatprep.mubr.msk.f32.mxu0 %vm661_vm5, %v5412_v7  ;;  %v3483_v49 = vpop.permute.xlu1 %3482  ;;  %v3448_v52 = vpop.permute.xlu0 %3447 }
0x1488   : > { %3579 = vmatmul.mubr.f32.gmra.mrb[58].mxu0 %v5411_v8 }
0x1489   : > { %5439 = vmatprep.mubr.msk.f32.mxu0 %vm661_vm5, %v5414_v9  ;;  %v3453_v62 = vpop.permute.xlu1 %3452  ;;  %v3458_v54 = vpop.permute.xlu0 %3457 }
0x148c   : > { %3584 = vmatmul.mubr.f32.gmra.mrb[60].mxu0 %v5413_v10 }
0x148d   : > { %5440 = vmatprep.mubr.msk.f32.mxu0 %vm661_vm5, %v5416_v11  ;;  %v3463_v6 = vpop.permute.xlu1 %3462 }
0x1490   : > { %3589 = vmatmul.mubr.f32.gmra.mrb[62].mxu0 %v5415_v14 }
0x1491   : > { %5441 = vmatprep.mubr.msk.f32.mxu0 %vm661_vm5, %v5418_v15 }
0x1494   : > { %3594 = vmatmul.mubr.f32.gmra.mrb[64].mxu0 %v5417_v17 }
0x1495   : > { %5442 = vmatprep.mubr.msk.f32.mxu0 %vm661_vm5, %v5420_v50 }
0x1498   : > { %3599 = vmatmul.mubr.f32.gmra.mrb[66].mxu0 %v5419_v18 }
0x1499   : > { %5443 = vmatprep.mubr.msk.f32.mxu0 %vm661_vm5, %v5422_v19 }
0x149c   : > { %3604 = vmatmul.mubr.f32.gmra.mrb[68].mxu0 %v5421_v21 }
0x149d   : > { %5444 = vmatprep.mubr.msk.f32.mxu0 %vm661_vm5, %v5424_v20 }
0x14a0   : > { %3609 = vmatmul.mubr.f32.gmra.mrb[70].mxu0 %v5423_v22 }
0x14a1   : > { %5862 = vmatprep.mubr.msk.f32.mxu0 %vm661_vm5, %v5449_v28 }
0x1557   : > { %v3575_v23 = vpop.f32.mrb[56].mxu0 }
0x1558   : > { %v3577_v39 = vpop.f32.mrb[57].mxu0  ;;  %v3576_v57 = vadd.f32 %v3575_v23, %v3448_v52 }
0x1559   : > { %v5450_v39 = vld [vmem:[%s8796_s6 + $0x148] sm:$0xff] }
0x155b   : > { %v3580_v56 = vpop.f32.mrb[58].mxu0 }
0x155c   : > { %v3582_v24 = vpop.f32.mrb[59].mxu0  ;;  %v3581_v1 = vadd.f32 %v3580_v56, %v3453_v62  ;;  %v5451_v56 = vld [vmem:[%s8796_s6 + $0x150] sm:$0xff]  ;;  %v5461_v62 = vld [vmem:[%s8798_s8 + $0x8] sm:$0xf] }
0x155d   : > { %v5452_v24 = vld [vmem:[%s8796_s6 + $0x158] sm:$0xff] }
0x155f   : > { %v3585_v25 = vpop.f32.mrb[60].mxu0 }
0x1560   : > { %v3587_v27 = vpop.f32.mrb[61].mxu0  ;;  %v3586_v4 = vadd.f32 %v3585_v25, %v3458_v54  ;;  %v3190_v25 = vpop.permute.xlu1 %3189 }
0x1561   : > { %v3185_v27 = vpop.permute.xlu0 %3184 }
0x1563   : > { %v3590_v26 = vpop.f32.mrb[62].mxu0 }
0x1564   : > { %v3592_v29 = vpop.f32.mrb[63].mxu0  ;;  %v3591_v16 = vadd.f32 %v3590_v26, %v3463_v6  ;;  %v3664_v26 = vpop.permute.xlu1 %3663 }
0x1565   : > { %v3659_v29 = vpop.permute.xlu0 %3658 }
0x1567   : > { %v3595_v33 = vpop.f32.mrb[64].mxu0 }
0x1568   : > { %v3596_v34 = vadd.f32 %v3595_v33, %v3468_v31  ;;  %v3597_v36 = vpop.f32.mrb[65].mxu0  ;;  %v3200_v31 = vpop.permute.xlu1 %3199 }
0x1569   : > { %v3195_v33 = vpop.permute.xlu0 %3194  ;;  %v6298_v36 = vadd.f32 %v3659_v29, %v3185_v27 }
0x156a   : > { %v5445_v37 = vmul.f32 -1.442695, %v3596_v34  ;;  %v6296_v34 = vadd.f32 %v3664_v26, %v3190_v25 }
0x156b   : > { %v3600_v40 = vpop.f32.mrb[66].mxu0 }
0x156c   : > { %6897 = vpow2.f32 %v5445_v37  ;;  %v3601_v44 = vadd.f32 %v3600_v40, %v3473_v38  ;;  %v3602_v45 = vpop.f32.mrb[67].mxu0  ;;  %v3674_v37 = vpop.permute.xlu1 %3673 }
0x156d   : > { %v3669_v40 = vpop.permute.xlu0 %3668 }
0x156e   : > { %v5446_v46 = vmul.f32 -1.442695, %v3601_v44 }
0x156f   : > { %v3605_v48 = vpop.f32.mrb[68].mxu0 }
0x1570   : > { %6899 = vpow2.f32 %v5446_v46  ;;  %v3606_v30 = vadd.f32 %v3605_v48, %v3478_v43  ;;  %v3607_v32 = vpop.f32.mrb[69].mxu0  ;;  %v6300_v46 = vadd.f32 %v3674_v37, %v3200_v31  ;;  %v8361_v48 = vld [vmem:[%s7195_s22] ss:$0 sm:$0xff] }
0x1571   : > { %v6302_v32 = vadd.f32 %v3669_v40, %v3195_v33 }
0x1572   : > { %v5447_v55 = vmul.f32 -1.442695, %v3606_v30 }
0x1573   : > { %v3610_v59 = vpop.f32.mrb[70].mxu0 }
0x1574   : > { %6901 = vpow2.f32 %v5447_v55  ;;  %v3611_v41 = vadd.f32 %v3610_v59, %v3483_v49  ;;  %v3612_v42 = vpop.f32.mrb[71].mxu0 }
0x1575   : > { %6903 = vtanh.f32 %v3576_v57 }
0x1576   : > { %v6898_v60 = vpop.eup %6897  ;;  %v5448_v61 = vmul.f32 -1.442695, %v3611_v41 }
0x1577   : > { %v3630_v2 = vadd.f32 1.0, %v6898_v60 }
0x1578   : > { %6905 = vpow2.f32 %v5448_v61 }
0x1579   : > { %6907 = vrcp.f32 %v3630_v2  ;;  %v5464_v2 = vld [vmem:[%s8792_s2 + $0x60] sm:$0xff] }
0x157a   : > { %v6900_v51 = vpop.eup %6899  ;;  %6909 = vtanh.f32 %v3581_v1  ;;  %v3788_v1 = vpop.permute.xlu0 %3787 }
0x157b   : > { %v3631_v3 = vadd.f32 1.0, %v6900_v51 }
0x157d   : > { %6911 = vrcp.f32 %v3631_v3 }
0x157e   : > { %v6902_v5 = vpop.eup %6901  ;;  %6913 = vtanh.f32 %v3586_v4 }
0x157f   : > { %v3632_v63 = vadd.f32 1.0, %v6902_v5  ;;  %v6904_v7 = vpop.eup %6903  ;;  %v3864_v5 = vmul.f32 %v7992_v53, %v7589_v13  ;;  %v5467_v13 = vld [vmem:[%s8792_s2 + $0x78] sm:$0xff]  ;;  %v3884_v53 = vpop.permute.xlu0 %3883 }
0x1581   : > { %6915 = vrcp.f32 %v3632_v63  ;;  %v5465_v63 = vld [vmem:[%s8792_s2 + $0x68] sm:$0xff] }
0x1582   : > { %v6906_v8 = vpop.eup %6905  ;;  %6917 = vtanh.f32 %v3591_v16  ;;  %v5466_v16 = vld [vmem:[%s8792_s2 + $0x70] sm:$0xff] }
0x1583   : > { %v6908_v9 = vpop.eup %6907  ;;  %v3633_v10 = vadd.f32 1.0, %v6906_v8 }
0x1584   : > { %v3642_v11 = vmul.f32 %v6908_v9, %v6904_v7  ;;  %v6910_v14 = vpop.eup %6909  ;;  %v3879_v7 = vpop.permute.xlu1 %3878 }
0x1585   : > { %6919 = vrcp.f32 %v3633_v10 }
0x1587   : > { %v6912_v15 = vpop.eup %6911 }
0x1588   : > { %v3643_v17 = vmul.f32 %v6912_v15, %v6910_v14  ;;  %v6914_v50 = vpop.eup %6913  ;;  %v3894_v15 = vpop.permute.xlu0 %3893 }
0x158a   : > { %v6176_v18 = vpack.c.bf16 %v3643_v17, %v3642_v11 }
0x158b   : > { %v6916_v19 = vpop.eup %6915 }
0x158c   : > { %6177 = vmatprep.subr.bf16.mxu0 %v6176_v18  ;;  %v3644_v21 = vmul.f32 %v6916_v19, %v6914_v50  ;;  %v6918_v20 = vpop.eup %6917 }
0x158d   : > { %6179 = vmatpush3.bf16.msra.mxu0 %v6176_v18  ;;  %v3889_v18 = vpop.permute.xlu1 %3888 }
0x158f   : > { %v6920_v22 = vpop.eup %6919 }
0x1590   : > { %v3645_v28 = vmul.f32 %v6920_v22, %v6918_v20 }
0x1592   : > { %v6180_v23 = vpack.c.bf16 %v3645_v28, %v3644_v21 }
0x1594   : > { %6181 = vmatprep.subr.bf16.mxu0 %v6180_v23 }
0x1595   : > { %6183 = vmatpush3.bf16.msra.mxu0 %v6180_v23 }
0x1598   : > { %5863 = vmatmul.mubr.msk.f32.vlgmr.msra.gmra.mrb[52].mxu0 %vm661_vm5, %v5450_v39 }
0x1599   : > { %5865 = vmatprep.mubr.msk.f32.mxu0 %vm661_vm5, %v5451_v56 }
0x159c   : > { %5866 = vmatmul.mubr.msk.f32.gmra.mrb[54].mxu0 %vm661_vm5, %v5452_v24 }
0x166b   : > { %v5864_v38 = vpop.f32.mrb[52].mxu0 }
0x166c   : > { %v6297_v43 = vadd.f32 %v6296_v34, %v5864_v38  ;;  %v3754_v44 = vpop.f32.mrb[53].mxu0 }
0x166d   : > { %v6299_v45 = vadd.f32 %v6298_v36, %v3754_v44 }
0x166e   : > { %v3778_v30 = vmul.f32 %v8361_v48, %v6297_v43 }
0x166f   : > { %v3777_v49 = vmul.f32 %v8361_v48, %v6299_v45  ;;  %v5867_v52 = vpop.f32.mrb[54].mxu0 }
0x1670   : > { %v6301_v55 = vadd.f32 %v6300_v46, %v5867_v52  ;;  %v3764_v57 = vpop.f32.mrb[55].mxu0  ;;  %v5478_v52 = vld [vmem:[%s8794_s4 + $0x308] sm:$0xff] }
0x1671   : > { %v6185_v59 = vpack.c.bf16 %v3778_v30, %v3777_v49  ;;  %v6303_v41 = vadd.f32 %v6302_v32, %v3764_v57  ;;  %v5497_v32 = vld [vmem:[%s8795_s5 + $0x1a0] sm:$0xff]  ;;  %v5499_v49 = vld [vmem:[%s8795_s5 + $0x1b0] sm:$0xff] }
0x1672   : > { %v3780_v42 = vmul.f32 %v8361_v48, %v6301_v55  ;;  %v5500_v55 = vld [vmem:[%s8795_s5 + $0x1b8] sm:$0xff]  ;;  %v5493_v57 = vld [vmem:[%s8795_s5 + $0x180] sm:$0xff] }
0x1673   : > { %v3779_v60 = vmul.f32 %v8361_v48, %v6303_v41  ;;  %6186 = vmatpush3.bf16.msra.mxu1 %v6185_v59  ;;  %v5494_v59 = vld [vmem:[%s8795_s5 + $0x188] sm:$0xff]  ;;  %v5495_v41 = vld [vmem:[%s8795_s5 + $0x190] sm:$0xff] }
0x1674   : > { %6187 = vmatprep.subr.bf16.mxu1 %v7039_v12 }
0x1675   : > { %v6188_v61 = vpack.c.bf16 %v3780_v42, %v3779_v60  ;;  %v5496_v42 = vld [vmem:[%s8795_s5 + $0x198] sm:$0xff]  ;;  %v5525_v60 = vld [vmem:[%s8797_s7 + $0x180] sm:$0xff] }
0x1677   : > { %6189 = vmatpush3.bf16.msra.mxu1 %v6188_v61  ;;  %v5526_v61 = vld [vmem:[%s8797_s7 + $0x188] sm:$0xff] }
0x167a   : > { %5877 = vmatmul.mubr.msk.f32.vlgmr.msra.gmra.mrb[68].mxu1 %vm661_vm5, %v5461_v62  ;;  %v5527_v62 = vld [vmem:[%s8797_s7 + $0x190] sm:$0xff] }
0x167b   : > { %5881 = vmatprep.mubr.msk.f32.mxu1 %vm413_vm0, %v5464_v2  ;;  %v5528_v2 = vld [vmem:[%s8797_s7 + $0x198] sm:$0xff] }
0x174d   : > { %v3859_v51 = vpop.f32.mrb[68].mxu1 }
0x174e   : > { %v3860_v54 = vadd.f32 %v3859_v51, %v3788_v1  ;;  %v5878_v3 = vpop.f32.mrb[69].mxu1 }
0x1750   : > { %v3863_v4 = vmul.f32 %v8361_v48, %v3860_v54 }
0x1752   : > { %v8379_v6 = vadd.f32 %v3864_v5, %v3863_v4 }
0x1754   : > { %5879 = vmatprep.subr.msk.mxu1 %vm426_vm1, %v8379_v6 }
0x1755   : > { %5880 = vmatpush3.msk.msra.mxu1 %vm426_vm1, %v8379_v6 }
0x1756   : > { %5882 = vmatmul.mubr.msk.f32.vlgmr.msra.gmra.mrb[70].mxu1 %vm413_vm0, %v5465_v63  ;;  %6190 = vmatprep.subr.bf16.mxu1 %v7039_v12 }
0x1757   : > { %5884 = vmatprep.mubr.msk.f32.mxu1 %vm413_vm0, %v5466_v16 }
0x175a   : > { %5885 = vmatmul.mubr.msk.f32.gmra.mrb[72].mxu1 %vm413_vm0, %v5467_v13 }
0x175b   : > { %5505 = vmatprep.mubr.msk.f32.mxu1 %vm661_vm5, %v5478_v52  ;;  %v5489_v52 = vld [vmem:[%s8794_s4 + $0x360] sm:$0xff] }
0x1829   : > { %v5883_v8 = vpop.f32.mrb[70].mxu1 }
0x182a   : > { %v3983_v9 = vadd.f32 %v5883_v8, %v3884_v53  ;;  %v3977_v10 = vpop.f32.mrb[71].mxu1 }
0x182b   : > { %v3978_v11 = vadd.f32 %v3977_v10, %v3879_v7 }
0x182c   : > { %v8399_v14 = vmul.f32 %v8361_v48, %v3983_v9 }
0x182d   : > { %v8402_v17 = vmul.f32 %v8361_v48, %v3978_v11  ;;  %v5886_v50 = vpop.f32.mrb[72].mxu1 }
0x182e   : > { %v3993_v19 = vadd.f32 %v5886_v50, %v3894_v15  ;;  %v3987_v21 = vpop.f32.mrb[73].mxu1 }
0x182f   : > { %v6677_v20 = vpack.i.bf16 %v8399_v14, %v8402_v17  ;;  %v3988_v22 = vadd.f32 %v3987_v21, %v3889_v18 }
0x1830   : > { %v8407_v28 = vmul.f32 %v8361_v48, %v3993_v19 }
0x1831   : > { %v8410_v23 = vmul.f32 %v8361_v48, %v3988_v22  ;;  %6678 = vrot.lane.b32.xlu1 %v6677_v20, %s8831_s28 }
0x1833   : > { %v6682_v39 = vpack.i.bf16 %v8407_v28, %v8410_v23 }
0x1835   : > { %6683 = vrot.lane.b32.xlu0 %v6682_v39, %s8831_s28 }
0x18a3   : > { %v6679_v56 = vpop.permute.xlu1 %6678 }
0x18a4   : > { %v6681_v24 = vunpack.i.h.bf16 %v6679_v56  ;;  %v6680_v25 = vunpack.i.l.bf16 %v6679_v56 }
0x18a6   : > { %v4017_v27 = vsel %vm535_vm2, 0.0, %v6681_v24  ;;  %v4016_v26 = vsel %vm535_vm2, 0.0, %v6680_v25 }
0x18a7   : > { %v4021_v29 = vsel %vm540_vm3, %v4017_v27, 0.0  ;;  %v4020_v31 = vsel %vm540_vm3, %v4016_v26, 0.0  ;;  %v6191_v33 = vpack.c.bf16 %v4017_v27, %v4016_v26  ;;  %v6684_v34 = vpop.permute.xlu0 %6683 }
0x18a8   : > { %v6686_v36 = vunpack.i.h.bf16 %v6684_v34  ;;  %v6685_v37 = vunpack.i.l.bf16 %v6684_v34  ;;  %v6687_v38 = vpack.i.bf16 %v4021_v29, %v4020_v31 }
0x18a9   : > { %6193 = vmatpush1.bf16.msk.msra.mxu1 %vm7224_vm4, %v6191_v33 }
0x18aa   : > { %v4019_v40 = vsel %vm535_vm2, 0.0, %v6686_v36  ;;  %v4018_v43 = vsel %vm535_vm2, 0.0, %v6685_v37  ;;  %6688 = vrot.lane.b32.xlu1 %v6687_v38, %s8832_s20  ;;  %6194 = vmatprep.subr.bf16.mxu1 %v7039_v12  ;;  %v5477_v36 = vld [vmem:[%s8794_s4 + $0x300] sm:$0xff]  ;;  %v5480_v37 = vld [vmem:[%s8794_s4 + $0x318] sm:$0xff] }
0x18ab   : > { %v4023_v44 = vsel %vm540_vm3, %v4019_v40, 0.0  ;;  %v4022_v45 = vsel %vm540_vm3, %v4018_v43, 0.0  ;;  %v6195_v46 = vpack.c.bf16 %v4019_v40, %v4018_v43  ;;  %v5482_v40 = vld [vmem:[%s8794_s4 + $0x328] sm:$0xff]  ;;  %v5481_v43 = vld [vmem:[%s8794_s4 + $0x320] sm:$0xff] }
0x18ac   : > { %v6692_v30 = vpack.i.bf16 %v4023_v44, %v4022_v45  ;;  %v5484_v44 = vld [vmem:[%s8794_s4 + $0x338] sm:$0xff]  ;;  %v5483_v45 = vld [vmem:[%s8794_s4 + $0x330] sm:$0xff] }
0x18ad   : > { %6197 = vmatpush1.bf16.msk.msra.mxu1 %vm7224_vm4, %v6195_v46  ;;  %v5486_v46 = vld [vmem:[%s8794_s4 + $0x348] sm:$0xff] }
0x18ae   : > { %6693 = vrot.lane.b32.xlu0 %v6692_v30, %s8832_s20  ;;  %6698 = vrot.lane.b32.xlu1 %v6687_v38, %s8833_s27 }
0x18af   : > { %6198 = vmatprep.subr.bf16.mxu1 %v7039_v12 }
0x18b2   : > { %6703 = vrot.lane.b32.xlu0 %v6692_v30, %s8833_s27  ;;  %6708 = vrot.lane.b32.xlu1 %v6687_v38, %s8834_s30 }
0x18b6   : > { %6713 = vrot.lane.b32.xlu0 %v6692_v30, %s8834_s30  ;;  %6718 = vrot.lane.b32.xlu1 %v6687_v38, %s8835_s21  ;;  %v5479_v38 = vld [vmem:[%s8794_s4 + $0x310] sm:$0xff]  ;;  %s8748_s30 = scalar_lea.hbm %s8800_s10, %s5597_s11 }
0x18ba   : > { %6723 = vrot.lane.b32.xlu0 %v6692_v30, %s8835_s21  ;;  %4124 = vperm.xlu1 %6376, %v5497_v32   ;;  %v5485_v30 = vld [vmem:[%s8794_s4 + $0x340] sm:$0xff]  ;;  %v5488_v32 = vld [vmem:[%s8794_s4 + $0x358] sm:$0xff] }
0x18be   : > { %4129 = vperm.xlu0 %6375, %v5498_v35   ;;  %4134 = vperm.xlu1 %6376, %v5499_v49   ;;  %v5487_v35 = vld [vmem:[%s8794_s4 + $0x350] sm:$0xff]  ;;  %v5490_v49 = vld [vmem:[%s8794_s4 + $0x368] sm:$0xff] }
0x18c2   : > { %4139 = vperm.xlu0 %6375, %v5500_v55   ;;  %4104 = vperm.xlu1 %6376, %v5493_v57   ;;  %v5492_v55 = vld [vmem:[%s8794_s4 + $0x378] sm:$0xff]  ;;  %v5491_v57 = vld [vmem:[%s8794_s4 + $0x370] sm:$0xff] }
0x18c6   : > { %4109 = vperm.xlu0 %6375, %v5494_v59   ;;  %4114 = vperm.xlu1 %6376, %v5495_v41   ;;  %v5517_v59 = vld [vmem:[%s8796_s6 + $0x180] sm:$0xff] }
0x18c7   : > { %5895 = vmatprep.mubr.msk.f32.mxu0 %vm661_vm5, %v5517_v59 }
0x18ca   : > { %4119 = vperm.xlu0 %6375, %v5496_v42   ;;  %4323 = vperm.xlu1 %6376, %v5525_v60  }
0x18ce   : > { %4328 = vperm.xlu0 %6375, %v5526_v61   ;;  %4333 = vperm.xlu1 %6376, %v5527_v62  }
0x18d2   : > { %4338 = vperm.xlu0 %6375, %v5528_v2  }
0x191c   : > { %v6689_v1 = vpop.permute.xlu1 %6688 }
0x191d   : > { %v6691_v51 = vunpack.i.h.bf16 %v6689_v1  ;;  %v6690_v54 = vunpack.i.l.bf16 %v6689_v1 }
0x191f   : > { %v6199_v3 = vpack.c.bf16 %v6691_v51, %v6690_v54 }
0x1920   : > { %v6694_v4 = vpop.permute.xlu0 %6693  ;;  %v6699_v5 = vpop.permute.xlu1 %6698 }
0x1921   : > { %v6696_v63 = vunpack.i.h.bf16 %v6694_v4  ;;  %v6695_v16 = vunpack.i.l.bf16 %v6694_v4  ;;  %6200 = vmatpush1.bf16.msra.mxu1 %v6199_v3  ;;  %v6701_v53 = vunpack.i.h.bf16 %v6699_v5  ;;  %v6700_v7 = vunpack.i.l.bf16 %v6699_v5 }
0x1922   : > { %6201 = vmatprep.subr.bf16.mxu1 %v7039_v12 }
0x1923   : > { %v6202_v13 = vpack.c.bf16 %v6696_v63, %v6695_v16  ;;  %v6205_v9 = vpack.c.bf16 %v6701_v53, %v6700_v7 }
0x1924   : > { %v6704_v8 = vpop.permute.xlu0 %6703  ;;  %v6709_v15 = vpop.permute.xlu1 %6708 }
0x1925   : > { %6203 = vmatpush1.bf16.msra.mxu1 %v6202_v13  ;;  %v6706_v10 = vunpack.i.h.bf16 %v6704_v8  ;;  %v6705_v11 = vunpack.i.l.bf16 %v6704_v8  ;;  %v6711_v18 = vunpack.i.h.bf16 %v6709_v15  ;;  %v6710_v19 = vunpack.i.l.bf16 %v6709_v15 }
0x1926   : > { %6204 = vmatprep.subr.bf16.mxu1 %v7039_v12 }
0x1927   : > { %v6208_v50 = vpack.c.bf16 %v6706_v10, %v6705_v11  ;;  %v6211_v20 = vpack.c.bf16 %v6711_v18, %v6710_v19 }
0x1928   : > { %v6714_v21 = vpop.permute.xlu0 %6713  ;;  %v6719_v56 = vpop.permute.xlu1 %6718 }
0x1929   : > { %6206 = vmatpush1.bf16.msra.mxu1 %v6205_v9  ;;  %v6716_v22 = vunpack.i.h.bf16 %v6714_v21  ;;  %v6715_v39 = vunpack.i.l.bf16 %v6714_v21  ;;  %v6721_v25 = vunpack.i.h.bf16 %v6719_v56  ;;  %v6720_v27 = vunpack.i.l.bf16 %v6719_v56 }
0x192a   : > { %6207 = vmatprep.subr.bf16.mxu1 %v7039_v12 }
0x192b   : > { %v6214_v24 = vpack.c.bf16 %v6716_v22, %v6715_v39  ;;  %v6217_v29 = vpack.c.bf16 %v6721_v25, %v6720_v27 }
0x192c   : > { %v6724_v26 = vpop.permute.xlu0 %6723 }
0x192d   : > { %6209 = vmatpush1.bf16.msra.mxu1 %v6208_v50  ;;  %v6726_v31 = vunpack.i.h.bf16 %v6724_v26  ;;  %v6725_v33 = vunpack.i.l.bf16 %v6724_v26 }
0x192e   : > { %6210 = vmatprep.subr.bf16.mxu1 %v7039_v12 }
0x192f   : > { %v6220_v34 = vpack.c.bf16 %v6726_v31, %v6725_v33 }
0x1931   : > { %6212 = vmatpush1.bf16.msra.mxu1 %v6211_v20 }
0x1932   : > { %6213 = vmatprep.subr.bf16.mxu1 %v7039_v12 }
0x1935   : > { %6215 = vmatpush1.bf16.msra.mxu1 %v6214_v24 }
0x1936   : > { %6216 = vmatprep.subr.bf16.mxu1 %v7039_v12 }
0x1939   : > { %6218 = vmatpush1.bf16.msra.mxu1 %v6217_v29  ;;  %v4125_v54 = vpop.permute.xlu1 %4124 }
0x193a   : > { %6219 = vmatprep.subr.bf16.mxu1 %v7039_v12 }
0x193d   : > { %6221 = vmatpush1.bf16.msra.mxu1 %v6220_v34  ;;  %v4135_v13 = vpop.permute.xlu1 %4134 }
0x193e   : > { %6270 = vmatprep.subr.bf16.mxu1 %v7039_v12 }
0x1940   : > { %4231 = vmatmul.mubr.f32.vlgmr.msra.gmra.mrb[74].mxu1 %v5477_v36 }
0x1941   : > { %5506 = vmatprep.mubr.msk.f32.mxu1 %vm661_vm5, %v5480_v37  ;;  %v4105_v50 = vpop.permute.xlu1 %4104 }
0x1944   : > { %4236 = vmatmul.mubr.f32.gmra.mrb[76].mxu1 %v5479_v38 }
0x1945   : > { %5507 = vmatprep.mubr.msk.f32.mxu1 %vm661_vm5, %v5482_v40  ;;  %v4115_v29 = vpop.permute.xlu1 %4114 }
0x1948   : > { %4241 = vmatmul.mubr.f32.gmra.mrb[78].mxu1 %v5481_v43 }
0x1949   : > { %5508 = vmatprep.mubr.msk.f32.mxu1 %vm661_vm5, %v5484_v44 }
0x194c   : > { %4246 = vmatmul.mubr.f32.gmra.mrb[80].mxu1 %v5483_v45 }
0x194d   : > { %5509 = vmatprep.mubr.msk.f32.mxu1 %vm661_vm5, %v5486_v46 }
0x1950   : > { %4251 = vmatmul.mubr.f32.gmra.mrb[82].mxu1 %v5485_v30 }
0x1951   : > { %5510 = vmatprep.mubr.msk.f32.mxu1 %vm661_vm5, %v5488_v32 }
0x1954   : > { %4256 = vmatmul.mubr.f32.gmra.mrb[84].mxu1 %v5487_v35 }
0x1955   : > { %5511 = vmatprep.mubr.msk.f32.mxu1 %vm661_vm5, %v5490_v49 }
0x1958   : > { %4261 = vmatmul.mubr.f32.gmra.mrb[86].mxu1 %v5489_v52 }
0x1959   : > { %5512 = vmatprep.mubr.msk.f32.mxu1 %vm661_vm5, %v5492_v55 }
0x195c   : > { %4266 = vmatmul.mubr.f32.gmra.mrb[88].mxu1 %v5491_v57 }
0x195d   : > { %5929 = vmatprep.mubr.msk.f32.mxu1 %vm7045_vm6, %v7046_v58  ;;  %v4130_v58 = vpop.permute.xlu0 %4129 }
0x1961   : > { %v4140_v15 = vpop.permute.xlu0 %4139 }
0x1965   : > { %v4110_v24 = vpop.permute.xlu0 %4109 }
0x1969   : > { %v4120_v36 = vpop.permute.xlu0 %4119 }
0x1a13   : > { %v4232_v41 = vpop.f32.mrb[74].mxu1 }
0x1a14   : > { %v4234_v42 = vpop.f32.mrb[75].mxu1  ;;  %v4233_v19 = vadd.f32 %v4232_v41, %v4105_v50 }
0x1a17   : > { %v4237_v60 = vpop.f32.mrb[76].mxu1 }
0x1a18   : > { %v4239_v61 = vpop.f32.mrb[77].mxu1  ;;  %v4238_v27 = vadd.f32 %v4237_v60, %v4110_v24 }
0x1a19   : > { %v5518_v61 = vld [vmem:[%s8796_s6 + $0x188] sm:$0xff] }
0x1a1b   : > { %v4242_v62 = vpop.f32.mrb[78].mxu1 }
0x1a1c   : > { %v4244_v2 = vpop.f32.mrb[79].mxu1  ;;  %v4243_v33 = vadd.f32 %v4242_v62, %v4115_v29  ;;  %v5519_v62 = vld [vmem:[%s8796_s6 + $0x190] sm:$0xff] }
0x1a1d   : > { %v5520_v2 = vld [vmem:[%s8796_s6 + $0x198] sm:$0xff] }
0x1a1f   : > { %v4247_v1 = vpop.f32.mrb[80].mxu1 }
0x1a20   : > { %v4249_v51 = vpop.f32.mrb[81].mxu1  ;;  %v4248_v38 = vadd.f32 %v4247_v1, %v4120_v36  ;;  %v4329_v1 = vpop.permute.xlu0 %4328 }
0x1a21   : > { %v4324_v51 = vpop.permute.xlu1 %4323 }
0x1a23   : > { %v4252_v3 = vpop.f32.mrb[82].mxu1 }
0x1a24   : > { %v4253_v4 = vadd.f32 %v4252_v3, %v4125_v54  ;;  %v4254_v5 = vpop.f32.mrb[83].mxu1 }
0x1a26   : > { %v5513_v63 = vmul.f32 -1.442695, %v4253_v4 }
0x1a27   : > { %v4257_v16 = vpop.f32.mrb[84].mxu1 }
0x1a28   : > { %6921 = vpow2.f32 %v5513_v63  ;;  %v4258_v53 = vadd.f32 %v4257_v16, %v4130_v58  ;;  %v4259_v7 = vpop.f32.mrb[85].mxu1  ;;  %v4339_v58 = vpop.permute.xlu0 %4338 }
0x1a2a   : > { %v5514_v8 = vmul.f32 -1.442695, %v4258_v53  ;;  %v4334_v53 = vpop.permute.xlu1 %4333 }
0x1a2b   : > { %v4262_v9 = vpop.f32.mrb[86].mxu1 }
0x1a2c   : > { %6923 = vpow2.f32 %v5514_v8  ;;  %v4263_v10 = vadd.f32 %v4262_v9, %v4135_v13  ;;  %v4264_v11 = vpop.f32.mrb[87].mxu1 }
0x1a2e   : > { %v5515_v18 = vmul.f32 -1.442695, %v4263_v10 }
0x1a2f   : > { %v4267_v21 = vpop.f32.mrb[88].mxu1 }
0x1a30   : > { %6925 = vpow2.f32 %v5515_v18  ;;  %v4268_v20 = vadd.f32 %v4267_v21, %v4140_v15  ;;  %v4269_v22 = vpop.f32.mrb[89].mxu1 }
0x1a31   : > { %6927 = vtanh.f32 %v4233_v19 }
0x1a32   : > { %v6922_v39 = vpop.eup %6921  ;;  %v5516_v56 = vmul.f32 -1.442695, %v4268_v20 }
0x1a33   : > { %v4287_v25 = vadd.f32 1.0, %v6922_v39 }
0x1a34   : > { %6929 = vpow2.f32 %v5516_v56 }
0x1a35   : > { %6931 = vrcp.f32 %v4287_v25 }
0x1a36   : > { %v6924_v26 = vpop.eup %6923  ;;  %6933 = vtanh.f32 %v4238_v27 }
0x1a37   : > { %v4288_v31 = vadd.f32 1.0, %v6924_v26 }
0x1a39   : > { %6935 = vrcp.f32 %v4288_v31 }
0x1a3a   : > { %v6926_v34 = vpop.eup %6925  ;;  %6937 = vtanh.f32 %v4243_v33 }
0x1a3b   : > { %v4289_v37 = vadd.f32 1.0, %v6926_v34  ;;  %v6928_v40 = vpop.eup %6927 }
0x1a3d   : > { %6939 = vrcp.f32 %v4289_v37 }
0x1a3e   : > { %v6930_v43 = vpop.eup %6929  ;;  %6941 = vtanh.f32 %v4248_v38  ;;  %v5521_v38 = vld [vmem:[%s8796_s6 + $0x1a0] sm:$0xff] }
0x1a3f   : > { %v6932_v44 = vpop.eup %6931  ;;  %v4290_v45 = vadd.f32 1.0, %v6930_v43  ;;  %v5523_v43 = vld [vmem:[%s8796_s6 + $0x1b0] sm:$0xff] }
0x1a40   : > { %v4299_v46 = vmul.f32 %v6932_v44, %v6928_v40  ;;  %v6934_v30 = vpop.eup %6933  ;;  %v5522_v40 = vld [vmem:[%s8796_s6 + $0x1a8] sm:$0xff]  ;;  %v5524_v44 = vld [vmem:[%s8796_s6 + $0x1b8] sm:$0xff] }
0x1a41   : > { %6943 = vrcp.f32 %v4290_v45  ;;  %v5562_v45 = vld [vmem:[%s8795_s5 + $0x1e8] sm:$0xff] }
0x1a43   : > { %v6936_v32 = vpop.eup %6935 }
0x1a44   : > { %v4300_v35 = vmul.f32 %v6936_v32, %v6934_v30  ;;  %v6938_v49 = vpop.eup %6937  ;;  %v5542_v30 = vld [vmem:[%s8794_s4 + $0x388] sm:$0xff]  ;;  %v5564_v32 = vld [vmem:[%s8795_s5 + $0x1f8] sm:$0xff] }
0x1a46   : > { %v6222_v52 = vpack.c.bf16 %v4300_v35, %v4299_v46  ;;  %v5563_v46 = vld [vmem:[%s8795_s5 + $0x1f0] sm:$0xff]  ;;  %v5557_v35 = vld [vmem:[%s8795_s5 + $0x1c0] sm:$0xff] }
0x1a47   : > { %v6940_v55 = vpop.eup %6939 }
0x1a48   : > { %6223 = vmatprep.subr.bf16.mxu0 %v6222_v52  ;;  %v4301_v57 = vmul.f32 %v6940_v55, %v6938_v49  ;;  %v6942_v59 = vpop.eup %6941  ;;  %v5558_v49 = vld [vmem:[%s8795_s5 + $0x1c8] sm:$0xff]  ;;  %v5560_v55 = vld [vmem:[%s8795_s5 + $0x1d8] sm:$0xff] }
0x1a49   : > { %6225 = vmatpush3.bf16.msra.mxu0 %v6222_v52  ;;  %v5559_v52 = vld [vmem:[%s8795_s5 + $0x1d0] sm:$0xff] }
0x1a4b   : > { %v6944_v41 = vpop.eup %6943 }
0x1a4c   : > { %v4302_v42 = vmul.f32 %v6944_v41, %v6942_v59  ;;  %v5530_v59 = vld [vmem:[%s8797_s7 + $0x1a8] sm:$0xff]  ;;  %v5585_v41 = vld [vmem:[%s8797_s7 + $0x1c0] sm:$0xff] }
0x1a4e   : > { %v6226_v60 = vpack.c.bf16 %v4302_v42, %v4301_v57  ;;  %v5529_v57 = vld [vmem:[%s8797_s7 + $0x1a0] sm:$0xff]  ;;  %v5586_v42 = vld [vmem:[%s8797_s7 + $0x1c8] sm:$0xff] }
0x1a50   : > { %6227 = vmatprep.subr.bf16.mxu0 %v6226_v60 }
0x1a51   : > { %6229 = vmatpush3.bf16.msra.mxu0 %v6226_v60  ;;  %v5531_v60 = vld [vmem:[%s8797_s7 + $0x1b0] sm:$0xff] }
0x1a52   : > { %6230 = vmatprep.subr.bf16.mxu0 %v7039_v12 }
0x1a54   : > { %5896 = vmatmul.mubr.msk.f32.vlgmr.msra.gmra.mrb[72].mxu0 %vm661_vm5, %v5518_v61  ;;  %v5532_v61 = vld [vmem:[%s8797_s7 + $0x1b8] sm:$0xff] }
0x1a55   : > { %5898 = vmatprep.mubr.msk.f32.mxu0 %vm661_vm5, %v5519_v62  ;;  %v5587_v62 = vld [vmem:[%s8797_s7 + $0x1d0] sm:$0xff] }
0x1a58   : > { %5899 = vmatmul.mubr.msk.f32.gmra.mrb[74].mxu0 %vm661_vm5, %v5520_v2  ;;  %v5588_v2 = vld [vmem:[%s8797_s7 + $0x1d8] sm:$0xff] }
0x1a59   : > { %5901 = vmatprep.mubr.msk.f32.mxu0 %vm661_vm5, %v5521_v38  ;;  %v5550_v38 = vld [vmem:[%s8794_s4 + $0x3c8] sm:$0xff] }
0x1a5c   : > { %5902 = vmatmul.mubr.msk.f32.gmra.mrb[76].mxu0 %vm661_vm5, %v5522_v40  ;;  %v5549_v40 = vld [vmem:[%s8794_s4 + $0x3c0] sm:$0xff] }
0x1a5d   : > { %5904 = vmatprep.mubr.msk.f32.mxu0 %vm661_vm5, %v5523_v43  ;;  %v5551_v43 = vld [vmem:[%s8794_s4 + $0x3d0] sm:$0xff] }
0x1a60   : > { %5905 = vmatmul.mubr.msk.f32.gmra.mrb[78].mxu0 %vm661_vm5, %v5524_v44  ;;  %v5554_v44 = vld [vmem:[%s8794_s4 + $0x3e8] sm:$0xff] }
0x1a61   : > { %5569 = vmatprep.mubr.msk.f32.mxu0 %vm661_vm5, %v5542_v30  ;;  %v5555_v30 = vld [vmem:[%s8794_s4 + $0x3f0] sm:$0xff] }
0x1b27   : > { %v5897_v54 = vpop.f32.mrb[72].mxu0 }
0x1b28   : > { %v4457_v3 = vadd.f32 %v5897_v54, %v4329_v1  ;;  %v4451_v4 = vpop.f32.mrb[73].mxu0  ;;  %v5594_v1 = vld [vmem:[%s8799_s9 + $0xc] sm:$0xf] }
0x1b29   : > { %v4452_v5 = vadd.f32 %v4451_v4, %v4324_v51 }
0x1b2a   : > { %v4491_v63 = vadd.f32 %v4457_v3, %v8399_v14 }
0x1b2b   : > { %v4490_v16 = vadd.f32 %v4452_v5, %v8402_v17  ;;  %v5900_v13 = vpop.f32.mrb[74].mxu0 }
0x1b2c   : > { %v4495_v7 = vmul.f32 %v8361_v48, %v4491_v63  ;;  %v4467_v8 = vadd.f32 %v5900_v13, %v4339_v58  ;;  %v4461_v9 = vpop.f32.mrb[75].mxu0 }
0x1b2d   : > { %v4494_v10 = vmul.f32 %v8361_v48, %v4490_v16  ;;  %v4462_v11 = vadd.f32 %v4461_v9, %v4334_v53 }
0x1b2e   : > { %v4493_v15 = vadd.f32 %v4467_v8, %v8407_v28 }
0x1b2f   : > { %v6727_v50 = vpack.i.bf16 %v4495_v7, %v4494_v10  ;;  %v4492_v18 = vadd.f32 %v4462_v11, %v8410_v23 }
0x1b30   : > { %v4497_v19 = vmul.f32 %v8361_v48, %v4493_v15 }
0x1b31   : > { %v4496_v14 = vmul.f32 %v8361_v48, %v4492_v18  ;;  %6728 = vrot.lane.b32.xlu1 %v6727_v50, %s7047_s26 }
0x1b33   : > { %v6732_v17 = vpack.i.bf16 %v4497_v19, %v4496_v14 }
0x1b35   : > { %6733 = vrot.lane.b32.xlu0 %v6732_v17, %s7047_s26  ;;  %s8838_s26 = smov 122  }
0x1ba3   : > { %v6729_v21 = vpop.permute.xlu1 %6728 }
0x1ba4   : > { %v6731_v20 = vunpack.i.h.bf16 %v6729_v21  ;;  %v6730_v22 = vunpack.i.l.bf16 %v6729_v21 }
0x1ba6   : > { %v4519_v39 = vsel %vm413_vm0, 0.0, %v6731_v20  ;;  %v4518_v56 = vsel %vm413_vm0, 0.0, %v6730_v22 }
0x1ba7   : > { %v4523_v28 = vsel %vm2200_vm8, %v4519_v39, 0.0  ;;  %v4522_v23 = vsel %vm2200_vm8, %v4518_v56, 0.0  ;;  %v6231_v24 = vpack.c.bf16 %v4519_v39, %v4518_v56  ;;  %v6734_v25 = vpop.permute.xlu0 %6733 }
0x1ba8   : > { %v6736_v27 = vunpack.i.h.bf16 %v6734_v25  ;;  %v6735_v48 = vunpack.i.l.bf16 %v6734_v25  ;;  %v6737_v26 = vpack.i.bf16 %v4523_v28, %v4522_v23 }
0x1ba9   : > { %6233 = vmatpush1.bf16.msk.msra.mxu0 %vm7786_vm9, %v6231_v24 }
0x1baa   : > { %v4521_v29 = vsel %vm413_vm0, 0.0, %v6736_v27  ;;  %v4520_v31 = vsel %vm413_vm0, 0.0, %v6735_v48  ;;  %6738 = vrot.lane.b32.xlu1 %v6737_v26, %s8833_s27  ;;  %6234 = vmatprep.subr.bf16.mxu0 %v7039_v12 }
0x1bab   : > { %v4525_v33 = vsel %vm2200_vm8, %v4521_v29, 0.0  ;;  %v4524_v34 = vsel %vm2200_vm8, %v4520_v31, 0.0  ;;  %v6235_v36 = vpack.c.bf16 %v4521_v29, %v4520_v31  ;;  %v5544_v29 = vld [vmem:[%s8794_s4 + $0x398] sm:$0xff]  ;;  %v5543_v31 = vld [vmem:[%s8794_s4 + $0x390] sm:$0xff] }
0x1bac   : > { %v6742_v37 = vpack.i.bf16 %v4525_v33, %v4524_v34  ;;  %v5546_v33 = vld [vmem:[%s8794_s4 + $0x3a8] sm:$0xff]  ;;  %v5545_v34 = vld [vmem:[%s8794_s4 + $0x3a0] sm:$0xff] }
0x1bad   : > { %6237 = vmatpush1.bf16.msk.msra.mxu0 %vm7786_vm9, %v6235_v36  ;;  %v5548_v36 = vld [vmem:[%s8794_s4 + $0x3b8] sm:$0xff] }
0x1bae   : > { %6743 = vrot.lane.b32.xlu0 %v6742_v37, %s8833_s27  ;;  %6748 = vrot.lane.b32.xlu1 %v6737_v26, %s8835_s21 }
0x1baf   : > { %6238 = vmatprep.subr.bf16.mxu0 %v7039_v12 }
0x1bb2   : > { %6753 = vrot.lane.b32.xlu0 %v6742_v37, %s8835_s21  ;;  %6758 = vrot.lane.b32.xlu1 %v6737_v26, %s8838_s26 }
0x1bb6   : > { %6763 = vrot.lane.b32.xlu0 %v6742_v37, %s8838_s26  ;;  %6768 = vrot.lane.b32.xlu1 %v6737_v26, %s8839_s0  ;;  %v5541_v26 = vld [vmem:[%s8794_s4 + $0x380] sm:$0xff]  ;;  %s6980_s26 = scalar_lea.vmem %s6979_s24, 128 }
0x1bba   : > { %6773 = vrot.lane.b32.xlu0 %v6742_v37, %s8839_s0  ;;  %4626 = vperm.xlu1 %6376, %v5561_v0   ;;  %v5547_v37 = vld [vmem:[%s8794_s4 + $0x3b0] sm:$0xff]  ;;  %v5552_v0 = vld [vmem:[%s8794_s4 + $0x3d8] sm:$0xff] }
0x1bbe   : > { %4631 = vperm.xlu0 %6375, %v5562_v45   ;;  %4636 = vperm.xlu1 %6376, %v5563_v46   ;;  %v5553_v45 = vld [vmem:[%s8794_s4 + $0x3e0] sm:$0xff]  ;;  %v5556_v46 = vld [vmem:[%s8794_s4 + $0x3f8] sm:$0xff] }
0x1bc2   : > { %4641 = vperm.xlu0 %6375, %v5564_v32   ;;  %4606 = vperm.xlu1 %6376, %v5557_v35   ;;  %v5581_v32 = vld [vmem:[%s8796_s6 + $0x1c0] sm:$0xff] }
0x1bc6   : > { %4611 = vperm.xlu0 %6375, %v5558_v49   ;;  %4616 = vperm.xlu1 %6376, %v5559_v52  }
0x1bca   : > { %4621 = vperm.xlu0 %6375, %v5560_v55   ;;  %4343 = vperm.xlu1 %6376, %v5529_v57  }
0x1bce   : > { %4348 = vperm.xlu0 %6375, %v5530_v59   ;;  %4817 = vperm.xlu1 %6376, %v5585_v41  }
0x1bd2   : > { %4822 = vperm.xlu0 %6375, %v5586_v42   ;;  %4353 = vperm.xlu1 %6376, %v5531_v60  }
0x1bd6   : > { %4358 = vperm.xlu0 %6375, %v5532_v61   ;;  %4827 = vperm.xlu1 %6376, %v5587_v62  }
0x1bda   : > { %4832 = vperm.xlu0 %6375, %v5588_v2   ;;  %4946 = vperm.xlu1 %6376, %v5594_v1  }
0x1c1c   : > { %v6739_v51 = vpop.permute.xlu1 %6738 }
0x1c1d   : > { %v6741_v54 = vunpack.i.h.bf16 %v6739_v51  ;;  %v6740_v3 = vunpack.i.l.bf16 %v6739_v51 }
0x1c1f   : > { %v6239_v4 = vpack.c.bf16 %v6741_v54, %v6740_v3 }
0x1c20   : > { %v6744_v5 = vpop.permute.xlu0 %6743  ;;  %v6749_v63 = vpop.permute.xlu1 %6748 }
0x1c21   : > { %v6746_v58 = vunpack.i.h.bf16 %v6744_v5  ;;  %v6745_v16 = vunpack.i.l.bf16 %v6744_v5  ;;  %6240 = vmatpush1.bf16.msra.mxu0 %v6239_v4  ;;  %v6751_v53 = vunpack.i.h.bf16 %v6749_v63  ;;  %v6750_v7 = vunpack.i.l.bf16 %v6749_v63 }
0x1c22   : > { %6241 = vmatprep.subr.bf16.mxu0 %v7039_v12 }
0x1c23   : > { %v6242_v13 = vpack.c.bf16 %v6746_v58, %v6745_v16  ;;  %v6245_v9 = vpack.c.bf16 %v6751_v53, %v6750_v7 }
0x1c24   : > { %v6754_v8 = vpop.permute.xlu0 %6753  ;;  %v6759_v15 = vpop.permute.xlu1 %6758 }
0x1c25   : > { %6243 = vmatpush1.bf16.msra.mxu0 %v6242_v13  ;;  %v6756_v10 = vunpack.i.h.bf16 %v6754_v8  ;;  %v6755_v11 = vunpack.i.l.bf16 %v6754_v8  ;;  %v6761_v18 = vunpack.i.h.bf16 %v6759_v15  ;;  %v6760_v19 = vunpack.i.l.bf16 %v6759_v15 }
0x1c26   : > { %6244 = vmatprep.subr.bf16.mxu0 %v7039_v12 }
0x1c27   : > { %v6248_v50 = vpack.c.bf16 %v6756_v10, %v6755_v11  ;;  %v6251_v17 = vpack.c.bf16 %v6761_v18, %v6760_v19 }
0x1c28   : > { %v6764_v14 = vpop.permute.xlu0 %6763  ;;  %v6769_v22 = vpop.permute.xlu1 %6768 }
0x1c29   : > { %6246 = vmatpush1.bf16.msra.mxu0 %v6245_v9  ;;  %v6766_v21 = vunpack.i.h.bf16 %v6764_v14  ;;  %v6765_v20 = vunpack.i.l.bf16 %v6764_v14  ;;  %v6771_v56 = vunpack.i.h.bf16 %v6769_v22  ;;  %v6770_v28 = vunpack.i.l.bf16 %v6769_v22 }
0x1c2a   : > { %6247 = vmatprep.subr.bf16.mxu0 %v7039_v12 }
0x1c2b   : > { %v6254_v39 = vpack.c.bf16 %v6766_v21, %v6765_v20  ;;  %v6257_v24 = vpack.c.bf16 %v6771_v56, %v6770_v28 }
0x1c2c   : > { %v6774_v23 = vpop.permute.xlu0 %6773 }
0x1c2d   : > { %6249 = vmatpush1.bf16.msra.mxu0 %v6248_v50  ;;  %v6776_v25 = vunpack.i.h.bf16 %v6774_v23  ;;  %v6775_v27 = vunpack.i.l.bf16 %v6774_v23 }
0x1c2e   : > { %6250 = vmatprep.subr.bf16.mxu0 %v7039_v12 }
0x1c2f   : > { %v6260_v48 = vpack.c.bf16 %v6776_v25, %v6775_v27 }
0x1c31   : > { %6252 = vmatpush1.bf16.msra.mxu0 %v6251_v17 }
0x1c32   : > { %6253 = vmatprep.subr.bf16.mxu0 %v7039_v12 }
0x1c35   : > { %6255 = vmatpush1.bf16.msra.mxu0 %v6254_v39 }
0x1c36   : > { %6256 = vmatprep.subr.bf16.mxu0 %v7039_v12 }
0x1c39   : > { %6258 = vmatpush1.bf16.msra.mxu0 %v6257_v24  ;;  %v4627_v60 = vpop.permute.xlu1 %4626 }
0x1c3a   : > { %6259 = vmatprep.subr.bf16.mxu0 %v7039_v12 }
0x1c3d   : > { %6261 = vmatpush1.bf16.msra.mxu0 %v6260_v48  ;;  %v4632_v51 = vpop.permute.xlu0 %4631  ;;  %v4637_v3 = vpop.permute.xlu1 %4636 }
0x1c40   : > { %4733 = vmatmul.mubr.f32.vlgmr.msra.gmra.mrb[80].mxu0 %v5541_v26 }
0x1c41   : > { %5570 = vmatprep.mubr.msk.f32.mxu0 %vm661_vm5, %v5544_v29  ;;  %v4642_v53 = vpop.permute.xlu0 %4641  ;;  %v4607_v7 = vpop.permute.xlu1 %4606 }
0x1c44   : > { %4738 = vmatmul.mubr.f32.gmra.mrb[82].mxu0 %v5543_v31 }
0x1c45   : > { %5571 = vmatprep.mubr.msk.f32.mxu0 %vm661_vm5, %v5546_v33  ;;  %v4612_v19 = vpop.permute.xlu0 %4611  ;;  %v4617_v20 = vpop.permute.xlu1 %4616 }
0x1c48   : > { %4743 = vmatmul.mubr.f32.gmra.mrb[84].mxu0 %v5545_v34 }
0x1c49   : > { %5572 = vmatprep.mubr.msk.f32.mxu0 %vm661_vm5, %v5548_v36  ;;  %v4622_v28 = vpop.permute.xlu0 %4621 }
0x1c4c   : > { %4748 = vmatmul.mubr.f32.gmra.mrb[86].mxu0 %v5547_v37 }
0x1c4d   : > { %5573 = vmatprep.mubr.msk.f32.mxu0 %vm661_vm5, %v5550_v38 }
0x1c50   : > { %4753 = vmatmul.mubr.f32.gmra.mrb[88].mxu0 %v5549_v40 }
0x1c51   : > { %5574 = vmatprep.mubr.msk.f32.mxu0 %vm661_vm5, %v5552_v0 }
0x1c54   : > { %4758 = vmatmul.mubr.f32.gmra.mrb[90].mxu0 %v5551_v43 }
0x1c55   : > { %5575 = vmatprep.mubr.msk.f32.mxu0 %vm661_vm5, %v5554_v44 }
0x1c58   : > { %4763 = vmatmul.mubr.f32.gmra.mrb[92].mxu0 %v5553_v45 }
0x1c59   : > { %5576 = vmatprep.mubr.msk.f32.mxu0 %vm661_vm5, %v5556_v46  ;;  %v5582_v46 = vld [vmem:[%s8796_s6 + $0x1c8] sm:$0xff] }
0x1c5c   : > { %4768 = vmatmul.mubr.f32.gmra.mrb[94].mxu0 %v5555_v30  ;;  %v5583_v30 = vld [vmem:[%s8796_s6 + $0x1d0] sm:$0xff] }
0x1c5d   : > { %5915 = vmatprep.mubr.msk.f32.mxu0 %vm661_vm5, %v5581_v32  ;;  %v5584_v32 = vld [vmem:[%s8796_s6 + $0x1d8] sm:$0xff] }
0x1d13   : > { %v4734_v35 = vpop.f32.mrb[80].mxu0 }
0x1d14   : > { %v4736_v49 = vpop.f32.mrb[81].mxu0  ;;  %v4735_v9 = vadd.f32 %v4734_v35, %v4607_v7  ;;  %v4349_v35 = vpop.permute.xlu0 %4348 }
0x1d15   : > { %v4344_v49 = vpop.permute.xlu1 %4343 }
0x1d17   : > { %v4739_v52 = vpop.f32.mrb[82].mxu0 }
0x1d18   : > { %v4741_v55 = vpop.f32.mrb[83].mxu0  ;;  %v4740_v17 = vadd.f32 %v4739_v52, %v4612_v19  ;;  %v4823_v52 = vpop.permute.xlu0 %4822 }
0x1d19   : > { %v4818_v55 = vpop.permute.xlu1 %4817 }
0x1d1b   : > { %v4744_v57 = vpop.f32.mrb[84].mxu0 }
0x1d1c   : > { %v4746_v59 = vpop.f32.mrb[85].mxu0  ;;  %v4745_v39 = vadd.f32 %v4744_v57, %v4617_v20  ;;  %v4359_v57 = vpop.permute.xlu0 %4358 }
0x1d1d   : > { %v4354_v59 = vpop.permute.xlu1 %4353 }
0x1d1f   : > { %v4749_v41 = vpop.f32.mrb[86].mxu0 }
0x1d20   : > { %v4751_v42 = vpop.f32.mrb[87].mxu0  ;;  %v4750_v24 = vadd.f32 %v4749_v41, %v4622_v28  ;;  %v6304_v41 = vadd.f32 %v4823_v52, %v4349_v35 }
0x1d21   : > { %v6306_v42 = vadd.f32 %v4818_v55, %v4344_v49 }
0x1d23   : > { %v4754_v61 = vpop.f32.mrb[88].mxu0 }
0x1d24   : > { %v4755_v62 = vadd.f32 %v4754_v61, %v4627_v60  ;;  %v4756_v2 = vpop.f32.mrb[89].mxu0  ;;  %v4833_v60 = vpop.permute.xlu0 %4832 }
0x1d26   : > { %v5577_v1 = vmul.f32 -1.442695, %v4755_v62  ;;  %v4828_v62 = vpop.permute.xlu1 %4827 }
0x1d27   : > { %v4759_v54 = vpop.f32.mrb[90].mxu0 }
0x1d28   : > { %6945 = vpow2.f32 %v5577_v1  ;;  %v4760_v4 = vadd.f32 %v4759_v54, %v4632_v51  ;;  %v4761_v5 = vpop.f32.mrb[91].mxu0  ;;  %v6308_v54 = vadd.f32 %v4833_v60, %v4359_v57 }
0x1d29   : > { %v6310_v5 = vadd.f32 %v4828_v62, %v4354_v59 }
0x1d2a   : > { %v5578_v63 = vmul.f32 -1.442695, %v4760_v4 }
0x1d2b   : > { %v4764_v58 = vpop.f32.mrb[92].mxu0 }
0x1d2c   : > { %6947 = vpow2.f32 %v5578_v63  ;;  %v4765_v16 = vadd.f32 %v4764_v58, %v4637_v3  ;;  %v4766_v13 = vpop.f32.mrb[93].mxu0  ;;  %v6973_v3 = vld [vmem:[%s7195_s22] ss:$0 sm:$0xff]  ;;  %s359_s22 = sand.u32 1, %s7028_s14  }
0x1d2d   : > { %s5113_s27 = sshll.u32 %s359_s22, 2  ;;  %s5028_s17 = scalar_lea.sflag [#allocation3], %s359_s22 }
0x1d2e   : > { %v5579_v8 = vmul.f32 -1.442695, %v4765_v16  ;;  %s361_s21 = scalar_lea.vmem [#allocation2], %s5113_s27 }
0x1d2f   : > { %v4769_v10 = vpop.f32.mrb[94].mxu0  ;;  %s5041_s1 = sshll.u32 %s361_s21, 4  ;;  %s8750_s1 = int_to_ptr.vmem [resolvable:$true] %s5041_s1 }
0x1d30   : > { %6949 = vpow2.f32 %v5579_v8  ;;  %v4770_v11 = vadd.f32 %v4769_v10, %v4642_v53  ;;  %v4771_v15 = vpop.f32.mrb[95].mxu0  ;;  %s6974_s19 = scalar_lea.vmem %s8750_s1, 64  ;;  %p6981_p0 = scmp.lt.s32.totalorder %s8750_s1, %s6979_s24 }
0x1d31   : > { %6951 = vtanh.f32 %v4735_v9  ;;  %v4947_v15 = vpop.permute.xlu1 %4946  ;;  %p6975_p11 = scmp.ne.s32.totalorder %s8750_s1, %s6974_s19  ;;  %p6982_p1 = scmp.lt.s32.totalorder %s6980_s26, %s6974_s19 }
0x1d32   : > { %v6946_v50 = vpop.eup %6945  ;;  %v5580_v18 = vmul.f32 -1.442695, %v4770_v11  ;;  %v5593_v11 = vld [vmem:[%s8798_s8 + $0xc] sm:$0xf] }
0x1d33   : > { %v4789_v14 = vadd.f32 1.0, %v6946_v50  ;;  %p6976_p12 = pnand %p6975_p11, %p7144_p5  ;;  %p6983_p2 = por %p6982_p1, %p6981_p0 }
0x1d34   : > { %6953 = vpow2.f32 %v5580_v18 }
0x1d35   : > { %6955 = vrcp.f32 %v4789_v14  ;;  %p6977_p13 = pneg %p6976_p12 }
0x1d36   : > { %v6948_v21 = vpop.eup %6947  ;;  %6957 = vtanh.f32 %v4740_v17 }
0x1d37   : > { %v4790_v22 = vadd.f32 1.0, %v6948_v21  ;;  %p6984_p3 = pnand %p6983_p2, %p6977_p13 }
0x1d39   : > { %6959 = vrcp.f32 %v4790_v22 }
0x1d3a   : > { %v6950_v56 = vpop.eup %6949  ;;  %6961 = vtanh.f32 %v4745_v39 }
0x1d3b   : > { %v4791_v23 = vadd.f32 1.0, %v6950_v56  ;;  %v6952_v25 = vpop.eup %6951 }
0x1d3d   : > { %6963 = vrcp.f32 %v4791_v23 }
0x1d3e   : > { %v6954_v27 = vpop.eup %6953  ;;  %6965 = vtanh.f32 %v4750_v24 }
0x1d3f   : > { %v6956_v48 = vpop.eup %6955  ;;  %v4792_v26 = vadd.f32 1.0, %v6954_v27 }
0x1d40   : > { %v4801_v29 = vmul.f32 %v6956_v48, %v6952_v25  ;;  %v6958_v31 = vpop.eup %6957 }
0x1d41   : > { %6967 = vrcp.f32 %v4792_v26 }
0x1d43   : > { %v6960_v33 = vpop.eup %6959 }
0x1d44   : > { %v4802_v34 = vmul.f32 %v6960_v33, %v6958_v31  ;;  %v6962_v36 = vpop.eup %6961 }
0x1d46   : > { %v6262_v37 = vpack.c.bf16 %v4802_v34, %v4801_v29 }
0x1d47   : > { %v6964_v38 = vpop.eup %6963 }
0x1d48   : > { %6263 = vmatprep.subr.bf16.mxu0 %v6262_v37  ;;  %v4803_v40 = vmul.f32 %v6964_v38, %v6962_v36  ;;  %v6966_v0 = vpop.eup %6965 }
0x1d49   : > { %6265 = vmatpush3.bf16.msra.mxu0 %v6262_v37 }
0x1d4b   : > { %v6968_v43 = vpop.eup %6967 }
0x1d4c   : > { %v4804_v44 = vmul.f32 %v6968_v43, %v6966_v0 }
0x1d4e   : > { %v6266_v45 = vpack.c.bf16 %v4804_v44, %v4803_v40 }
0x1d50   : > { %6267 = vmatprep.subr.bf16.mxu0 %v6266_v45 }
0x1d51   : > { %6269 = vmatpush3.bf16.msra.mxu0 %v6266_v45 }
0x1d54   : > { %5916 = vmatmul.mubr.msk.f32.vlgmr.msra.gmra.mrb[76].mxu0 %vm661_vm5, %v5582_v46 }
0x1d55   : > { %5918 = vmatprep.mubr.msk.f32.mxu0 %vm661_vm5, %v5583_v30 }
0x1d58   : > { %5919 = vmatmul.mubr.msk.f32.gmra.mrb[78].mxu0 %vm661_vm5, %v5584_v32 }
0x1e27   : > { %v5917_v61 = vpop.f32.mrb[76].mxu0 }
0x1e28   : > { %v6305_v2 = vadd.f32 %v6304_v41, %v5917_v61  ;;  %v4913_v1 = vpop.f32.mrb[77].mxu0 }
0x1e29   : > { %v6307_v51 = vadd.f32 %v6306_v42, %v4913_v1 }
0x1e2a   : > { %v4937_v4 = vmul.f32 %v6973_v3, %v6305_v2 }
0x1e2b   : > { %v4936_v63 = vmul.f32 %v6973_v3, %v6307_v51  ;;  %v5920_v58 = vpop.f32.mrb[78].mxu0 }
0x1e2c   : > { %v6309_v16 = vadd.f32 %v6308_v54, %v5920_v58  ;;  %v4923_v13 = vpop.f32.mrb[79].mxu0 }
0x1e2d   : > { %v6271_v53 = vpack.c.bf16 %v4937_v4, %v4936_v63  ;;  %v6311_v7 = vadd.f32 %v6310_v5, %v4923_v13 }
0x1e2e   : > { %v4939_v8 = vmul.f32 %v6973_v3, %v6309_v16 }
0x1e2f   : > { %v4938_v9 = vmul.f32 %v6973_v3, %v6311_v7  ;;  %6272 = vmatpush3.bf16.msra.mxu1 %v6271_v53 }
0x1e30   : > { %6273 = vmatprep.subr.bf16.mxu1 %v7039_v12  ;;  %v5023_v12 = vmul.f32 %v8379_v6, %v7987_v47 }
0x1e31   : > { %v6274_v10 = vpack.c.bf16 %v4939_v8, %v4938_v9 }
0x1e33   : > { %6275 = vmatpush3.bf16.msra.mxu1 %v6274_v10 }
0x1e36   : > { %5930 = vmatmul.mubr.msk.f32.vlgmr.msra.gmra.mrb[90].mxu1 %vm661_vm5, %v5593_v11 }
0x1f09   : > { %v5018_v50 = vpop.f32.mrb[90].mxu1 }
0x1f0a   : > { %v5019_v18 = vadd.f32 %v5018_v50, %v4947_v15  ;;  %v5931_v19 = vpop.f32.mrb[91].mxu1 }
0x1f0c   : > { %v5022_v14 = vmul.f32 %v6973_v3, %v5019_v18 }
0x1f0e   : > { %v5024_v17 = vadd.f32 %v5023_v12, %v5022_v14 }
0x1f10   : > { %5026 = vst.msk [vmem:[%s361_s21] sm:$0xf] %vm5025_vm11, %v5024_v17 }
0x1f11   : > { %6987 = shalt.err (!%p6984_p3)
}
0x1f12   : > { %s6988_s12 = scalar_lea.hbm %s8748_s30, 64  ;;  %s6992_s20 = scalar_lea.hbm %s8800_s10, 128 }
0x1f13   : > { %p6989_p4 = scmp.ne.s32.totalorder %s8748_s30, %s6988_s12  ;;  %p6993_p9 = scmp.lt.u32.totalorder %s8748_s30, %s8800_s10 }
0x1f14   : > { %p6994_p10 = scmp.lt.u32.totalorder %s6992_s20, %s6988_s12  ;;  %p6996_p12 = scmp.lt.u32.totalorder %s6988_s12, %s8748_s30 }
0x1f15   : > { %p6990_p7 = pnand %p6989_p4, %p7144_p5 }
0x1f16   : > { %p6995_p11 = por %p6994_p10, %p6993_p9 }
0x1f17   : > { %p6991_p8 = pneg %p6990_p7 }
0x1f18   : > { %p6997_p13 = por %p6996_p12, %p6995_p11 }
0x1f1a   : > { %p6998_p0 = pnand %p6997_p13, %p6991_p8 }
0x1f1c   : > { %7001 = shalt.err (!%p6998_p0)
}
0x1f1d   : > { %6324 = dma.vmem_to_hbm [thread:$0]  (%p7144_p5), %s8750_s1, 64, %s8748_s30, %s5028_s17  }
0x1f1e PF: > { %p6330_p1 = scmp.ge.s32.totalorder %s7036_s16, 2  ;;  %s5053_s11 = sand.u32 1, %s7024_s13  }
0x1f1f   : > { %s5054_s21 = scalar_lea.sflag [#allocation3], %s5053_s11 }
0x1f20   : > { %p6327_p2 = pnand %p6330_p1, %p7148_p6 }
0x1f22   : > { %7019 = dma.done.wait (!%p6327_p2), %s5054_s21, 64  }
0x1f23   : > { %7021 = vsyncadd (!%p6327_p2), %s5054_s21, 4294967232  ;;  %s8841_s16 = sld [smem:[#allocation6_spill]]  ;;  %s8842_s25 = sld [smem:[#allocation5_spill]] }
0x1f24   : > { %s8843_s15 = sld [smem:[#allocation7_spill]]  ;;  %s8844_s13 = smov %s7028_s14 }
0x1f29   : > { %p20_p3 = scmp.ge.s32.totalorder %s8841_s16, 4   ;;  %s8845_s14 = smov %s8842_s25 }
0x1f2b   :  { %22 = sbr.rel (!%p20_p3) target bundleno = 6 (0x6), region = 138 }
0x1f32   :  { %5059 = vsyncpa [#allocation3], 1 }
0x1f33   :  { %5061 = vsyncpa [#allocation3 + $0x1], 1 }

</bundles_post_ra>
